<compile_context>
chip_gen: v5e
topology: v5e:2x2
jax: 0.10.0
libtpu: 0.0.40
codegen_flags: <defaults>
</compile_context>

<pallas_src>
import functools

import jax
import jax.numpy as jnp
from jax.experimental import pallas as pl
from jax.experimental.pallas import tpu as pltpu


def _pick_tile(dim, prefs):
    for t in prefs:
        if t <= dim and dim % t == 0:
            return t
    return dim  # full extent (always divides; Mosaic allows full-dim blocks)


# ----------------------------------------------------------------------------
# Kernel 1: tiled linear  y = x @ W + b   (bf16 MXU inputs, f32 accumulation)
# Used for the feature-extractor stand-in AND the hoisted GRU input projection.
# ----------------------------------------------------------------------------
def _linear_kernel_accout(x_ref, w_ref, b_ref, o_ref):
    """f32 output: accumulate directly into the resident output tile."""
    @pl.when(pl.program_id(2) == 0)
    def _():
        o_ref[...] = jnp.broadcast_to(b_ref[...], o_ref.shape)

    o_ref[...] += jnp.dot(x_ref[...], w_ref[...],
                          preferred_element_type=jnp.float32)


def _linear_kernel_scratch(x_ref, w_ref, b_ref, o_ref, acc_ref):
    """Narrow (bf16) output: keep a f32 accumulator, cast once at the end."""
    @pl.when(pl.program_id(2) == 0)
    def _():
        acc_ref[...] = jnp.broadcast_to(b_ref[...], acc_ref.shape)

    acc_ref[...] += jnp.dot(x_ref[...], w_ref[...],
                            preferred_element_type=jnp.float32)

    @pl.when(pl.program_id(2) == pl.num_programs(2) - 1)
    def _():
        o_ref[...] = acc_ref[...].astype(o_ref.dtype)


def tiled_linear(x, w, b, out_dtype=jnp.float32):
    """x: (M, K) bf16; w: (K, N) bf16; b: (1, N) f32 -> (M, N) out_dtype."""
    M, K = x.shape
    Kw, N = w.shape
    assert K == Kw
    tm = _pick_tile(M, (256, 512, 128, 64, 32, 16, 8))
    tk = _pick_tile(K, (512, 256, 128))
    tn = _pick_tile(N, (1024, 512, 256, 128))
    grid = (M // tm, N // tn, K // tk)

    if out_dtype == jnp.float32:
        kernel = _linear_kernel_accout
        scratch = []
    else:
        kernel = _linear_kernel_scratch
        scratch = [pltpu.VMEM((tm, tn), jnp.float32)]

    return pl.pallas_call(
        kernel,
        out_shape=jax.ShapeDtypeStruct((M, N), out_dtype),
        grid_spec=pltpu.PrefetchScalarGridSpec(
            num_scalar_prefetch=0,
            grid=grid,
            in_specs=[
                pl.BlockSpec((tm, tk), lambda i, j, k: (i, k)),   # x tile (bf16)
                pl.BlockSpec((tk, tn), lambda i, j, k: (k, j)),   # W tile (bf16)
                pl.BlockSpec((1, tn), lambda i, j, k: (0, j)),    # bias tile
            ],
            out_specs=pl.BlockSpec((tm, tn), lambda i, j, k: (i, j)),
            scratch_shapes=scratch,
        ),
        compiler_params=pltpu.CompilerParams(
            dimension_semantics=("parallel", "parallel", "arbitrary")),
    )(x, w, b)


# ----------------------------------------------------------------------------
# Kernel 2: fused GRU recurrence — single invocation, whole sequence in VMEM.
#   gi_t already contains  x_t @ W_ih^T + b_ih + [b_hh_r, b_hh_z, 0]
#   per step:  gh = h @ W_hh^T
#              r = sigmoid(gi_r + gh_r) ; z = sigmoid(gi_z + gh_z)
#              n = tanh(gi_n + r * (gh_n + b_hh_n))
#              h = (1-z)*n + z*h ;  y = h (+ x residual)
# Layout stays batch-major: gi (B, T*3H), feat (B, T*H), y (B, T*H); the
# per-timestep slab is a static column slice — no transposes, no dynamic
# lane slicing, no per-step grid overhead.
# ----------------------------------------------------------------------------
def _gru_fused_kernel(*refs, hidden, seqlen, use_residual):
    if use_residual:
        gi_ref, whh_ref, bhn_ref, feat_ref, y_ref = refs
    else:
        gi_ref, whh_ref, bhn_ref, y_ref = refs
        feat_ref = None

    H = hidden
    B = y_ref.shape[0]

    # Hoisted (loop-invariant) broadcast of b_hh_n.
    bhn = jnp.broadcast_to(bhn_ref[...], (B, H))            # (B, H) f32

    h = jnp.zeros((B, H), jnp.float32)
    for t in range(seqlen):                                  # static unroll
        gi = gi_ref[:, t * 3 * H:(t + 1) * 3 * H]            # (B, 3H) f32
        gh = jnp.dot(h.astype(whh_ref.dtype), whh_ref[...],
                     preferred_element_type=jnp.float32)     # (B, 3H) f32

        r = jax.nn.sigmoid(gi[:, 0:H] + gh[:, 0:H])
        z = jax.nn.sigmoid(gi[:, H:2 * H] + gh[:, H:2 * H])
        n = jnp.tanh(gi[:, 2 * H:] + r * (gh[:, 2 * H:] + bhn))
        h = (1.0 - z) * n + z * h

        y = h
        if use_residual:
            y = y + feat_ref[:, t * H:(t + 1) * H].astype(jnp.float32)
        y_ref[:, t * H:(t + 1) * H] = y


def gru_recurrence(gi_bt, feat_bt, w_hh_t, b_hh_n, *, hidden, seqlen,
                   use_residual):
    B = gi_bt.shape[0]
    H = hidden
    T = seqlen

    kernel = functools.partial(_gru_fused_kernel, hidden=H, seqlen=T,
                               use_residual=use_residual)

    inputs = [gi_bt, w_hh_t, b_hh_n]
    if use_residual:
        inputs.append(feat_bt)

    # Gridless call: every input/output is a single full-array VMEM block, so
    # W_hh^T is resident (and single-buffered) for the whole recurrence.
    return pl.pallas_call(
        kernel,
        out_shape=jax.ShapeDtypeStruct((B, T * H), jnp.float32),
        compiler_params=pltpu.CompilerParams(
            vmem_limit_bytes=32 * 1024 * 1024),
    )(*inputs)


# ----------------------------------------------------------------------------
# Parameter preparation (one-time): bf16 matmul weights, folded biases.
# ----------------------------------------------------------------------------
def prepare_params(raw):
    H = raw["w_hh_t"].shape[0]
    # Fold b_hh_{r,z} into the hoisted projection bias; keep b_hh_n separate
    # (it is multiplied by r inside the recurrence).
    b_gi = raw["b_ih"].at[:, :2 * H].add(raw["b_hh"][:, :2 * H])
    return {
        "w_feat": raw["w_feat"].astype(jnp.bfloat16),
        "b_feat": raw["b_feat"].astype(jnp.float32),
        "w_ih_t": raw["w_ih_t"].astype(jnp.bfloat16),
        "w_hh_t": raw["w_hh_t"].astype(jnp.bfloat16),
        "b_gi": b_gi.astype(jnp.float32),
        "b_hh_n": raw["b_hh"][:, 2 * H:].astype(jnp.float32),
    }


# ----------------------------------------------------------------------------
# VIBE_Demo forward (feature extractor stand-in + TemporalEncoder)
# ----------------------------------------------------------------------------
def vibe_demo_forward(video, params, *, use_residual=True):
    """video: (B, T, nc, h, w) f32 -> encoded feature (B, T, H)."""
    B, T, nc, hh, ww = video.shape
    F = params["w_feat"].shape[1]
    H = params["w_hh_t"].shape[0]

    # hmr.feature_extractor(input.reshape(-1, nc, h, w)) -- stand-in linear.
    # LHS cast to bf16 hoisted here (once), feature emitted in bf16.
    x_flat = video.reshape(B * T, nc * hh * ww).astype(jnp.bfloat16)
    feature = tiled_linear(x_flat, params["w_feat"], params["b_feat"],
                           out_dtype=jnp.bfloat16)                    # (B*T, F)

    # Hoisted (time-independent) GRU input projection for all timesteps at once.
    gi = tiled_linear(feature, params["w_ih_t"], params["b_gi"],
                      out_dtype=jnp.float32)                          # (B*T, 3H)

    residual = bool(use_residual) and (H == F)   # mirrors `y.shape[-1] == 2048`
    y_bt = gru_recurrence(
        gi.reshape(B, T * 3 * H),            # free reshape (contiguous, batch-major)
        feature.reshape(B, T * F) if residual else None,
        params["w_hh_t"], params["b_hh_n"],
        hidden=H, seqlen=T, use_residual=residual)

    encoded = y_bt.reshape(B, T, H)          # free reshape, no transpose passes

    # TODO(synk): Regressor (SMPL) not provided; its theta/verts/kp_2d/kp_3d/
    # rotmat heads and the final per-output reshapes are omitted.
    return encoded


# ----------------------------------------------------------------------------
# Pure-JAX reference mirroring the kernel numerics (bf16 matmuls / bf16
# feature round-trip, f32 accumulation and gate math)
# ----------------------------------------------------------------------------
def _reference(video, raw, *, use_residual=True):
    B, T, nc, hh, ww = video.shape
    F = raw["w_feat"].shape[1]
    H = raw["w_hh_t"].shape[0]
    bf16 = jnp.bfloat16

    x_flat = video.reshape(B * T, nc * hh * ww).astype(bf16)
    feat_f32 = jnp.dot(x_flat, raw["w_feat"].astype(bf16),
                       preferred_element_type=jnp.float32) + raw["b_feat"]
    feat = feat_f32.astype(bf16)                         # kernel emits bf16 feature
    gi_all = jnp.dot(feat, raw["w_ih_t"].astype(bf16),
                     preferred_element_type=jnp.float32) + raw["b_ih"]

    feat_tn = jnp.transpose(feat.reshape(B, T, F), (1, 0, 2))
    gi_tn = jnp.transpose(gi_all.reshape(B, T, 3 * H), (1, 0, 2))
    w_hh_bf16 = raw["w_hh_t"].astype(bf16)
    residual = use_residual and (H == F)

    def step(h, inp):
        gi_t, x_t = inp
        gh = jnp.dot(h.astype(bf16), w_hh_bf16,
                     preferred_element_type=jnp.float32) + raw["b_hh"]
        r = jax.nn.sigmoid(gi_t[:, :H] + gh[:, :H])
        z = jax.nn.sigmoid(gi_t[:, H:2 * H] + gh[:, H:2 * H])
        n = jnp.tanh(gi_t[:, 2 * H:] + r * gh[:, 2 * H:])
        h_new = (1.0 - z) * n + z * h
        y = h_new + x_t.astype(jnp.float32) if residual else h_new
        return h_new, y

    h0 = jnp.zeros((B, H), jnp.float32)
    _, y_tnh = jax.lax.scan(step, h0, (gi_tn, feat_tn))
    return jnp.transpose(y_tnh, (1, 0, 2))


# ----------------------------------------------------------------------------
if __name__ == "__main__":
    # Small shapes consistent with the module's forward:
    #   input: (batch, seqlen, nc, h, w); F == hidden_size so the residual fires.
    # H = F = 128 stands in for 2048 (lane-aligned gates); B = 8 fills sublanes.
    B, T, nc, hh, ww = 8, 8, 3, 16, 16
    F = 128
    H = 128

    key = jax.random.PRNGKey(0)
    k_vid, k_wf, k_bf, k_wih, k_whh, k_bih, k_bhh = jax.random.split(key, 7)

    video = jax.random.normal(k_vid, (B, T, nc, hh, ww), jnp.float32)

    scale = float(1.0 / (H ** 0.5))
    raw = {
        "w_feat": jax.random.uniform(k_wf, (nc * hh * ww, F), jnp.float32,
                                     -0.02, 0.02),
        "b_feat": jax.random.uniform(k_bf, (1, F), jnp.float32, -0.02, 0.02),
        # GRU weights stored pre-transposed: W_ih^T (F, 3H), W_hh^T (H, 3H)
        "w_ih_t": jax.random.uniform(k_wih, (F, 3 * H), jnp.float32,
                                     -scale, scale),
        "w_hh_t": jax.random.uniform(k_whh, (H, 3 * H), jnp.float32,
                                     -scale, scale),
        "b_ih": jax.random.uniform(k_bih, (1, 3 * H), jnp.float32, -scale, scale),
        "b_hh": jax.random.uniform(k_bhh, (1, 3 * H), jnp.float32, -scale, scale),
    }

    params = prepare_params(raw)
    fwd = jax.jit(functools.partial(vibe_demo_forward, use_residual=True))
    out = jax.block_until_ready(fwd(video, params))

    ref = jax.block_until_ready(_reference(video, raw, use_residual=True))
    assert out.shape == (B, T, H), out.shape
    max_err = float(jnp.max(jnp.abs(out - ref)))
    assert jnp.allclose(out, ref, rtol=2e-2, atol=2e-2), max_err

    print("KERNEL_OK")
</pallas_src>

<mosaic_0001>
module attributes {stable_mosaic.version = 11 : i64} {
  func.func @_linear_kernel_scratch(%arg0: i32, %arg1: i32, %arg2: i32, %arg3: memref<64x256xbf16, #tpu.memory_space<vmem>>, %arg4: memref<256x128xbf16, #tpu.memory_space<vmem>>, %arg5: memref<1x128xf32, #tpu.memory_space<vmem>>, %arg6: memref<64x128xbf16, #tpu.memory_space<vmem>>, %arg7: memref<64x128xf32, #tpu.memory_space<vmem>>) attributes {dimension_semantics = [#tpu.dimension_semantics<parallel>, #tpu.dimension_semantics<parallel>, #tpu.dimension_semantics<arbitrary>], iteration_bounds = array<i64: 1, 1, 3>, scalar_prefetch = 0 : i64, scratch_operands = 1 : i64, tpu.core_type = #tpu.core_type<tc>, window_params = [{transform_indices = @transform_0, window_bounds = array<i64: 64, 256>}, {transform_indices = @transform_1, window_bounds = array<i64: 256, 128>}, {transform_indices = @transform_2, window_bounds = array<i64: 1, 128>}, {transform_indices = @transform_3, window_bounds = array<i64: 64, 128>}]} {
    %c0_i32 = arith.constant 0 : i32
    %0 = arith.cmpi eq, %arg2, %c0_i32 : i32
    %1 = arith.extui %0 : i1 to i32
    %c0_i32_0 = arith.constant 0 : i32
    %2 = arith.cmpi ne, %1, %c0_i32_0 : i32
    scf.if %2 {
      %c0_9 = arith.constant 0 : index
      %c0_10 = arith.constant 0 : index
      %12 = vector.load %arg5[%c0_9, %c0_10] : memref<1x128xf32, #tpu.memory_space<vmem>>, vector<1x128xf32>
      %13 = vector.shape_cast %12 : vector<1x128xf32> to vector<1x128xf32>
      %14 = vector.broadcast %13 : vector<1x128xf32> to vector<64x128xf32>
      %c0_11 = arith.constant 0 : index
      %c0_12 = arith.constant 0 : index
      %15 = vector.load %arg7[%c0_11, %c0_12] : memref<64x128xf32, #tpu.memory_space<vmem>>, vector<64x128xf32>
      tpu.vector_store %arg7[%c0_11, %c0_12], %14 {strides = array<i32>} : memref<64x128xf32, #tpu.memory_space<vmem>>, vector<64x128xf32>,
    } else {
    }
    %c0 = arith.constant 0 : index
    %c0_1 = arith.constant 0 : index
    %3 = vector.load %arg7[%c0, %c0_1] : memref<64x128xf32, #tpu.memory_space<vmem>>, vector<64x128xf32>
    %c0_2 = arith.constant 0 : index
    %c0_3 = arith.constant 0 : index
    %4 = vector.load %arg3[%c0_2, %c0_3] : memref<64x256xbf16, #tpu.memory_space<vmem>>, vector<64x256xbf16>
    %c0_4 = arith.constant 0 : index
    %c0_5 = arith.constant 0 : index
    %5 = vector.load %arg4[%c0_4, %c0_5] : memref<256x128xbf16, #tpu.memory_space<vmem>>, vector<256x128xbf16>
    %cst = arith.constant dense<0.000000e+00> : vector<64x128xf32>
    %6 = tpu.matmul %4, %5, %cst {dimension_numbers = #tpu.dot_dimension_numbers<[1], [0], [0], [1], [0, 0, 1, 1], [], []>} : vector<64x256xbf16>, vector<256x128xbf16>, vector<64x128xf32> -> vector<64x128xf32>
    %7 = arith.addf %3, %6 : vector<64x128xf32>
    %c0_6 = arith.constant 0 : index
    %c0_7 = arith.constant 0 : index
    %8 = vector.load %arg7[%c0_6, %c0_7] : memref<64x128xf32, #tpu.memory_space<vmem>>, vector<64x128xf32>
    tpu.vector_store %arg7[%c0_6, %c0_7], %7 {strides = array<i32>} : memref<64x128xf32, #tpu.memory_space<vmem>>, vector<64x128xf32>,
    %c2_i32 = arith.constant 2 : i32
    %9 = arith.cmpi eq, %arg2, %c2_i32 : i32
    %10 = arith.extui %9 : i1 to i32
    %c0_i32_8 = arith.constant 0 : i32
    %11 = arith.cmpi ne, %10, %c0_i32_8 : i32
    scf.if %11 {
      %c0_9 = arith.constant 0 : index
      %c0_10 = arith.constant 0 : index
      %12 = vector.load %arg7[%c0_9, %c0_10] : memref<64x128xf32, #tpu.memory_space<vmem>>, vector<64x128xf32>
      %13 = arith.truncf %12 : vector<64x128xf32> to vector<64x128xbf16>
      %c0_11 = arith.constant 0 : index
      %c0_12 = arith.constant 0 : index
      %14 = vector.load %arg6[%c0_11, %c0_12] : memref<64x128xbf16, #tpu.memory_space<vmem>>, vector<64x128xbf16>
      tpu.vector_store %arg6[%c0_11, %c0_12], %13 {strides = array<i32>} : memref<64x128xbf16, #tpu.memory_space<vmem>>, vector<64x128xbf16>,
    } else {
    }
    return
  }
  func.func @transform_0(%arg0: i32, %arg1: i32, %arg2: i32) -> (i32, i32) {
    %c0_i32 = arith.constant 0 : i32
    return %arg0, %arg2 : i32, i32
  }
  func.func @transform_1(%arg0: i32, %arg1: i32, %arg2: i32) -> (i32, i32) {
    %c0_i32 = arith.constant 0 : i32
    return %arg2, %arg1 : i32, i32
  }
  func.func @transform_2(%arg0: i32, %arg1: i32, %arg2: i32) -> (i32, i32) {
    %c0_i32 = arith.constant 0 : i32
    %c0_i32_0 = arith.constant 0 : i32
    return %c0_i32, %arg1 : i32, i32
  }
  func.func @transform_3(%arg0: i32, %arg1: i32, %arg2: i32) -> (i32, i32) {
    %c0_i32 = arith.constant 0 : i32
    return %arg0, %arg1 : i32, i32
  }
}

module attributes {stable_mosaic.version = 11 : i64} {
  func.func @_linear_kernel_accout(%arg0: i32, %arg1: i32, %arg2: i32, %arg3: memref<64x128xbf16, #tpu.memory_space<vmem>>, %arg4: memref<128x128xbf16, #tpu.memory_space<vmem>>, %arg5: memref<1x128xf32, #tpu.memory_space<vmem>>, %arg6: memref<64x128xf32, #tpu.memory_space<vmem>>) attributes {dimension_semantics = [#tpu.dimension_semantics<parallel>, #tpu.dimension_semantics<parallel>, #tpu.dimension_semantics<arbitrary>], iteration_bounds = array<i64: 1, 3, 1>, scalar_prefetch = 0 : i64, scratch_operands = 0 : i64, tpu.core_type = #tpu.core_type<tc>, window_params = [{transform_indices = @transform_0, window_bounds = array<i64: 64, 128>}, {transform_indices = @transform_1, window_bounds = array<i64: 128, 128>}, {transform_indices = @transform_2, window_bounds = array<i64: 1, 128>}, {transform_indices = @transform_3, window_bounds = array<i64: 64, 128>}]} {
    %c0_i32 = arith.constant 0 : i32
    %0 = arith.cmpi eq, %arg2, %c0_i32 : i32
    %1 = arith.extui %0 : i1 to i32
    %c0_i32_0 = arith.constant 0 : i32
    %2 = arith.cmpi ne, %1, %c0_i32_0 : i32
    scf.if %2 {
      %c0_8 = arith.constant 0 : index
      %c0_9 = arith.constant 0 : index
      %9 = vector.load %arg5[%c0_8, %c0_9] : memref<1x128xf32, #tpu.memory_space<vmem>>, vector<1x128xf32>
      %10 = vector.shape_cast %9 : vector<1x128xf32> to vector<1x128xf32>
      %11 = vector.broadcast %10 : vector<1x128xf32> to vector<64x128xf32>
      %c0_10 = arith.constant 0 : index
      %c0_11 = arith.constant 0 : index
      %12 = vector.load %arg6[%c0_10, %c0_11] : memref<64x128xf32, #tpu.memory_space<vmem>>, vector<64x128xf32>
      tpu.vector_store %arg6[%c0_10, %c0_11], %11 {strides = array<i32>} : memref<64x128xf32, #tpu.memory_space<vmem>>, vector<64x128xf32>,
    } else {
    }
    %c0 = arith.constant 0 : index
    %c0_1 = arith.constant 0 : index
    %3 = vector.load %arg6[%c0, %c0_1] : memref<64x128xf32, #tpu.memory_space<vmem>>, vector<64x128xf32>
    %c0_2 = arith.constant 0 : index
    %c0_3 = arith.constant 0 : index
    %4 = vector.load %arg3[%c0_2, %c0_3] : memref<64x128xbf16, #tpu.memory_space<vmem>>, vector<64x128xbf16>
    %c0_4 = arith.constant 0 : index
    %c0_5 = arith.constant 0 : index
    %5 = vector.load %arg4[%c0_4, %c0_5] : memref<128x128xbf16, #tpu.memory_space<vmem>>, vector<128x128xbf16>
    %cst = arith.constant dense<0.000000e+00> : vector<64x128xf32>
    %6 = tpu.matmul %4, %5, %cst {dimension_numbers = #tpu.dot_dimension_numbers<[1], [0], [0], [1], [0, 0, 1, 1], [], []>} : vector<64x128xbf16>, vector<128x128xbf16>, vector<64x128xf32> -> vector<64x128xf32>
    %7 = arith.addf %3, %6 : vector<64x128xf32>
    %c0_6 = arith.constant 0 : index
    %c0_7 = arith.constant 0 : index
    %8 = vector.load %arg6[%c0_6, %c0_7] : memref<64x128xf32, #tpu.memory_space<vmem>>, vector<64x128xf32>
    tpu.vector_store %arg6[%c0_6, %c0_7], %7 {strides = array<i32>} : memref<64x128xf32, #tpu.memory_space<vmem>>, vector<64x128xf32>,
    return
  }
  func.func @transform_0(%arg0: i32, %arg1: i32, %arg2: i32) -> (i32, i32) {
    %c0_i32 = arith.constant 0 : i32
    return %arg0, %arg2 : i32, i32
  }
  func.func @transform_1(%arg0: i32, %arg1: i32, %arg2: i32) -> (i32, i32) {
    %c0_i32 = arith.constant 0 : i32
    return %arg2, %arg1 : i32, i32
  }
  func.func @transform_2(%arg0: i32, %arg1: i32, %arg2: i32) -> (i32, i32) {
    %c0_i32 = arith.constant 0 : i32
    %c0_i32_0 = arith.constant 0 : i32
    return %c0_i32, %arg1 : i32, i32
  }
  func.func @transform_3(%arg0: i32, %arg1: i32, %arg2: i32) -> (i32, i32) {
    %c0_i32 = arith.constant 0 : i32
    return %arg0, %arg1 : i32, i32
  }
}

module attributes {stable_mosaic.version = 11 : i64} {
  func.func @_gru_fused_kernel(%arg0: memref<8x3072xf32, #tpu.memory_space<vmem>>, %arg1: memref<128x384xbf16, #tpu.memory_space<vmem>>, %arg2: memref<1x128xf32, #tpu.memory_space<vmem>>, %arg3: memref<8x1024xbf16, #tpu.memory_space<vmem>>, %arg4: memref<8x1024xf32, #tpu.memory_space<vmem>>) attributes {dimension_semantics = [], scalar_prefetch = 0 : i64, scratch_operands = 0 : i64, tpu.core_type = #tpu.core_type<tc>} {
    %c0 = arith.constant 0 : index
    %c0_0 = arith.constant 0 : index
    %0 = vector.load %arg2[%c0, %c0_0] : memref<1x128xf32, #tpu.memory_space<vmem>>, vector<1x128xf32>
    %1 = vector.shape_cast %0 : vector<1x128xf32> to vector<1x128xf32>
    %2 = vector.broadcast %1 : vector<1x128xf32> to vector<8x128xf32>
    %cst = arith.constant 0.000000e+00 : f32
    %3 = vector.broadcast %cst : f32 to vector<8x128xf32>
    %c0_1 = arith.constant 0 : index
    %c0_2 = arith.constant 0 : index
    %4 = vector.load %arg0[%c0_1, %c0_2] : memref<8x3072xf32, #tpu.memory_space<vmem>>, vector<8x384xf32>
    %5 = arith.truncf %3 : vector<8x128xf32> to vector<8x128xbf16>
    %c0_3 = arith.constant 0 : index
    %c0_4 = arith.constant 0 : index
    %6 = vector.load %arg1[%c0_3, %c0_4] : memref<128x384xbf16, #tpu.memory_space<vmem>>, vector<128x384xbf16>
    %cst_5 = arith.constant dense<0.000000e+00> : vector<8x384xf32>
    %7 = tpu.matmul %5, %6, %cst_5 {dimension_numbers = #tpu.dot_dimension_numbers<[1], [0], [0], [1], [0, 0, 1, 1], [], []>} : vector<8x128xbf16>, vector<128x384xbf16>, vector<8x384xf32> -> vector<8x384xf32>
    %8 = vector.extract_strided_slice %4 {offsets = [0, 0], sizes = [8, 128], strides = [1, 1]} : vector<8x384xf32> to vector<8x128xf32>
    %9 = vector.extract_strided_slice %7 {offsets = [0, 0], sizes = [8, 128], strides = [1, 1]} : vector<8x384xf32> to vector<8x128xf32>
    %10 = arith.addf %8, %9 : vector<8x128xf32>
    %11 = arith.negf %10 : vector<8x128xf32>
    %12 = math.exp %11 : vector<8x128xf32>
    %cst_6 = arith.constant 1.000000e+00 : f32
    %13 = vector.broadcast %cst_6 : f32 to vector<8x128xf32>
    %14 = arith.addf %13, %12 : vector<8x128xf32>
    %15 = arith.divf %13, %14 : vector<8x128xf32>
    %16 = vector.extract_strided_slice %4 {offsets = [0, 128], sizes = [8, 128], strides = [1, 1]} : vector<8x384xf32> to vector<8x128xf32>
    %17 = vector.extract_strided_slice %7 {offsets = [0, 128], sizes = [8, 128], strides = [1, 1]} : vector<8x384xf32> to vector<8x128xf32>
    %18 = arith.addf %16, %17 : vector<8x128xf32>
    %19 = arith.negf %18 : vector<8x128xf32>
    %20 = math.exp %19 : vector<8x128xf32>
    %cst_7 = arith.constant 1.000000e+00 : f32
    %21 = vector.broadcast %cst_7 : f32 to vector<8x128xf32>
    %22 = arith.addf %21, %20 : vector<8x128xf32>
    %23 = arith.divf %21, %22 : vector<8x128xf32>
    %24 = vector.extract_strided_slice %4 {offsets = [0, 256], sizes = [8, 128], strides = [1, 1]} : vector<8x384xf32> to vector<8x128xf32>
    %25 = vector.extract_strided_slice %7 {offsets = [0, 256], sizes = [8, 128], strides = [1, 1]} : vector<8x384xf32> to vector<8x128xf32>
    %26 = arith.addf %25, %2 : vector<8x128xf32>
    %27 = arith.mulf %15, %26 : vector<8x128xf32>
    %28 = arith.addf %24, %27 : vector<8x128xf32>
    %29 = math.tanh %28 : vector<8x128xf32>
    %cst_8 = arith.constant 1.000000e+00 : f32
    %30 = vector.broadcast %cst_8 : f32 to vector<8x128xf32>
    %31 = arith.subf %30, %23 : vector<8x128xf32>
    %32 = arith.mulf %31, %29 : vector<8x128xf32>
    %33 = arith.mulf %23, %3 : vector<8x128xf32>
    %34 = arith.addf %32, %33 : vector<8x128xf32>
    %c0_9 = arith.constant 0 : index
    %c0_10 = arith.constant 0 : index
    %35 = vector.load %arg3[%c0_9, %c0_10] : memref<8x1024xbf16, #tpu.memory_space<vmem>>, vector<8x128xbf16>
    %36 = arith.extf %35 : vector<8x128xbf16> to vector<8x128xf32>
    %37 = arith.addf %34, %36 : vector<8x128xf32>
    %c0_11 = arith.constant 0 : index
    %c0_12 = arith.constant 0 : index
    %38 = vector.load %arg4[%c0_11, %c0_12] : memref<8x1024xf32, #tpu.memory_space<vmem>>, vector<8x128xf32>
    tpu.vector_store %arg4[%c0_11, %c0_12], %37 {strides = array<i32>} : memref<8x1024xf32, #tpu.memory_space<vmem>>, vector<8x128xf32>,
    %c0_13 = arith.constant 0 : index
    %c384 = arith.constant 384 : index
    %39 = vector.load %arg0[%c0_13, %c384] : memref<8x3072xf32, #tpu.memory_space<vmem>>, vector<8x384xf32>
    %40 = arith.truncf %34 : vector<8x128xf32> to vector<8x128xbf16>
    %c0_14 = arith.constant 0 : index
    %c0_15 = arith.constant 0 : index
    %41 = vector.load %arg1[%c0_14, %c0_15] : memref<128x384xbf16, #tpu.memory_space<vmem>>, vector<128x384xbf16>
    %cst_16 = arith.constant dense<0.000000e+00> : vector<8x384xf32>
    %42 = tpu.matmul %40, %41, %cst_16 {dimension_numbers = #tpu.dot_dimension_numbers<[1], [0], [0], [1], [0, 0, 1, 1], [], []>} : vector<8x128xbf16>, vector<128x384xbf16>, vector<8x384xf32> -> vector<8x384xf32>
    %43 = vector.extract_strided_slice %39 {offsets = [0, 0], sizes = [8, 128], strides = [1, 1]} : vector<8x384xf32> to vector<8x128xf32>
    %44 = vector.extract_strided_slice %42 {offsets = [0, 0], sizes = [8, 128], strides = [1, 1]} : vector<8x384xf32> to vector<8x128xf32>
    %45 = arith.addf %43, %44 : vector<8x128xf32>
    %46 = arith.negf %45 : vector<8x128xf32>
    %47 = math.exp %46 : vector<8x128xf32>
    %cst_17 = arith.constant 1.000000e+00 : f32
    %48 = vector.broadcast %cst_17 : f32 to vector<8x128xf32>
    %49 = arith.addf %48, %47 : vector<8x128xf32>
    %50 = arith.divf %48, %49 : vector<8x128xf32>
    %51 = vector.extract_strided_slice %39 {offsets = [0, 128], sizes = [8, 128], strides = [1, 1]} : vector<8x384xf32> to vector<8x128xf32>
    %52 = vector.extract_strided_slice %42 {offsets = [0, 128], sizes = [8, 128], strides = [1, 1]} : vector<8x384xf32> to vector<8x128xf32>
    %53 = arith.addf %51, %52 : vector<8x128xf32>
    %54 = arith.negf %53 : vector<8x128xf32>
    %55 = math.exp %54 : vector<8x128xf32>
    %cst_18 = arith.constant 1.000000e+00 : f32
    %56 = vector.broadcast %cst_18 : f32 to vector<8x128xf32>
    %57 = arith.addf %56, %55 : vector<8x128xf32>
    %58 = arith.divf %56, %57 : vector<8x128xf32>
    %59 = vector.extract_strided_slice %39 {offsets = [0, 256], sizes = [8, 128], strides = [1, 1]} : vector<8x384xf32> to vector<8x128xf32>
    %60 = vector.extract_strided_slice %42 {offsets = [0, 256], sizes = [8, 128], strides = [1, 1]} : vector<8x384xf32> to vector<8x128xf32>
    %61 = arith.addf %60, %2 : vector<8x128xf32>
    %62 = arith.mulf %50, %61 : vector<8x128xf32>
    %63 = arith.addf %59, %62 : vector<8x128xf32>
    %64 = math.tanh %63 : vector<8x128xf32>
    %cst_19 = arith.constant 1.000000e+00 : f32
    %65 = vector.broadcast %cst_19 : f32 to vector<8x128xf32>
    %66 = arith.subf %65, %58 : vector<8x128xf32>
    %67 = arith.mulf %66, %64 : vector<8x128xf32>
    %68 = arith.mulf %58, %34 : vector<8x128xf32>
    %69 = arith.addf %67, %68 : vector<8x128xf32>
    %c0_20 = arith.constant 0 : index
    %c128 = arith.constant 128 : index
    %70 = vector.load %arg3[%c0_20, %c128] : memref<8x1024xbf16, #tpu.memory_space<vmem>>, vector<8x128xbf16>
    %71 = arith.extf %70 : vector<8x128xbf16> to vector<8x128xf32>
    %72 = arith.addf %69, %71 : vector<8x128xf32>
    %c0_21 = arith.constant 0 : index
    %c128_22 = arith.constant 128 : index
    %73 = vector.load %arg4[%c0_21, %c128_22] : memref<8x1024xf32, #tpu.memory_space<vmem>>, vector<8x128xf32>
    tpu.vector_store %arg4[%c0_21, %c128_22], %72 {strides = array<i32>} : memref<8x1024xf32, #tpu.memory_space<vmem>>, vector<8x128xf32>,
    %c0_23 = arith.constant 0 : index
    %c768 = arith.constant 768 : index
    %74 = vector.load %arg0[%c0_23, %c768] : memref<8x3072xf32, #tpu.memory_space<vmem>>, vector<8x384xf32>
    %75 = arith.truncf %69 : vector<8x128xf32> to vector<8x128xbf16>
    %c0_24 = arith.constant 0 : index
    %c0_25 = arith.constant 0 : index
    %76 = vector.load %arg1[%c0_24, %c0_25] : memref<128x384xbf16, #tpu.memory_space<vmem>>, vector<128x384xbf16>
    %cst_26 = arith.constant dense<0.000000e+00> : vector<8x384xf32>
    %77 = tpu.matmul %75, %76, %cst_26 {dimension_numbers = #tpu.dot_dimension_numbers<[1], [0], [0], [1], [0, 0, 1, 1], [], []>} : vector<8x128xbf16>, vector<128x384xbf16>, vector<8x384xf32> -> vector<8x384xf32>
    %78 = vector.extract_strided_slice %74 {offsets = [0, 0], sizes = [8, 128], strides = [1, 1]} : vector<8x384xf32> to vector<8x128xf32>
    %79 = vector.extract_strided_slice %77 {offsets = [0, 0], sizes = [8, 128], strides = [1, 1]} : vector<8x384xf32> to vector<8x128xf32>
    %80 = arith.addf %78, %79 : vector<8x128xf32>
    %81 = arith.negf %80 : vector<8x128xf32>
    %82 = math.exp %81 : vector<8x128xf32>
    %cst_27 = arith.constant 1.000000e+00 : f32
    %83 = vector.broadcast %cst_27 : f32 to vector<8x128xf32>
    %84 = arith.addf %83, %82 : vector<8x128xf32>
    %85 = arith.divf %83, %84 : vector<8x128xf32>
    %86 = vector.extract_strided_slice %74 {offsets = [0, 128], sizes = [8, 128], strides = [1, 1]} : vector<8x384xf32> to vector<8x128xf32>
    %87 = vector.extract_strided_slice %77 {offsets = [0, 128], sizes = [8, 128], strides = [1, 1]} : vector<8x384xf32> to vector<8x128xf32>
    %88 = arith.addf %86, %87 : vector<8x128xf32>
    %89 = arith.negf %88 : vector<8x128xf32>
    %90 = math.exp %89 : vector<8x128xf32>
    %cst_28 = arith.constant 1.000000e+00 : f32
    %91 = vector.broadcast %cst_28 : f32 to vector<8x128xf32>
    %92 = arith.addf %91, %90 : vector<8x128xf32>
    %93 = arith.divf %91, %92 : vector<8x128xf32>
    %94 = vector.extract_strided_slice %74 {offsets = [0, 256], sizes = [8, 128], strides = [1, 1]} : vector<8x384xf32> to vector<8x128xf32>
    %95 = vector.extract_strided_slice %77 {offsets = [0, 256], sizes = [8, 128], strides = [1, 1]} : vector<8x384xf32> to vector<8x128xf32>
    %96 = arith.addf %95, %2 : vector<8x128xf32>
    %97 = arith.mulf %85, %96 : vector<8x128xf32>
    %98 = arith.addf %94, %97 : vector<8x128xf32>
    %99 = math.tanh %98 : vector<8x128xf32>
    %cst_29 = arith.constant 1.000000e+00 : f32
    %100 = vector.broadcast %cst_29 : f32 to vector<8x128xf32>
    %101 = arith.subf %100, %93 : vector<8x128xf32>
    %102 = arith.mulf %101, %99 : vector<8x128xf32>
    %103 = arith.mulf %93, %69 : vector<8x128xf32>
    %104 = arith.addf %102, %103 : vector<8x128xf32>
    %c0_30 = arith.constant 0 : index
    %c256 = arith.constant 256 : index
    %105 = vector.load %arg3[%c0_30, %c256] : memref<8x1024xbf16, #tpu.memory_space<vmem>>, vector<8x128xbf16>
    %106 = arith.extf %105 : vector<8x128xbf16> to vector<8x128xf32>
    %107 = arith.addf %104, %106 : vector<8x128xf32>
    %c0_31 = arith.constant 0 : index
    %c256_32 = arith.constant 256 : index
    %108 = vector.load %arg4[%c0_31, %c256_32] : memref<8x1024xf32, #tpu.memory_space<vmem>>, vector<8x128xf32>
    tpu.vector_store %arg4[%c0_31, %c256_32], %107 {strides = array<i32>} : memref<8x1024xf32, #tpu.memory_space<vmem>>, vector<8x128xf32>,
    %c0_33 = arith.constant 0 : index
    %c1152 = arith.constant 1152 : index
    %109 = vector.load %arg0[%c0_33, %c1152] : memref<8x3072xf32, #tpu.memory_space<vmem>>, vector<8x384xf32>
    %110 = arith.truncf %104 : vector<8x128xf32> to vector<8x128xbf16>
    %c0_34 = arith.constant 0 : index
    %c0_35 = arith.constant 0 : index
    %111 = vector.load %arg1[%c0_34, %c0_35] : memref<128x384xbf16, #tpu.memory_space<vmem>>, vector<128x384xbf16>
    %cst_36 = arith.constant dense<0.000000e+00> : vector<8x384xf32>
    %112 = tpu.matmul %110, %111, %cst_36 {dimension_numbers = #tpu.dot_dimension_numbers<[1], [0], [0], [1], [0, 0, 1, 1], [], []>} : vector<8x128xbf16>, vector<128x384xbf16>, vector<8x384xf32> -> vector<8x384xf32>
    %113 = vector.extract_strided_slice %109 {offsets = [0, 0], sizes = [8, 128], strides = [1, 1]} : vector<8x384xf32> to vector<8x128xf32>
    %114 = vector.extract_strided_slice %112 {offsets = [0, 0], sizes = [8, 128], strides = [1, 1]} : vector<8x384xf32> to vector<8x128xf32>
    %115 = arith.addf %113, %114 : vector<8x128xf32>
    %116 = arith.negf %115 : vector<8x128xf32>
    %117 = math.exp %116 : vector<8x128xf32>
    %cst_37 = arith.constant 1.000000e+00 : f32
    %118 = vector.broadcast %cst_37 : f32 to vector<8x128xf32>
    %119 = arith.addf %118, %117 : vector<8x128xf32>
    %120 = arith.divf %118, %119 : vector<8x128xf32>
    %121 = vector.extract_strided_slice %109 {offsets = [0, 128], sizes = [8, 128], strides = [1, 1]} : vector<8x384xf32> to vector<8x128xf32>
    %122 = vector.extract_strided_slice %112 {offsets = [0, 128], sizes = [8, 128], strides = [1, 1]} : vector<8x384xf32> to vector<8x128xf32>
    %123 = arith.addf %121, %122 : vector<8x128xf32>
    %124 = arith.negf %123 : vector<8x128xf32>
    %125 = math.exp %124 : vector<8x128xf32>
    %cst_38 = arith.constant 1.000000e+00 : f32
    %126 = vector.broadcast %cst_38 : f32 to vector<8x128xf32>
    %127 = arith.addf %126, %125 : vector<8x128xf32>
    %128 = arith.divf %126, %127 : vector<8x128xf32>
    %129 = vector.extract_strided_slice %109 {offsets = [0, 256], sizes = [8, 128], strides = [1, 1]} : vector<8x384xf32> to vector<8x128xf32>
    %130 = vector.extract_strided_slice %112 {offsets = [0, 256], sizes = [8, 128], strides = [1, 1]} : vector<8x384xf32> to vector<8x128xf32>
    %131 = arith.addf %130, %2 : vector<8x128xf32>
    %132 = arith.mulf %120, %131 : vector<8x128xf32>
    %133 = arith.addf %129, %132 : vector<8x128xf32>
    %134 = math.tanh %133 : vector<8x128xf32>
    %cst_39 = arith.constant 1.000000e+00 : f32
    %135 = vector.broadcast %cst_39 : f32 to vector<8x128xf32>
    %136 = arith.subf %135, %128 : vector<8x128xf32>
    %137 = arith.mulf %136, %134 : vector<8x128xf32>
    %138 = arith.mulf %128, %104 : vector<8x128xf32>
    %139 = arith.addf %137, %138 : vector<8x128xf32>
    %c0_40 = arith.constant 0 : index
    %c384_41 = arith.constant 384 : index
    %140 = vector.load %arg3[%c0_40, %c384_41] : memref<8x1024xbf16, #tpu.memory_space<vmem>>, vector<8x128xbf16>
    %141 = arith.extf %140 : vector<8x128xbf16> to vector<8x128xf32>
    %142 = arith.addf %139, %141 : vector<8x128xf32>
    %c0_42 = arith.constant 0 : index
    %c384_43 = arith.constant 384 : index
    %143 = vector.load %arg4[%c0_42, %c384_43] : memref<8x1024xf32, #tpu.memory_space<vmem>>, vector<8x128xf32>
    tpu.vector_store %arg4[%c0_42, %c384_43], %142 {strides = array<i32>} : memref<8x1024xf32, #tpu.memory_space<vmem>>, vector<8x128xf32>,
    %c0_44 = arith.constant 0 : index
    %c1536 = arith.constant 1536 : index
    %144 = vector.load %arg0[%c0_44, %c1536] : memref<8x3072xf32, #tpu.memory_space<vmem>>, vector<8x384xf32>
    %145 = arith.truncf %139 : vector<8x128xf32> to vector<8x128xbf16>
    %c0_45 = arith.constant 0 : index
    %c0_46 = arith.constant 0 : index
    %146 = vector.load %arg1[%c0_45, %c0_46] : memref<128x384xbf16, #tpu.memory_space<vmem>>, vector<128x384xbf16>
    %cst_47 = arith.constant dense<0.000000e+00> : vector<8x384xf32>
    %147 = tpu.matmul %145, %146, %cst_47 {dimension_numbers = #tpu.dot_dimension_numbers<[1], [0], [0], [1], [0, 0, 1, 1], [], []>} : vector<8x128xbf16>, vector<128x384xbf16>, vector<8x384xf32> -> vector<8x384xf32>
    %148 = vector.extract_strided_slice %144 {offsets = [0, 0], sizes = [8, 128], strides = [1, 1]} : vector<8x384xf32> to vector<8x128xf32>
    %149 = vector.extract_strided_slice %147 {offsets = [0, 0], sizes = [8, 128], strides = [1, 1]} : vector<8x384xf32> to vector<8x128xf32>
    %150 = arith.addf %148, %149 : vector<8x128xf32>
    %151 = arith.negf %150 : vector<8x128xf32>
    %152 = math.exp %151 : vector<8x128xf32>
    %cst_48 = arith.constant 1.000000e+00 : f32
    %153 = vector.broadcast %cst_48 : f32 to vector<8x128xf32>
    %154 = arith.addf %153, %152 : vector<8x128xf32>
    %155 = arith.divf %153, %154 : vector<8x128xf32>
    %156 = vector.extract_strided_slice %144 {offsets = [0, 128], sizes = [8, 128], strides = [1, 1]} : vector<8x384xf32> to vector<8x128xf32>
    %157 = vector.extract_strided_slice %147 {offsets = [0, 128], sizes = [8, 128], strides = [1, 1]} : vector<8x384xf32> to vector<8x128xf32>
    %158 = arith.addf %156, %157 : vector<8x128xf32>
    %159 = arith.negf %158 : vector<8x128xf32>
    %160 = math.exp %159 : vector<8x128xf32>
    %cst_49 = arith.constant 1.000000e+00 : f32
    %161 = vector.broadcast %cst_49 : f32 to vector<8x128xf32>
    %162 = arith.addf %161, %160 : vector<8x128xf32>
    %163 = arith.divf %161, %162 : vector<8x128xf32>
    %164 = vector.extract_strided_slice %144 {offsets = [0, 256], sizes = [8, 128], strides = [1, 1]} : vector<8x384xf32> to vector<8x128xf32>
    %165 = vector.extract_strided_slice %147 {offsets = [0, 256], sizes = [8, 128], strides = [1, 1]} : vector<8x384xf32> to vector<8x128xf32>
    %166 = arith.addf %165, %2 : vector<8x128xf32>
    %167 = arith.mulf %155, %166 : vector<8x128xf32>
    %168 = arith.addf %164, %167 : vector<8x128xf32>
    %169 = math.tanh %168 : vector<8x128xf32>
    %cst_50 = arith.constant 1.000000e+00 : f32
    %170 = vector.broadcast %cst_50 : f32 to vector<8x128xf32>
    %171 = arith.subf %170, %163 : vector<8x128xf32>
    %172 = arith.mulf %171, %169 : vector<8x128xf32>
    %173 = arith.mulf %163, %139 : vector<8x128xf32>
    %174 = arith.addf %172, %173 : vector<8x128xf32>
    %c0_51 = arith.constant 0 : index
    %c512 = arith.constant 512 : index
    %175 = vector.load %arg3[%c0_51, %c512] : memref<8x1024xbf16, #tpu.memory_space<vmem>>, vector<8x128xbf16>
    %176 = arith.extf %175 : vector<8x128xbf16> to vector<8x128xf32>
    %177 = arith.addf %174, %176 : vector<8x128xf32>
    %c0_52 = arith.constant 0 : index
    %c512_53 = arith.constant 512 : index
    %178 = vector.load %arg4[%c0_52, %c512_53] : memref<8x1024xf32, #tpu.memory_space<vmem>>, vector<8x128xf32>
    tpu.vector_store %arg4[%c0_52, %c512_53], %177 {strides = array<i32>} : memref<8x1024xf32, #tpu.memory_space<vmem>>, vector<8x128xf32>,
    %c0_54 = arith.constant 0 : index
    %c1920 = arith.constant 1920 : index
    %179 = vector.load %arg0[%c0_54, %c1920] : memref<8x3072xf32, #tpu.memory_space<vmem>>, vector<8x384xf32>
    %180 = arith.truncf %174 : vector<8x128xf32> to vector<8x128xbf16>
    %c0_55 = arith.constant 0 : index
    %c0_56 = arith.constant 0 : index
    %181 = vector.load %arg1[%c0_55, %c0_56] : memref<128x384xbf16, #tpu.memory_space<vmem>>, vector<128x384xbf16>
    %cst_57 = arith.constant dense<0.000000e+00> : vector<8x384xf32>
    %182 = tpu.matmul %180, %181, %cst_57 {dimension_numbers = #tpu.dot_dimension_numbers<[1], [0], [0], [1], [0, 0, 1, 1], [], []>} : vector<8x128xbf16>, vector<128x384xbf16>, vector<8x384xf32> -> vector<8x384xf32>
    %183 = vector.extract_strided_slice %179 {offsets = [0, 0], sizes = [8, 128], strides = [1, 1]} : vector<8x384xf32> to vector<8x128xf32>
    %184 = vector.extract_strided_slice %182 {offsets = [0, 0], sizes = [8, 128], strides = [1, 1]} : vector<8x384xf32> to vector<8x128xf32>
    %185 = arith.addf %183, %184 : vector<8x128xf32>
    %186 = arith.negf %185 : vector<8x128xf32>
    %187 = math.exp %186 : vector<8x128xf32>
    %cst_58 = arith.constant 1.000000e+00 : f32
    %188 = vector.broadcast %cst_58 : f32 to vector<8x128xf32>
    %189 = arith.addf %188, %187 : vector<8x128xf32>
    %190 = arith.divf %188, %189 : vector<8x128xf32>
    %191 = vector.extract_strided_slice %179 {offsets = [0, 128], sizes = [8, 128], strides = [1, 1]} : vector<8x384xf32> to vector<8x128xf32>
    %192 = vector.extract_strided_slice %182 {offsets = [0, 128], sizes = [8, 128], strides = [1, 1]} : vector<8x384xf32> to vector<8x128xf32>
    %193 = arith.addf %191, %192 : vector<8x128xf32>
    %194 = arith.negf %193 : vector<8x128xf32>
    %195 = math.exp %194 : vector<8x128xf32>
    %cst_59 = arith.constant 1.000000e+00 : f32
    %196 = vector.broadcast %cst_59 : f32 to vector<8x128xf32>
    %197 = arith.addf %196, %195 : vector<8x128xf32>
    %198 = arith.divf %196, %197 : vector<8x128xf32>
    %199 = vector.extract_strided_slice %179 {offsets = [0, 256], sizes = [8, 128], strides = [1, 1]} : vector<8x384xf32> to vector<8x128xf32>
    %200 = vector.extract_strided_slice %182 {offsets = [0, 256], sizes = [8, 128], strides = [1, 1]} : vector<8x384xf32> to vector<8x128xf32>
    %201 = arith.addf %200, %2 : vector<8x128xf32>
    %202 = arith.mulf %190, %201 : vector<8x128xf32>
    %203 = arith.addf %199, %202 : vector<8x128xf32>
    %204 = math.tanh %203 : vector<8x128xf32>
    %cst_60 = arith.constant 1.000000e+00 : f32
    %205 = vector.broadcast %cst_60 : f32 to vector<8x128xf32>
    %206 = arith.subf %205, %198 : vector<8x128xf32>
    %207 = arith.mulf %206, %204 : vector<8x128xf32>
    %208 = arith.mulf %198, %174 : vector<8x128xf32>
    %209 = arith.addf %207, %208 : vector<8x128xf32>
    %c0_61 = arith.constant 0 : index
    %c640 = arith.constant 640 : index
    %210 = vector.load %arg3[%c0_61, %c640] : memref<8x1024xbf16, #tpu.memory_space<vmem>>, vector<8x128xbf16>
    %211 = arith.extf %210 : vector<8x128xbf16> to vector<8x128xf32>
    %212 = arith.addf %209, %211 : vector<8x128xf32>
    %c0_62 = arith.constant 0 : index
    %c640_63 = arith.constant 640 : index
    %213 = vector.load %arg4[%c0_62, %c640_63] : memref<8x1024xf32, #tpu.memory_space<vmem>>, vector<8x128xf32>
    tpu.vector_store %arg4[%c0_62, %c640_63], %212 {strides = array<i32>} : memref<8x1024xf32, #tpu.memory_space<vmem>>, vector<8x128xf32>,
    %c0_64 = arith.constant 0 : index
    %c2304 = arith.constant 2304 : index
    %214 = vector.load %arg0[%c0_64, %c2304] : memref<8x3072xf32, #tpu.memory_space<vmem>>, vector<8x384xf32>
    %215 = arith.truncf %209 : vector<8x128xf32> to vector<8x128xbf16>
    %c0_65 = arith.constant 0 : index
    %c0_66 = arith.constant 0 : index
    %216 = vector.load %arg1[%c0_65, %c0_66] : memref<128x384xbf16, #tpu.memory_space<vmem>>, vector<128x384xbf16>
    %cst_67 = arith.constant dense<0.000000e+00> : vector<8x384xf32>
    %217 = tpu.matmul %215, %216, %cst_67 {dimension_numbers = #tpu.dot_dimension_numbers<[1], [0], [0], [1], [0, 0, 1, 1], [], []>} : vector<8x128xbf16>, vector<128x384xbf16>, vector<8x384xf32> -> vector<8x384xf32>
    %218 = vector.extract_strided_slice %214 {offsets = [0, 0], sizes = [8, 128], strides = [1, 1]} : vector<8x384xf32> to vector<8x128xf32>
    %219 = vector.extract_strided_slice %217 {offsets = [0, 0], sizes = [8, 128], strides = [1, 1]} : vector<8x384xf32> to vector<8x128xf32>
    %220 = arith.addf %218, %219 : vector<8x128xf32>
    %221 = arith.negf %220 : vector<8x128xf32>
    %222 = math.exp %221 : vector<8x128xf32>
    %cst_68 = arith.constant 1.000000e+00 : f32
    %223 = vector.broadcast %cst_68 : f32 to vector<8x128xf32>
    %224 = arith.addf %223, %222 : vector<8x128xf32>
    %225 = arith.divf %223, %224 : vector<8x128xf32>
    %226 = vector.extract_strided_slice %214 {offsets = [0, 128], sizes = [8, 128], strides = [1, 1]} : vector<8x384xf32> to vector<8x128xf32>
    %227 = vector.extract_strided_slice %217 {offsets = [0, 128], sizes = [8, 128], strides = [1, 1]} : vector<8x384xf32> to vector<8x128xf32>
    %228 = arith.addf %226, %227 : vector<8x128xf32>
    %229 = arith.negf %228 : vector<8x128xf32>
    %230 = math.exp %229 : vector<8x128xf32>
    %cst_69 = arith.constant 1.000000e+00 : f32
    %231 = vector.broadcast %cst_69 : f32 to vector<8x128xf32>
    %232 = arith.addf %231, %230 : vector<8x128xf32>
    %233 = arith.divf %231, %232 : vector<8x128xf32>
    %234 = vector.extract_strided_slice %214 {offsets = [0, 256], sizes = [8, 128], strides = [1, 1]} : vector<8x384xf32> to vector<8x128xf32>
    %235 = vector.extract_strided_slice %217 {offsets = [0, 256], sizes = [8, 128], strides = [1, 1]} : vector<8x384xf32> to vector<8x128xf32>
    %236 = arith.addf %235, %2 : vector<8x128xf32>
    %237 = arith.mulf %225, %236 : vector<8x128xf32>
    %238 = arith.addf %234, %237 : vector<8x128xf32>
    %239 = math.tanh %238 : vector<8x128xf32>
    %cst_70 = arith.constant 1.000000e+00 : f32
    %240 = vector.broadcast %cst_70 : f32 to vector<8x128xf32>
    %241 = arith.subf %240, %233 : vector<8x128xf32>
    %242 = arith.mulf %241, %239 : vector<8x128xf32>
    %243 = arith.mulf %233, %209 : vector<8x128xf32>
    %244 = arith.addf %242, %243 : vector<8x128xf32>
    %c0_71 = arith.constant 0 : index
    %c768_72 = arith.constant 768 : index
    %245 = vector.load %arg3[%c0_71, %c768_72] : memref<8x1024xbf16, #tpu.memory_space<vmem>>, vector<8x128xbf16>
    %246 = arith.extf %245 : vector<8x128xbf16> to vector<8x128xf32>
    %247 = arith.addf %244, %246 : vector<8x128xf32>
    %c0_73 = arith.constant 0 : index
    %c768_74 = arith.constant 768 : index
    %248 = vector.load %arg4[%c0_73, %c768_74] : memref<8x1024xf32, #tpu.memory_space<vmem>>, vector<8x128xf32>
    tpu.vector_store %arg4[%c0_73, %c768_74], %247 {strides = array<i32>} : memref<8x1024xf32, #tpu.memory_space<vmem>>, vector<8x128xf32>,
    %c0_75 = arith.constant 0 : index
    %c2688 = arith.constant 2688 : index
    %249 = vector.load %arg0[%c0_75, %c2688] : memref<8x3072xf32, #tpu.memory_space<vmem>>, vector<8x384xf32>
    %250 = arith.truncf %244 : vector<8x128xf32> to vector<8x128xbf16>
    %c0_76 = arith.constant 0 : index
    %c0_77 = arith.constant 0 : index
    %251 = vector.load %arg1[%c0_76, %c0_77] : memref<128x384xbf16, #tpu.memory_space<vmem>>, vector<128x384xbf16>
    %cst_78 = arith.constant dense<0.000000e+00> : vector<8x384xf32>
    %252 = tpu.matmul %250, %251, %cst_78 {dimension_numbers = #tpu.dot_dimension_numbers<[1], [0], [0], [1], [0, 0, 1, 1], [], []>} : vector<8x128xbf16>, vector<128x384xbf16>, vector<8x384xf32> -> vector<8x384xf32>
    %253 = vector.extract_strided_slice %249 {offsets = [0, 0], sizes = [8, 128], strides = [1, 1]} : vector<8x384xf32> to vector<8x128xf32>
    %254 = vector.extract_strided_slice %252 {offsets = [0, 0], sizes = [8, 128], strides = [1, 1]} : vector<8x384xf32> to vector<8x128xf32>
    %255 = arith.addf %253, %254 : vector<8x128xf32>
    %256 = arith.negf %255 : vector<8x128xf32>
    %257 = math.exp %256 : vector<8x128xf32>
    %cst_79 = arith.constant 1.000000e+00 : f32
    %258 = vector.broadcast %cst_79 : f32 to vector<8x128xf32>
    %259 = arith.addf %258, %257 : vector<8x128xf32>
    %260 = arith.divf %258, %259 : vector<8x128xf32>
    %261 = vector.extract_strided_slice %249 {offsets = [0, 128], sizes = [8, 128], strides = [1, 1]} : vector<8x384xf32> to vector<8x128xf32>
    %262 = vector.extract_strided_slice %252 {offsets = [0, 128], sizes = [8, 128], strides = [1, 1]} : vector<8x384xf32> to vector<8x128xf32>
    %263 = arith.addf %261, %262 : vector<8x128xf32>
    %264 = arith.negf %263 : vector<8x128xf32>
    %265 = math.exp %264 : vector<8x128xf32>
    %cst_80 = arith.constant 1.000000e+00 : f32
    %266 = vector.broadcast %cst_80 : f32 to vector<8x128xf32>
    %267 = arith.addf %266, %265 : vector<8x128xf32>
    %268 = arith.divf %266, %267 : vector<8x128xf32>
    %269 = vector.extract_strided_slice %249 {offsets = [0, 256], sizes = [8, 128], strides = [1, 1]} : vector<8x384xf32> to vector<8x128xf32>
    %270 = vector.extract_strided_slice %252 {offsets = [0, 256], sizes = [8, 128], strides = [1, 1]} : vector<8x384xf32> to vector<8x128xf32>
    %271 = arith.addf %270, %2 : vector<8x128xf32>
    %272 = arith.mulf %260, %271 : vector<8x128xf32>
    %273 = arith.addf %269, %272 : vector<8x128xf32>
    %274 = math.tanh %273 : vector<8x128xf32>
    %cst_81 = arith.constant 1.000000e+00 : f32
    %275 = vector.broadcast %cst_81 : f32 to vector<8x128xf32>
    %276 = arith.subf %275, %268 : vector<8x128xf32>
    %277 = arith.mulf %276, %274 : vector<8x128xf32>
    %278 = arith.mulf %268, %244 : vector<8x128xf32>
    %279 = arith.addf %277, %278 : vector<8x128xf32>
    %c0_82 = arith.constant 0 : index
    %c896 = arith.constant 896 : index
    %280 = vector.load %arg3[%c0_82, %c896] : memref<8x1024xbf16, #tpu.memory_space<vmem>>, vector<8x128xbf16>
    %281 = arith.extf %280 : vector<8x128xbf16> to vector<8x128xf32>
    %282 = arith.addf %279, %281 : vector<8x128xf32>
    %c0_83 = arith.constant 0 : index
    %c896_84 = arith.constant 896 : index
    %283 = vector.load %arg4[%c0_83, %c896_84] : memref<8x1024xf32, #tpu.memory_space<vmem>>, vector<8x128xf32>
    tpu.vector_store %arg4[%c0_83, %c896_84], %282 {strides = array<i32>} : memref<8x1024xf32, #tpu.memory_space<vmem>>, vector<8x128xf32>,
    return
  }
}

</mosaic_0001>

<bundles_post_ra>
// kernel: vibe_demo_forward.4
= control target key start
LH: loop header
LB: loop body
LE: loop exit
PB: predicated region body
PF: predicated region fallthrough
CT: control target
= control target key end

     0   :  { %s879_s12 = smov 0   ;;  %s881_s13 = smov 0   ;;  %s1026_s0 = inlined_call_operand.vmem [shape: bf16[64,128], index: 0, kind: input, shape index: {}]   ;;  %s1027_s1 = inlined_call_operand.vmem [shape: bf16[128,384], index: 1, kind: input, shape index: {}]   ;;  %s1028_s2 = inlined_call_operand.vmem [shape: f32[1,384], index: 2, kind: input, shape index: {}]   ;;  %s1029_s3 = inlined_call_operand.vmem [shape: f32[64,384], index: 3, kind: output, shape index: {}]  }
   0x1   :  { %s883_s14 = smov 0   ;;  %s885_s15 = smov 0  }
   0x2   :  { %s887_s16 = smov 0  }
   0x3 LB: > { %s28_s17 = sadd.s32 1, %s853_s15  ;;  %s680_s18 = sadd.s32 4294967295, %s857_s16   ;;  %s857_s16 = sphi %s887_s16, %s13_s16   ;;  %s853_s15 = sphi %s885_s15, %s1034_s15   ;;  %s849_s14 = sphi %s883_s14, %s1033_s14   ;;  %s845_s13 = sphi %s881_s13, %s1032_s13   ;;  %s841_s12 = sphi %s879_s12, %s1031_s12  }
   0x4   : > { %p30_p0 = scmp.ge.s32.totalorder %s28_s17, 3  ;;  %p76_p1 = scmp.ne.s32.totalorder %s845_s13, %s841_s12 }
   0x5   : > { %p77_p2 = scmp.eq.s32.totalorder %s857_s16, 0  ;;  %p134_p4 = scmp.eq.s32.totalorder %s680_s18, 2 }
   0x6   : > { %s1036_s17 = smov (%p30_p0, %s28_s17), 0  ;;  %s69_s20 = sadd.s32 1, %s845_s13 }
   0x7   : > { %p78_p3 = por %p77_p2, %p76_p1  ;;  %s65_s19 = ssub.s32 %s853_s15, %s1036_s17 }
   0x8   : > { %p67_p5 = scmp.eq.s32.totalorder %s65_s19, 0  ;;  %p914_p6 = por %p134_p4, %p76_p1 }
   0x9   : > { %p684_p7 = scmp.ge.s32.totalorder %s857_s16, 3 }
   0xa   : > { %s919_s22 = scalar_select %p67_p5, %s845_s13, %s69_s20  }
   0xb   : > { %168 = sbr.rel (%p684_p7) target bundleno = 36 (0x24), region = 20 }
  0x10   : > { %171 = sbr.rel (!%p78_p3) target bundleno = 36 (0x24), region = 24  ;;  %s173_s23 = sand.u32 (%p78_p3), 1, %s845_s13  }
  0x11   : > { %s686_s24 = sshll.u32 (%p78_p3), %s853_s15, 2  ;;  %s685_s25 = sshll.u32 (%p78_p3), %s173_s23, 6 }
  0x12   : > { %s927_s28 = scalar_lea.vmem (%p78_p3), %s1027_s1, %s686_s24  ;;  %s175_s29 = scalar_lea.vmem (%p78_p3), [#allocation2], %s685_s25 }
  0x13   : > { %v197_v0 = vld [vmem:[%s927_s28] sm:$0xf] (%p78_p3)  ;;  %v199_v1 = vld [vmem:[%s927_s28 + $0xc] sm:$0xf] (%p78_p3)  ;;  %v201_v2 = vld [vmem:[%s927_s28 + $0x18] sm:$0xf] (%p78_p3) }
  0x14   : > { %198 = vst [vmem:[%s175_s29] sm:$0xf] (%p78_p3), %v197_v0  ;;  %v203_v3 = vld [vmem:[%s927_s28 + $0x24] sm:$0xf] (%p78_p3)  ;;  %v205_v4 = vld [vmem:[%s927_s28 + $0x30] sm:$0xf] (%p78_p3) }
  0x15   : > { %200 = vst [vmem:[%s175_s29 + $0x4] sm:$0xf] %v199_v1  ;;  %v207_v5 = vld [vmem:[%s927_s28 + $0x3c] sm:$0xf]  ;;  %v209_v6 = vld [vmem:[%s927_s28 + $0x48] sm:$0xf] }
  0x16   : > { %202 = vst [vmem:[%s175_s29 + $0x8] sm:$0xf] %v201_v2  ;;  %v211_v7 = vld [vmem:[%s927_s28 + $0x54] sm:$0xf]  ;;  %v213_v8 = vld [vmem:[%s927_s28 + $0x60] sm:$0xf] }
  0x17   : > { %204 = vst [vmem:[%s175_s29 + $0xc] sm:$0xf] %v203_v3  ;;  %v215_v9 = vld [vmem:[%s927_s28 + $0x6c] sm:$0xf]  ;;  %v217_v10 = vld [vmem:[%s927_s28 + $0x78] sm:$0xf] }
  0x18   : > { %206 = vst [vmem:[%s175_s29 + $0x10] sm:$0xf] %v205_v4  ;;  %v219_v11 = vld [vmem:[%s927_s28 + $0x84] sm:$0xf]  ;;  %v221_v12 = vld [vmem:[%s927_s28 + $0x90] sm:$0xf] }
  0x19   : > { %208 = vst [vmem:[%s175_s29 + $0x14] sm:$0xf] %v207_v5  ;;  %v223_v13 = vld [vmem:[%s927_s28 + $0x9c] sm:$0xf]  ;;  %v225_v14 = vld [vmem:[%s927_s28 + $0xa8] sm:$0xf] }
  0x1a   : > { %210 = vst [vmem:[%s175_s29 + $0x18] sm:$0xf] %v209_v6  ;;  %v227_v15 = vld [vmem:[%s927_s28 + $0xb4] sm:$0xf] }
  0x1b   : > { %212 = vst [vmem:[%s175_s29 + $0x1c] sm:$0xf] %v211_v7 }
  0x1c   : > { %214 = vst [vmem:[%s175_s29 + $0x20] sm:$0xf] %v213_v8 }
  0x1d   : > { %216 = vst [vmem:[%s175_s29 + $0x24] sm:$0xf] %v215_v9 }
  0x1e   : > { %218 = vst [vmem:[%s175_s29 + $0x28] sm:$0xf] %v217_v10 }
  0x1f   : > { %220 = vst [vmem:[%s175_s29 + $0x2c] sm:$0xf] %v219_v11 }
  0x20   : > { %222 = vst [vmem:[%s175_s29 + $0x30] sm:$0xf] %v221_v12 }
  0x21   : > { %224 = vst [vmem:[%s175_s29 + $0x34] sm:$0xf] %v223_v13 }
  0x22   : > { %226 = vst [vmem:[%s175_s29 + $0x38] sm:$0xf] %v225_v14 }
  0x23   : > { %228 = vst [vmem:[%s175_s29 + $0x3c] sm:$0xf] %v227_v15 }
  0x24 PF: > { %p687_p8 = scmp.ge.s32.totalorder %s857_s16, 1  ;;  %p289_p9 = scmp.lt.s32.totalorder %s857_s16, 4 }
  0x26   : > { %p290_p10 = pnand %p687_p8, %p289_p9 }
  0x27   : > { %s296_s30 = sand.u32 (!%p290_p10), 1, %s841_s12   ;;  %p339_p11 = scmp.lt.s32.totalorder (!%p290_p10), %s849_s14, 2 }
  0x28   : > { %293 = sbr.rel (%p290_p10) target bundleno = 230 (0xe6), region = 69  ;;  %s949_s4 = sshll.u32 (!%p290_p10), %s296_s30, 6 }
  0x29   : > { %s952_s5 = scalar_lea.vmem (!%p290_p10), [#allocation2], %s949_s4  ;;  %s987_s27 = scalar_lea.vmem (!%p290_p10), [#allocation3], %s949_s4 }
  0x2d   : > { %v753_v16 = vld [vmem:[%s952_s5 + $0x38] sm:$0xff]  ;;  %s956_s6 = scalar_select %p339_p11, %s849_s14, 2  ;;  %v752_v17 = vld [vmem:[%s952_s5 + $0x30] sm:$0xff]  ;;  %v751_v18 = vld [vmem:[%s952_s5 + $0x28] sm:$0xff] }
  0x2e   : > { %463 = vmatpush.bf16.msra.mxu0 %v753_v16  ;;  %754 = vmatpush.bf16.msra.mxu1 %v753_v16  ;;  %v750_v19 = vld [vmem:[%s952_s5 + $0x20] sm:$0xff]  ;;  %v749_v20 = vld [vmem:[%s952_s5 + $0x18] sm:$0xff]  ;;  %v748_v21 = vld [vmem:[%s952_s5 + $0x10] sm:$0xff]  ;;  %s739_s28 = sshll.u32 (%p914_p6), %s849_s14, 3 }
  0x2f   : > { %s341_s9 = scalar_lea.vmem %s1028_s2, %s956_s6  ;;  %755 = vmatpush.bf16.msra.mxu2 %v753_v16  ;;  %756 = vmatpush.bf16.msra.mxu3 %v753_v16  ;;  %v747_v22 = vld [vmem:[%s952_s5 + $0x8] sm:$0xff]  ;;  %v746_v23 = vld [vmem:[%s952_s5] sm:$0xff]  ;;  %v744_v26 = vld [vmem:[%s1026_s0 + $0x10] sm:$0xff]  ;;  %s519_s4 = scalar_lea.vmem (%p914_p6), %s1029_s3, %s739_s28 }
  0x30   : > { %v742_v24 = vld [vmem:[%s1026_s0] sm:$0xff]  ;;  %v743_v25 = vld [vmem:[%s1026_s0 + $0x8] sm:$0xff]  ;;  %v745_v27 = vld [vmem:[%s1026_s0 + $0x18] sm:$0xff] }
  0x31   : > { %v818_v28 = vld [vmem:[%s341_s9] ss:$0 sm:$0xff] }
  0x32   : > { %464 = vmatpush.bf16.msra.mxu0 %v752_v17  ;;  %757 = vmatpush.bf16.msra.mxu1 %v752_v17 }
  0x33   : > { %758 = vmatpush.bf16.msra.mxu2 %v752_v17  ;;  %759 = vmatpush.bf16.msra.mxu3 %v752_v17 }
  0x36   : > { %465 = vmatpush.bf16.msra.mxu0 %v751_v18  ;;  %760 = vmatpush.bf16.msra.mxu1 %v751_v18 }
  0x37   : > { %761 = vmatpush.bf16.msra.mxu2 %v751_v18  ;;  %762 = vmatpush.bf16.msra.mxu3 %v751_v18 }
  0x3a   : > { %466 = vmatpush.bf16.msra.mxu0 %v750_v19  ;;  %763 = vmatpush.bf16.msra.mxu1 %v750_v19 }
  0x3b   : > { %764 = vmatpush.bf16.msra.mxu2 %v750_v19  ;;  %765 = vmatpush.bf16.msra.mxu3 %v750_v19 }
  0x3e   : > { %467 = vmatpush.bf16.msra.mxu0 %v749_v20  ;;  %766 = vmatpush.bf16.msra.mxu1 %v749_v20 }
  0x3f   : > { %767 = vmatpush.bf16.msra.mxu2 %v749_v20  ;;  %768 = vmatpush.bf16.msra.mxu3 %v749_v20 }
  0x42   : > { %468 = vmatpush.bf16.msra.mxu0 %v748_v21  ;;  %769 = vmatpush.bf16.msra.mxu1 %v748_v21 }
  0x43   : > { %770 = vmatpush.bf16.msra.mxu2 %v748_v21  ;;  %771 = vmatpush.bf16.msra.mxu3 %v748_v21 }
  0x46   : > { %469 = vmatpush.bf16.msra.mxu0 %v747_v22  ;;  %772 = vmatpush.bf16.msra.mxu1 %v747_v22 }
  0x47   : > { %773 = vmatpush.bf16.msra.mxu2 %v747_v22  ;;  %774 = vmatpush.bf16.msra.mxu3 %v747_v22 }
  0x4a   : > { %470 = vmatpush.bf16.msra.mxu0 %v746_v23  ;;  %775 = vmatpush.bf16.msra.mxu1 %v746_v23 }
  0x4b   : > { %776 = vmatpush.bf16.msra.mxu2 %v746_v23  ;;  %777 = vmatpush.bf16.msra.mxu3 %v746_v23 }
  0x4d   : > { %471 = vmatmul.bf16.vlgmr.msra.gmra.mxu0 %v742_v24  ;;  %476 = vmatmul.bf16.vlgmr.msra.gmra.mxu1 %v743_v25 }
  0x4e   : > { %481 = vmatmul.bf16.vlgmr.msra.gmra.mxu2 %v744_v26  ;;  %486 = vmatmul.bf16.vlgmr.msra.gmra.mxu3 %v745_v27 }
  0xca   : > { %v472_v29 = vpop.f32.mrf.mxu0  ;;  %v477_v30 = vpop.f32.mrf.mxu1 }
  0xcb   : > { %v492_v31 = vadd.f32 %v818_v28, %v472_v29  ;;  %v494_v32 = vadd.f32 %v818_v28, %v477_v30 }
  0xcd   : > { %500 = vst [vmem:[%s987_s27] sm:$0xff] %v492_v31 }
  0xce   : > { %502 = vst [vmem:[%s987_s27 + $0x10] sm:$0xff] %v494_v32 }
  0xd1   : > { %v482_v33 = vpop.f32.mrf.mxu2  ;;  %v487_v34 = vpop.f32.mrf.mxu3 }
  0xd2   : > { %v496_v35 = vadd.f32 %v818_v28, %v482_v33  ;;  %v498_v36 = vadd.f32 %v818_v28, %v487_v34  ;;  %v474_v37 = vpop.f32.mrf.mxu0  ;;  %v479_v38 = vpop.f32.mrf.mxu1 }
  0xd3   : > { %v493_v39 = vadd.f32 %v818_v28, %v474_v37  ;;  %v495_v40 = vadd.f32 %v818_v28, %v479_v38 }
  0xd4   : > { %504 = vst [vmem:[%s987_s27 + $0x20] sm:$0xff] %v496_v35  ;;  %v562_v45 = vld [vmem:[%s987_s27] sm:$0xff] (%p914_p6) }
  0xd5   : > { %506 = vst [vmem:[%s987_s27 + $0x30] sm:$0xff] %v498_v36  ;;  %v566_v47 = vld [vmem:[%s987_s27 + $0x10] sm:$0xff] (%p914_p6) }
  0xd6   : > { %501 = vst [vmem:[%s987_s27 + $0x8] sm:$0xff] %v493_v39 }
  0xd7   : > { %503 = vst [vmem:[%s987_s27 + $0x18] sm:$0xff] %v495_v40 }
  0xd8   : > { %563 = vst [vmem:[%s519_s4] sm:$0xff] (%p914_p6), %v562_v45 }
  0xd9   : > { %v484_v41 = vpop.f32.mrf.mxu2  ;;  %v489_v42 = vpop.f32.mrf.mxu3  ;;  %514 = sbr.rel (!%p914_p6) target bundleno = 230 (0xe6), region = 81  ;;  %567 = vst [vmem:[%s519_s4 + $0x30] sm:$0xff] (%p914_p6), %v566_v47 }
  0xda   : > { %v497_v43 = vadd.f32 %v818_v28, %v484_v41  ;;  %v499_v44 = vadd.f32 %v818_v28, %v489_v42 }
  0xdb   : > { %v570_v49 = vld [vmem:[%s987_s27 + $0x20] sm:$0xff] (%p914_p6) }
  0xdc   : > { %505 = vst [vmem:[%s987_s27 + $0x28] sm:$0xff] %v497_v43  ;;  %v574_v51 = vld [vmem:[%s987_s27 + $0x30] sm:$0xff] (%p914_p6) }
  0xdd   : > { %507 = vst [vmem:[%s987_s27 + $0x38] sm:$0xff] %v499_v44  ;;  %v564_v46 = vld [vmem:[%s987_s27 + $0x8] sm:$0xff] (%p914_p6) }
  0xde   : > { %v568_v48 = vld [vmem:[%s987_s27 + $0x18] sm:$0xff]  ;;  %565 = vst [vmem:[%s519_s4 + $0x18] sm:$0xff] %v564_v46 }
  0xdf   : > { %569 = vst [vmem:[%s519_s4 + $0x48] sm:$0xff] %v568_v48 }
  0xe0   : > { %571 = vst [vmem:[%s519_s4 + $0x60] sm:$0xff] %v570_v49 }
  0xe1   : > { %575 = vst [vmem:[%s519_s4 + $0x90] sm:$0xff] %v574_v51 }
  0xe3   : > { %v572_v50 = vld [vmem:[%s987_s27 + $0x28] sm:$0xff] }
  0xe4   : > { %v576_v52 = vld [vmem:[%s987_s27 + $0x38] sm:$0xff]  ;;  %573 = vst [vmem:[%s519_s4 + $0x78] sm:$0xff] %v572_v50 }
  0xe5   : > { %577 = vst [vmem:[%s519_s4 + $0xa8] sm:$0xff] %v576_v52 }
  0xe6 PF: > { %s13_s16 = sadd.s32 1, %s857_s16   ;;  %s1031_s12 = smov %s845_s13 }
  0xe7   : > { %p10_p12 = scmp.ge.s32.totalorder %s13_s16, 5   ;;  %s1032_s13 = smov %s919_s22 }
  0xe8   : > { %s1033_s14 = smov %s853_s15  ;;  %s1034_s15 = smov %s1036_s17 }
  0xe9   :  { %12 = sbr.rel (!%p10_p12) target bundleno = 3 (0x3), region = 156 }

// kernel: vibe_demo_forward.3
= control target key start
LH: loop header
LB: loop body
LE: loop exit
PB: predicated region body
PF: predicated region fallthrough
CT: control target
= control target key end

     0   :  { %s1008_s12 = smov 0   ;;  %s1010_s13 = smov 0   ;;  %s1126_s0 = inlined_call_operand.vmem [shape: bf16[64,768], index: 0, kind: input, shape index: {}]   ;;  %s1127_s1 = inlined_call_operand.vmem [shape: bf16[768,128], index: 1, kind: input, shape index: {}]   ;;  %s1128_s2 = inlined_call_operand.vmem [shape: f32[1,128], index: 2, kind: input, shape index: {}]   ;;  %s1129_s3 = inlined_call_operand.vmem [shape: bf16[64,128], index: 3, kind: output, shape index: {}]  }
   0x1   :  { %s1012_s14 = smov 0   ;;  %s1014_s15 = smov 0  }
   0x2   :  { %s1016_s16 = smov 0  }
   0x3 LB: > { %s25_s17 = sadd.s32 1, %s982_s15  ;;  %p48_p1 = scmp.ne.s32.totalorder %s974_s13, %s970_s12  ;;  %s986_s16 = sphi %s1016_s16, %s13_s16   ;;  %s982_s15 = sphi %s1014_s15, %s1133_s15   ;;  %s978_s14 = sphi %s1012_s14, %s1132_s14   ;;  %s974_s13 = sphi %s1010_s13, %s1131_s13   ;;  %s970_s12 = sphi %s1008_s12, %s1130_s12  }
   0x4   : > { %p26_p0 = scmp.ge.s32.totalorder %s25_s17, 3  ;;  %p49_p2 = scmp.eq.s32.totalorder %s986_s16, 0 }
   0x5   : > { %s41_s19 = sadd.s32 1, %s974_s13  ;;  %p733_p5 = scmp.ge.s32.totalorder %s986_s16, 3 }
   0x6   : > { %s1135_s17 = smov (%p26_p0, %s25_s17), 0  ;;  %p50_p3 = por %p49_p2, %p48_p1 }
   0x7   : > { %s37_s18 = ssub.s32 %s982_s15, %s1135_s17  ;;  %162 = sbr.rel (%p733_p5) target bundleno = 24 (0x18), region = 20 }
   0x8   : > { %p39_p4 = scmp.eq.s32.totalorder %s37_s18, 0 }
   0xa   : > { %s1043_s20 = scalar_select %p39_p4, %s974_s13, %s41_s19  }
   0xc   : > { %165 = sbr.rel (!%p50_p3) target bundleno = 24 (0x18), region = 24  ;;  %s167_s21 = sand.u32 (%p50_p3), 1, %s974_s13  }
   0xd   : > { %s843_s22 = sshll.u32 (%p50_p3), %s982_s15, 3  ;;  %s734_s23 = sshll.u32 (%p50_p3), %s167_s21, 6 }
   0xe   : > { %s175_s26 = scalar_lea.vmem (%p50_p3), %s1126_s0, %s843_s22  ;;  %s169_s27 = scalar_lea.vmem (%p50_p3), [#allocation3], %s734_s23 }
   0xf   : > { %v218_v0 = vld [vmem:[%s175_s26] sm:$0xff] (%p50_p3)  ;;  %v220_v1 = vld [vmem:[%s175_s26 + $0x18] sm:$0xff] (%p50_p3)  ;;  %v222_v2 = vld [vmem:[%s175_s26 + $0x30] sm:$0xff] (%p50_p3) }
  0x10   : > { %219 = vst [vmem:[%s169_s27] sm:$0xff] (%p50_p3), %v218_v0  ;;  %v224_v3 = vld [vmem:[%s175_s26 + $0x48] sm:$0xff] (%p50_p3)  ;;  %v226_v4 = vld [vmem:[%s175_s26 + $0x60] sm:$0xff] (%p50_p3)  ;;  %v228_v5 = vld [vmem:[%s175_s26 + $0x78] sm:$0xff] (%p50_p3) }
  0x11   : > { %221 = vst [vmem:[%s169_s27 + $0x8] sm:$0xff] %v220_v1  ;;  %v230_v6 = vld [vmem:[%s175_s26 + $0x90] sm:$0xff]  ;;  %v232_v7 = vld [vmem:[%s175_s26 + $0xa8] sm:$0xff] }
  0x12   : > { %223 = vst [vmem:[%s169_s27 + $0x10] sm:$0xff] %v222_v2 }
  0x13   : > { %225 = vst [vmem:[%s169_s27 + $0x18] sm:$0xff] %v224_v3 }
  0x14   : > { %227 = vst [vmem:[%s169_s27 + $0x20] sm:$0xff] %v226_v4 }
  0x15   : > { %229 = vst [vmem:[%s169_s27 + $0x28] sm:$0xff] %v228_v5 }
  0x16   : > { %231 = vst [vmem:[%s169_s27 + $0x30] sm:$0xff] %v230_v6 }
  0x17   : > { %233 = vst [vmem:[%s169_s27 + $0x38] sm:$0xff] %v232_v7 }
  0x18 PF: > { %p737_p6 = scmp.ge.s32.totalorder %s986_s16, 1  ;;  %p250_p7 = scmp.lt.s32.totalorder %s986_s16, 4 }
  0x1a   : > { %p251_p8 = pnand %p737_p6, %p250_p7 }
  0x1b   : > { %s257_s28 = sand.u32 (!%p251_p8), 1, %s970_s12   ;;  %s739_s29 = sshll.u32 (!%p251_p8), %s978_s14, 5 }
  0x1c   : > { %254 = sbr.rel (%p251_p8) target bundleno = 251 (0xfb), region = 66  ;;  %s738_s30 = sshll.u32 (!%p251_p8), %s257_s28, 6 }
  0x1d   : > { %p297_p9 = scmp.lt.s32.totalorder (!%p251_p8), %s739_s29, 95  ;;  %s1060_s8 = scalar_lea.vmem (!%p251_p8), [#allocation3], %s738_s30 }
  0x1e   : > { %p741_p10 = scmp.ne.s32.totalorder (!%p251_p8), %s978_s14, 0 }
  0x21   : > { %s1137_s29 = smov (!%p297_p9, %s739_s29), 95  ;;  %320 = sbr.rel (%p741_p10) target bundleno = 47 (0x2f), region = 74 }
  0x22   : > { %s740_s4 = sshll.u32 %s1137_s29, 2 }
  0x23   : > { %s1058_s7 = scalar_lea.vmem %s1127_s1, %s740_s4 }
  0x26   : > { %v947_v8 = vld [vmem:[%s1128_s2] ss:$0 sm:$0xff] }
  0x27   : > { %325 = vst [vmem:[#allocation2 + $0x30] sm:$0xff] %v947_v8 }
  0x28   : > { %326 = vst [vmem:[#allocation2] sm:$0xff] %v947_v8 }
  0x29   : > { %327 = vst [vmem:[#allocation2 + $0x18] sm:$0xff] %v947_v8 }
  0x2a   : > { %328 = vst [vmem:[#allocation2 + $0x10] sm:$0xff] %v947_v8 }
  0x2b   : > { %329 = vst [vmem:[#allocation2 + $0x8] sm:$0xff] %v947_v8 }
  0x2c   : > { %330 = vst [vmem:[#allocation2 + $0x20] sm:$0xff] %v947_v8 }
  0x2d   : > { %331 = vst [vmem:[#allocation2 + $0x28] sm:$0xff] %v947_v8 }
  0x2e   : > { %332 = vst [vmem:[#allocation2 + $0x38] sm:$0xff] %v947_v8 }
  0x2f PF: > { %v859_v9 = vld [vmem:[%s1058_s7 + $0x38] sm:$0xff]  ;;  %v858_v11 = vld [vmem:[%s1058_s7 + $0x30] sm:$0xff]  ;;  %v857_v13 = vld [vmem:[%s1058_s7 + $0x28] sm:$0xff]  ;;  %p838_p11 = scmp.ne.s32.totalorder %s978_s14, 2 }
  0x30   : > { %v867_v10 = vld [vmem:[%s1058_s7 + $0x78] sm:$0xff]  ;;  %517 = vmatpush.bf16.msra.mxu0 %v859_v9  ;;  %891 = vmatpush.bf16.msra.mxu2 %v859_v9  ;;  %v866_v12 = vld [vmem:[%s1058_s7 + $0x70] sm:$0xff]  ;;  %v865_v14 = vld [vmem:[%s1058_s7 + $0x68] sm:$0xff] }
  0x31   : > { %546 = vmatpush.bf16.msra.mxu1 %v867_v10  ;;  %899 = vmatpush.bf16.msra.mxu3 %v867_v10  ;;  %v856_v15 = vld [vmem:[%s1058_s7 + $0x20] sm:$0xff]  ;;  %v855_v17 = vld [vmem:[%s1058_s7 + $0x18] sm:$0xff]  ;;  %v854_v19 = vld [vmem:[%s1058_s7 + $0x10] sm:$0xff] }
  0x32   : > { %v864_v16 = vld [vmem:[%s1058_s7 + $0x60] sm:$0xff]  ;;  %v863_v18 = vld [vmem:[%s1058_s7 + $0x58] sm:$0xff]  ;;  %v862_v20 = vld [vmem:[%s1058_s7 + $0x50] sm:$0xff] }
  0x33   : > { %v853_v21 = vld [vmem:[%s1058_s7 + $0x8] sm:$0xff]  ;;  %v852_v23 = vld [vmem:[%s1058_s7] sm:$0xff]  ;;  %v752_v37 = vld [vmem:[%s1060_s8 + $0x10] sm:$0xf] }
  0x34   : > { %518 = vmatpush.bf16.msra.mxu0 %v858_v11  ;;  %892 = vmatpush.bf16.msra.mxu2 %v858_v11  ;;  %v861_v22 = vld [vmem:[%s1058_s7 + $0x48] sm:$0xff]  ;;  %v860_v24 = vld [vmem:[%s1058_s7 + $0x40] sm:$0xff]  ;;  %v847_v38 = vld [vmem:[%s1060_s8 + $0x14] sm:$0xf0] }
  0x35   : > { %547 = vmatpush.bf16.msra.mxu1 %v866_v12  ;;  %900 = vmatpush.bf16.msra.mxu3 %v866_v12  ;;  %v744_v25 = vld [vmem:[%s1060_s8] sm:$0xf]  ;;  %v845_v26 = vld [vmem:[%s1060_s8 + $0x4] sm:$0xf0]  ;;  %v844_v29 = vld [vmem:[%s1060_s8 + $0x4] sm:$0xf]  ;;  %v753_v45 = vor.u32 %v847_v38, %v752_v37 }
  0x36   : > { %v760_v27 = vld [vmem:[%s1060_s8 + $0x20] sm:$0xf]  ;;  %v849_v28 = vld [vmem:[%s1060_s8 + $0x24] sm:$0xf0]  ;;  %v746_v30 = vld [vmem:[%s1060_s8 + $0x8] sm:$0xf0]  ;;  %v745_v33 = vor.u32 %v845_v26, %v744_v25 }
  0x37   : > { %v848_v31 = vld [vmem:[%s1060_s8 + $0x24] sm:$0xf]  ;;  %v762_v32 = vld [vmem:[%s1060_s8 + $0x28] sm:$0xf0]  ;;  %v761_v34 = vor.u32 %v849_v28, %v760_v27  ;;  %v749_v35 = vor.u32 %v844_v29, %v746_v30  ;;  %v768_v39 = vld [vmem:[%s1060_s8 + $0x30] sm:$0xf] }
  0x38   : > { %519 = vmatpush.bf16.msra.mxu0 %v857_v13  ;;  %893 = vmatpush.bf16.msra.mxu2 %v857_v13  ;;  %v765_v36 = vor.u32 %v848_v31, %v762_v32  ;;  %v851_v40 = vld [vmem:[%s1060_s8 + $0x34] sm:$0xf0]  ;;  %v846_v41 = vld [vmem:[%s1060_s8 + $0x14] sm:$0xf]  ;;  %v754_v42 = vld [vmem:[%s1060_s8 + $0x18] sm:$0xf0] }
  0x39   : > { %548 = vmatpush.bf16.msra.mxu1 %v865_v14  ;;  %901 = vmatpush.bf16.msra.mxu3 %v865_v14  ;;  %v850_v43 = vld [vmem:[%s1060_s8 + $0x34] sm:$0xf]  ;;  %v770_v44 = vld [vmem:[%s1060_s8 + $0x38] sm:$0xf0]  ;;  %v769_v46 = vor.u32 %v851_v40, %v768_v39  ;;  %v757_v47 = vor.u32 %v846_v41, %v754_v42  ;;  %v337_v55 = vld [vmem:[#allocation2 + $0x8] sm:$0xff] }
  0x3a   : > { %v773_v48 = vor.u32 %v850_v43, %v770_v44  ;;  %v333_v50 = vld [vmem:[#allocation2 + $0x30] sm:$0xff]  ;;  %v334_v59 = vld [vmem:[#allocation2] sm:$0xff]  ;;  %v335_v5 = vld [vmem:[#allocation2 + $0x18] sm:$0xff] }
  0x3b   : > { %v338_v1 = vld [vmem:[#allocation2 + $0x20] sm:$0xff]  ;;  %v339_v11 = vld [vmem:[#allocation2 + $0x28] sm:$0xff] }
  0x3c   : > { %520 = vmatpush.bf16.msra.mxu0 %v856_v15  ;;  %894 = vmatpush.bf16.msra.mxu2 %v856_v15  ;;  %v336_v15 = vld [vmem:[#allocation2 + $0x10] sm:$0xff] }
  0x3d   : > { %549 = vmatpush.bf16.msra.mxu1 %v864_v16  ;;  %902 = vmatpush.bf16.msra.mxu3 %v864_v16 }
  0x40   : > { %521 = vmatpush.bf16.msra.mxu0 %v855_v17  ;;  %895 = vmatpush.bf16.msra.mxu2 %v855_v17 }
  0x41   : > { %550 = vmatpush.bf16.msra.mxu1 %v863_v18  ;;  %903 = vmatpush.bf16.msra.mxu3 %v863_v18 }
  0x44   : > { %522 = vmatpush.bf16.msra.mxu0 %v854_v19  ;;  %896 = vmatpush.bf16.msra.mxu2 %v854_v19 }
  0x45   : > { %551 = vmatpush.bf16.msra.mxu1 %v862_v20  ;;  %904 = vmatpush.bf16.msra.mxu3 %v862_v20 }
  0x48   : > { %523 = vmatpush.bf16.msra.mxu0 %v853_v21  ;;  %897 = vmatpush.bf16.msra.mxu2 %v853_v21  ;;  %v340_v21 = vld [vmem:[#allocation2 + $0x38] sm:$0xff] }
  0x49   : > { %552 = vmatpush.bf16.msra.mxu1 %v861_v22  ;;  %905 = vmatpush.bf16.msra.mxu3 %v861_v22 }
  0x4c   : > { %524 = vmatpush.bf16.msra.mxu0 %v852_v23  ;;  %898 = vmatpush.bf16.msra.mxu2 %v852_v23 }
  0x4d   : > { %553 = vmatpush.bf16.msra.mxu1 %v860_v24  ;;  %906 = vmatpush.bf16.msra.mxu3 %v860_v24 }
  0x4f   : > { %525 = vmatmul.bf16.vlgmr.msra.gmra.mxu0 %v745_v33  ;;  %535 = vmatmul.bf16.vlgmr.msra.gmra.mxu2 %v761_v34 }
  0x50   : > { %554 = vmatmul.bf16.vlgmr.msra.gmra.mxu1 %v749_v35  ;;  %564 = vmatmul.bf16.vlgmr.msra.gmra.mxu3 %v765_v36 }
  0x5f   : > { %530 = vmatmul.bf16.gmra.mxu0 %v753_v45  ;;  %540 = vmatmul.bf16.gmra.mxu2 %v769_v46 }
  0x60   : > { %559 = vmatmul.bf16.gmra.mxu1 %v757_v47  ;;  %569 = vmatmul.bf16.gmra.mxu3 %v773_v48 }
  0xcc   : > { %v526_v49 = vpop.f32.mrf.mxu0 }
  0xcd   : > { %v555_v51 = vpop.f32.mrf.mxu1 }
  0xce   : > { %v556_v52 = vadd.f32 %v555_v51, %v526_v49 }
  0xd0   : > { %v575_v53 = vadd.f32 %v556_v52, %v333_v50 }
  0xd2   : > { %583 = vst [vmem:[#allocation2 + $0x30] sm:$0xff] %v575_v53  ;;  %v536_v54 = vpop.f32.mrf.mxu2 }
  0xd3   : > { %v565_v56 = vpop.f32.mrf.mxu3 }
  0xd4   : > { %v566_v57 = vadd.f32 %v565_v56, %v536_v54  ;;  %v528_v58 = vpop.f32.mrf.mxu0 }
  0xd5   : > { %v557_v60 = vpop.f32.mrf.mxu1 }
  0xd6   : > { %v579_v61 = vadd.f32 %v566_v57, %v337_v55  ;;  %v558_v62 = vadd.f32 %v557_v60, %v528_v58 }
  0xd8   : > { %587 = vst [vmem:[#allocation2 + $0x8] sm:$0xff] %v579_v61  ;;  %v576_v63 = vadd.f32 %v558_v62, %v334_v59 }
  0xda   : > { %584 = vst [vmem:[#allocation2] sm:$0xff] %v576_v63  ;;  %v538_v0 = vpop.f32.mrf.mxu2 }
  0xdb   : > { %v567_v2 = vpop.f32.mrf.mxu3 }
  0xdc   : > { %v568_v3 = vadd.f32 %v567_v2, %v538_v0  ;;  %v531_v4 = vpop.f32.mrf.mxu0 }
  0xdd   : > { %v560_v6 = vpop.f32.mrf.mxu1 }
  0xde   : > { %v580_v7 = vadd.f32 %v568_v3, %v338_v1  ;;  %v561_v8 = vadd.f32 %v560_v6, %v531_v4 }
  0xe0   : > { %588 = vst [vmem:[#allocation2 + $0x20] sm:$0xff] %v580_v7  ;;  %v577_v9 = vadd.f32 %v561_v8, %v335_v5 }
  0xe2   : > { %585 = vst [vmem:[#allocation2 + $0x18] sm:$0xff] %v577_v9  ;;  %v541_v10 = vpop.f32.mrf.mxu2 }
  0xe3   : > { %v570_v12 = vpop.f32.mrf.mxu3 }
  0xe4   : > { %v571_v13 = vadd.f32 %v570_v12, %v541_v10  ;;  %v533_v14 = vpop.f32.mrf.mxu0 }
  0xe5   : > { %v562_v16 = vpop.f32.mrf.mxu1 }
  0xe6   : > { %v581_v17 = vadd.f32 %v571_v13, %v339_v11  ;;  %v563_v18 = vadd.f32 %v562_v16, %v533_v14 }
  0xe8   : > { %589 = vst [vmem:[#allocation2 + $0x28] sm:$0xff] %v581_v17  ;;  %v578_v19 = vadd.f32 %v563_v18, %v336_v15 }
  0xea   : > { %586 = vst [vmem:[#allocation2 + $0x10] sm:$0xff] %v578_v19  ;;  %v543_v20 = vpop.f32.mrf.mxu2 }
  0xeb   : > { %v572_v22 = vpop.f32.mrf.mxu3 }
  0xec   : > { %v573_v23 = vadd.f32 %v572_v22, %v543_v20  ;;  %594 = sbr.rel (%p838_p11) target bundleno = 251 (0xfb), region = 78 }
  0xee   : > { %v582_v24 = vadd.f32 %v573_v23, %v340_v21 }
  0xf0   : > { %590 = vst [vmem:[#allocation2 + $0x38] sm:$0xff] %v582_v24 }
  0xf1   : > { %v595_v25 = vld [vmem:[#allocation2 + $0x30] sm:$0xff]  ;;  %v596_v26 = vld [vmem:[#allocation2] sm:$0xff]  ;;  %v597_v27 = vld [vmem:[#allocation2 + $0x18] sm:$0xff] }
  0xf2   : > { %v871_v28 = vpack.c.bf16 %v596_v26, %v595_v25  ;;  %v598_v29 = vld [vmem:[#allocation2 + $0x10] sm:$0xff]  ;;  %v599_v30 = vld [vmem:[#allocation2 + $0x8] sm:$0xff]  ;;  %v600_v31 = vld [vmem:[#allocation2 + $0x20] sm:$0xff] }
  0xf3   : > { %v876_v32 = vpack.c.bf16 %v598_v29, %v597_v27  ;;  %v881_v33 = vpack.c.bf16 %v600_v31, %v599_v30  ;;  %v601_v34 = vld [vmem:[#allocation2 + $0x28] sm:$0xff] }
  0xf4   : > { %872 = vst [vmem:[%s1129_s3] sm:$0xff] %v871_v28  }
  0xf5   : > { %888 = vst [vmem:[%s1129_s3 + $0x8] sm:$0xff] %v876_v32  }
  0xf6   : > { %889 = vst [vmem:[%s1129_s3 + $0x10] sm:$0xff] %v881_v33  }
  0xf7   : > { %v602_v35 = vld [vmem:[#allocation2 + $0x38] sm:$0xff] }
  0xf8   : > { %v886_v36 = vpack.c.bf16 %v602_v35, %v601_v34 }
  0xfa   : > { %890 = vst [vmem:[%s1129_s3 + $0x18] sm:$0xff] %v886_v36  }
  0xfb PF: > { %s13_s16 = sadd.s32 1, %s986_s16   ;;  %s1130_s12 = smov %s974_s13 }
  0xfc   : > { %p10_p12 = scmp.ge.s32.totalorder %s13_s16, 5   ;;  %s1131_s13 = smov %s1043_s20 }
  0xfd   : > { %s1132_s14 = smov %s982_s15  ;;  %s1133_s15 = smov %s1135_s17 }
  0xfe   :  { %12 = sbr.rel (!%p10_p12) target bundleno = 3 (0x3), region = 119 }

// kernel: vibe_demo_forward.5
= control target key start
LH: loop header
LB: loop body
LE: loop exit
PB: predicated region body
PF: predicated region fallthrough
CT: control target
= control target key end

     0   :  { %s4498_s1 = inlined_call_operand.vmem [shape: bf16[128,384], index: 1, kind: input, shape index: {}]   ;;  %s4499_s2 = inlined_call_operand.vmem [shape: f32[1,128], index: 2, kind: input, shape index: {}]   ;;  %s4500_s0 = inlined_call_operand.vmem [shape: f32[8,3072], index: 0, kind: input, shape index: {}]   ;;  %s4501_s3 = inlined_call_operand.vmem [shape: bf16[8,1024], index: 3, kind: input, shape index: {}]   ;;  %s4502_s4 = inlined_call_operand.vmem [shape: f32[8,1024], index: 4, kind: output, shape index: {}]  }
   0x1   :  { %v2151_v0 = vld [vmem:[%s4498_s1 + $0xa8] sm:$0xf]  ;;  %v2871_v1 = vld [vmem:[%s4498_s1 + $0xb0] sm:$0xf0]  ;;  %v2870_v2 = vld [vmem:[%s4498_s1 + $0xac] sm:$0xf] }
   0x2   :  { %v2152_v3 = vor.u32 %v2871_v1, %v2151_v0  ;;  %v2153_v4 = vld [vmem:[%s4498_s1 + $0xb4] sm:$0xf0]  ;;  %v2139_v5 = vld [vmem:[%s4498_s1 + $0x90] sm:$0xf]  ;;  %v2868_v6 = vld [vmem:[%s4498_s1 + $0x98] sm:$0xf0] }
   0x3   :  { %v2156_v7 = vor.u32 %v2870_v2, %v2153_v4  ;;  %v2867_v8 = vld [vmem:[%s4498_s1 + $0x94] sm:$0xf]  ;;  %v2141_v9 = vld [vmem:[%s4498_s1 + $0x9c] sm:$0xf0]  ;;  %v2140_v10 = vor.u32 %v2868_v6, %v2139_v5  ;;  %v2127_v12 = vld [vmem:[%s4498_s1 + $0x78] sm:$0xf] }
   0x4   :  { %185 = vmatpush.bf16.msra.mxu0 %v2152_v3  ;;  %v2144_v11 = vor.u32 %v2867_v8, %v2141_v9  ;;  %v2865_v13 = vld [vmem:[%s4498_s1 + $0x80] sm:$0xf0]  ;;  %v2864_v14 = vld [vmem:[%s4498_s1 + $0x7c] sm:$0xf]  ;;  %v2129_v15 = vld [vmem:[%s4498_s1 + $0x84] sm:$0xf0] }
   0x5   :  { %198 = vmatpush.bf16.msra.mxu1 %v2156_v7  ;;  %v2159_v16 = vld [vmem:[%s4498_s1 + $0xb0] sm:$0xf]  ;;  %v2872_v17 = vld [vmem:[%s4498_s1 + $0xb8] sm:$0xf0]  ;;  %v2128_v19 = vor.u32 %v2865_v13, %v2127_v12  ;;  %v2147_v20 = vld [vmem:[%s4498_s1 + $0x98] sm:$0xf]  ;;  %v2132_v22 = vor.u32 %v2864_v14, %v2129_v15 }
   0x6   :  { %v2160_v18 = vor.u32 %v2872_v17, %v2159_v16  ;;  %v2869_v21 = vld [vmem:[%s4498_s1 + $0xa0] sm:$0xf0]  ;;  %v2115_v23 = vld [vmem:[%s4498_s1 + $0x60] sm:$0xf]  ;;  %v2862_v24 = vld [vmem:[%s4498_s1 + $0x68] sm:$0xf0] }
   0x7   :  { %v2861_v25 = vld [vmem:[%s4498_s1 + $0x64] sm:$0xf]  ;;  %v2148_v26 = vor.u32 %v2869_v21, %v2147_v20  ;;  %v2117_v27 = vld [vmem:[%s4498_s1 + $0x6c] sm:$0xf0]  ;;  %v2135_v28 = vld [vmem:[%s4498_s1 + $0x80] sm:$0xf]  ;;  %v2116_v30 = vor.u32 %v2862_v24, %v2115_v23 }
   0x8   :  { %186 = vmatpush.bf16.msra.mxu0 %v2140_v10  ;;  %211 = vmatpush.bf16.msra.mxu2 %v2160_v18  ;;  %v2866_v29 = vld [vmem:[%s4498_s1 + $0x88] sm:$0xf0]  ;;  %v2120_v31 = vor.u32 %v2861_v25, %v2117_v27  ;;  %v2103_v32 = vld [vmem:[%s4498_s1 + $0x48] sm:$0xf]  ;;  %v2859_v33 = vld [vmem:[%s4498_s1 + $0x50] sm:$0xf0] }
   0x9   :  { %199 = vmatpush.bf16.msra.mxu1 %v2144_v11  ;;  %v2858_v34 = vld [vmem:[%s4498_s1 + $0x4c] sm:$0xf]  ;;  %v2136_v35 = vor.u32 %v2866_v29, %v2135_v28  ;;  %v2105_v36 = vld [vmem:[%s4498_s1 + $0x54] sm:$0xf0]  ;;  %v2123_v37 = vld [vmem:[%s4498_s1 + $0x68] sm:$0xf]  ;;  %v2104_v39 = vor.u32 %v2859_v33, %v2103_v32 }
   0xa   :  { %v2863_v38 = vld [vmem:[%s4498_s1 + $0x70] sm:$0xf0]  ;;  %v2108_v40 = vor.u32 %v2858_v34, %v2105_v36  ;;  %v2091_v41 = vld [vmem:[%s4498_s1 + $0x30] sm:$0xf]  ;;  %v2856_v42 = vld [vmem:[%s4498_s1 + $0x38] sm:$0xf0] }
   0xb   :  { %v2855_v43 = vld [vmem:[%s4498_s1 + $0x34] sm:$0xf]  ;;  %v2124_v44 = vor.u32 %v2863_v38, %v2123_v37  ;;  %v2093_v45 = vld [vmem:[%s4498_s1 + $0x3c] sm:$0xf0]  ;;  %v2111_v46 = vld [vmem:[%s4498_s1 + $0x50] sm:$0xf]  ;;  %v2092_v48 = vor.u32 %v2856_v42, %v2091_v41 }
   0xc   :  { %187 = vmatpush.bf16.msra.mxu0 %v2128_v19  ;;  %212 = vmatpush.bf16.msra.mxu2 %v2148_v26  ;;  %v2860_v47 = vld [vmem:[%s4498_s1 + $0x58] sm:$0xf0]  ;;  %v2096_v49 = vor.u32 %v2855_v43, %v2093_v45  ;;  %v2079_v50 = vld [vmem:[%s4498_s1 + $0x18] sm:$0xf]  ;;  %v2853_v51 = vld [vmem:[%s4498_s1 + $0x20] sm:$0xf0] }
   0xd   :  { %200 = vmatpush.bf16.msra.mxu1 %v2132_v22  ;;  %v2852_v52 = vld [vmem:[%s4498_s1 + $0x1c] sm:$0xf]  ;;  %v2112_v53 = vor.u32 %v2860_v47, %v2111_v46  ;;  %v2081_v54 = vld [vmem:[%s4498_s1 + $0x24] sm:$0xf0]  ;;  %v2099_v55 = vld [vmem:[%s4498_s1 + $0x38] sm:$0xf]  ;;  %v2080_v57 = vor.u32 %v2853_v51, %v2079_v50 }
   0xe   :  { %v2857_v56 = vld [vmem:[%s4498_s1 + $0x40] sm:$0xf0]  ;;  %v2084_v58 = vor.u32 %v2852_v52, %v2081_v54  ;;  %v2067_v59 = vld [vmem:[%s4498_s1] sm:$0xf]  ;;  %v2850_v60 = vld [vmem:[%s4498_s1 + $0x8] sm:$0xf0] }
   0xf   :  { %v2849_v61 = vld [vmem:[%s4498_s1 + $0x4] sm:$0xf]  ;;  %v2100_v62 = vor.u32 %v2857_v56, %v2099_v55  ;;  %v2069_v63 = vld [vmem:[%s4498_s1 + $0xc] sm:$0xf0]  ;;  %v2087_v0 = vld [vmem:[%s4498_s1 + $0x20] sm:$0xf]  ;;  %v2068_v2 = vor.u32 %v2850_v60, %v2067_v59 }
  0x10   :  { %188 = vmatpush.bf16.msra.mxu0 %v2116_v30  ;;  %213 = vmatpush.bf16.msra.mxu2 %v2136_v35  ;;  %v2854_v1 = vld [vmem:[%s4498_s1 + $0x28] sm:$0xf0]  ;;  %v2072_v3 = vor.u32 %v2849_v61, %v2069_v63  ;;  %v2075_v5 = vld [vmem:[%s4498_s1 + $0x8] sm:$0xf]  ;;  %v2851_v6 = vld [vmem:[%s4498_s1 + $0x10] sm:$0xf0] }
  0x11   :  { %201 = vmatpush.bf16.msra.mxu1 %v2120_v31  ;;  %v2088_v4 = vor.u32 %v2854_v1, %v2087_v0  ;;  %v2076_v7 = vor.u32 %v2851_v6, %v2075_v5  ;;  %v3124_v8 = vmov 0   ;;  %v2249_v9 = vld [vmem:[%s4498_s1 + $0xa8] sm:$0xf]  ;;  %v2895_v10 = vld [vmem:[%s4498_s1 + $0xb0] sm:$0xf0]  ;;  %v22_v45 = vld [vmem:[%s4500_s0] sm:$0xff] }
  0x12   :  { %v2894_v11 = vld [vmem:[%s4498_s1 + $0xac] sm:$0xf]  ;;  %v2250_v12 = vor.u32 %v2895_v10, %v2249_v9  ;;  %v2251_v13 = vld [vmem:[%s4498_s1 + $0xb4] sm:$0xf0]  ;;  %v2257_v14 = vld [vmem:[%s4498_s1 + $0xb0] sm:$0xf] }
  0x13   :  { %v2896_v15 = vld [vmem:[%s4498_s1 + $0xb8] sm:$0xf0]  ;;  %v2254_v16 = vor.u32 %v2894_v11, %v2251_v13  ;;  %v2237_v18 = vld [vmem:[%s4498_s1 + $0x90] sm:$0xf]  ;;  %v2891_v20 = vld [vmem:[%s4498_s1 + $0x94] sm:$0xf] }
  0x14   :  { %189 = vmatpush.bf16.msra.mxu0 %v2104_v39  ;;  %214 = vmatpush.bf16.msra.mxu2 %v2124_v44  ;;  %v2258_v17 = vor.u32 %v2896_v15, %v2257_v14  ;;  %v2892_v19 = vld [vmem:[%s4498_s1 + $0x98] sm:$0xf0]  ;;  %v2239_v22 = vld [vmem:[%s4498_s1 + $0x9c] sm:$0xf0]  ;;  %v2245_v23 = vld [vmem:[%s4498_s1 + $0x98] sm:$0xf] }
  0x15   :  { %202 = vmatpush.bf16.msra.mxu1 %v2108_v40  ;;  %440 = vmatpush.bf16.msra.mxu3 %v2250_v12  ;;  %v2238_v21 = vor.u32 %v2892_v19, %v2237_v18  ;;  %v2893_v24 = vld [vmem:[%s4498_s1 + $0xa0] sm:$0xf0]  ;;  %v2242_v25 = vor.u32 %v2891_v20, %v2239_v22  ;;  %v2225_v27 = vld [vmem:[%s4498_s1 + $0x78] sm:$0xf]  ;;  %v2888_v29 = vld [vmem:[%s4498_s1 + $0x7c] sm:$0xf] }
  0x16   :  { %v2246_v26 = vor.u32 %v2893_v24, %v2245_v23  ;;  %v2889_v28 = vld [vmem:[%s4498_s1 + $0x80] sm:$0xf0]  ;;  %v2227_v31 = vld [vmem:[%s4498_s1 + $0x84] sm:$0xf0]  ;;  %v2233_v32 = vld [vmem:[%s4498_s1 + $0x80] sm:$0xf] }
  0x17   :  { %v2226_v30 = vor.u32 %v2889_v28, %v2225_v27  ;;  %v2890_v33 = vld [vmem:[%s4498_s1 + $0x88] sm:$0xf0]  ;;  %v2230_v34 = vor.u32 %v2888_v29, %v2227_v31  ;;  %v2213_v36 = vld [vmem:[%s4498_s1 + $0x60] sm:$0xf]  ;;  %v2885_v38 = vld [vmem:[%s4498_s1 + $0x64] sm:$0xf] }
  0x18   :  { %190 = vmatpush.bf16.msra.mxu0 %v2092_v48  ;;  %215 = vmatpush.bf16.msra.mxu2 %v2112_v53  ;;  %v2234_v35 = vor.u32 %v2890_v33, %v2233_v32  ;;  %v2886_v37 = vld [vmem:[%s4498_s1 + $0x68] sm:$0xf0]  ;;  %v2215_v40 = vld [vmem:[%s4498_s1 + $0x6c] sm:$0xf0]  ;;  %v2221_v41 = vld [vmem:[%s4498_s1 + $0x68] sm:$0xf] }
  0x19   :  { %203 = vmatpush.bf16.msra.mxu1 %v2096_v49  ;;  %441 = vmatpush.bf16.msra.mxu3 %v2238_v21  ;;  %v2214_v39 = vor.u32 %v2886_v37, %v2213_v36  ;;  %v2887_v42 = vld [vmem:[%s4498_s1 + $0x70] sm:$0xf0]  ;;  %v2218_v43 = vor.u32 %v2885_v38, %v2215_v40  ;;  %v23_v46 = vld [vmem:[%s4500_s0 + $0x8] sm:$0xff]  ;;  %v2203_v52 = vld [vmem:[%s4498_s1 + $0x54] sm:$0xf0] }
  0x1a   :  { %v2222_v44 = vor.u32 %v2887_v42, %v2221_v41  ;;  %v2201_v47 = vld [vmem:[%s4498_s1 + $0x48] sm:$0xf]  ;;  %v2883_v48 = vld [vmem:[%s4498_s1 + $0x50] sm:$0xf0]  ;;  %v2882_v49 = vld [vmem:[%s4498_s1 + $0x4c] sm:$0xf] }
  0x1b   :  { %v2202_v51 = vor.u32 %v2883_v48, %v2201_v47  ;;  %v2209_v53 = vld [vmem:[%s4498_s1 + $0x50] sm:$0xf]  ;;  %v2884_v54 = vld [vmem:[%s4498_s1 + $0x58] sm:$0xf0]  ;;  %v2879_v1 = vld [vmem:[%s4498_s1 + $0x34] sm:$0xf] }
  0x1c   :  { %191 = vmatpush.bf16.msra.mxu0 %v2080_v57  ;;  %216 = vmatpush.bf16.msra.mxu2 %v2100_v62  ;;  %v2206_v57 = vor.u32 %v2882_v49, %v2203_v52  ;;  %v2189_v61 = vld [vmem:[%s4498_s1 + $0x30] sm:$0xf]  ;;  %v2880_v62 = vld [vmem:[%s4498_s1 + $0x38] sm:$0xf0]  ;;  %v2881_v5 = vld [vmem:[%s4498_s1 + $0x40] sm:$0xf0] }
  0x1d   :  { %204 = vmatpush.bf16.msra.mxu1 %v2084_v58  ;;  %442 = vmatpush.bf16.msra.mxu3 %v2226_v30  ;;  %v2210_v58 = vor.u32 %v2884_v54, %v2209_v53  ;;  %v2190_v0 = vor.u32 %v2880_v62, %v2189_v61  ;;  %v2177_v6 = vld [vmem:[%s4498_s1 + $0x18] sm:$0xf]  ;;  %v2876_v9 = vld [vmem:[%s4498_s1 + $0x1c] sm:$0xf]  ;;  %v2179_v10 = vld [vmem:[%s4498_s1 + $0x24] sm:$0xf0] }
  0x1e   :  { %v2182_v12 = vor.u32 %v2876_v9, %v2179_v10  ;;  %v2185_v13 = vld [vmem:[%s4498_s1 + $0x20] sm:$0xf]  ;;  %v2878_v14 = vld [vmem:[%s4498_s1 + $0x28] sm:$0xf0]  ;;  %v2873_v19 = vld [vmem:[%s4498_s1 + $0x4] sm:$0xf] }
  0x1f   :  { %v2165_v15 = vld [vmem:[%s4498_s1] sm:$0xf]  ;;  %v2874_v18 = vld [vmem:[%s4498_s1 + $0x8] sm:$0xf0]  ;;  %v2167_v20 = vld [vmem:[%s4498_s1 + $0xc] sm:$0xf0] }
  0x20   :  { %192 = vmatpush.bf16.msra.mxu0 %v2068_v2  ;;  %217 = vmatpush.bf16.msra.mxu2 %v2088_v4  ;;  %v2191_v2 = vld [vmem:[%s4498_s1 + $0x3c] sm:$0xf0]  ;;  %v2197_v4 = vld [vmem:[%s4498_s1 + $0x38] sm:$0xf]  ;;  %v2173_v22 = vld [vmem:[%s4498_s1 + $0x8] sm:$0xf]  ;;  %v2166_v24 = vor.u32 %v2874_v18, %v2165_v15  ;;  %v2170_v27 = vor.u32 %v2873_v19, %v2167_v20 }
  0x21   :  { %205 = vmatpush.bf16.msra.mxu1 %v2072_v3  ;;  %443 = vmatpush.bf16.msra.mxu3 %v2214_v39  ;;  %v2194_v3 = vor.u32 %v2879_v1, %v2191_v2  ;;  %v2875_v23 = vld [vmem:[%s4498_s1 + $0x10] sm:$0xf0]  ;;  %v3447_v37 = vld [vmem:[%s4499_s2] ss:$0 sm:$0xff]  ;;  %v2920_v9 = vld [vmem:[%s4498_s1 + $0xb8] sm:$0xf0] }
  0x22   :  { %v2174_v30 = vor.u32 %v2875_v23, %v2173_v22  ;;  %v24_v48 = vld [vmem:[%s4500_s0 + $0x10] sm:$0xff]  ;;  %v2917_v18 = vld [vmem:[%s4498_s1 + $0xa0] sm:$0xf0]  ;;  %v2323_v22 = vld [vmem:[%s4498_s1 + $0x78] sm:$0xf] }
  0x23   :  { %193 = vmatmul.bf16.vlgmr.msra.gmra.mxu0 %v3124_v8  ;;  %v2913_v23 = vld [vmem:[%s4498_s1 + $0x80] sm:$0xf0] }
  0x24   :  { %206 = vmatmul.bf16.vlgmr.msra.gmra.mxu1 %v3124_v8  ;;  %218 = vmatpush.bf16.msra.mxu2 %v2076_v7  ;;  %v2198_v7 = vor.u32 %v2881_v5, %v2197_v4  ;;  %v2919_v4 = vld [vmem:[%s4498_s1 + $0xb0] sm:$0xf0]  ;;  %v2918_v5 = vld [vmem:[%s4498_s1 + $0xac] sm:$0xf] }
  0x25   :  { %453 = vmatpush.bf16.msrb.mxu0 %v2254_v16  ;;  %466 = vmatpush.bf16.msrb.mxu1 %v2258_v17  ;;  %v2186_v17 = vor.u32 %v2878_v14, %v2185_v13  ;;  %v2916_v13 = vld [vmem:[%s4498_s1 + $0x98] sm:$0xf0]  ;;  %v2915_v14 = vld [vmem:[%s4498_s1 + $0x94] sm:$0xf] }
  0x26   :  { %444 = vmatpush.bf16.msra.mxu3 %v2202_v51 }
  0x27   :  { %219 = vmatmul.bf16.vlgmr.msra.gmra.mxu2 %v3124_v8  ;;  %v2877_v8 = vld [vmem:[%s4498_s1 + $0x20] sm:$0xf0] }
  0x28   :  { %v2178_v11 = vor.u32 %v2877_v8, %v2177_v6  ;;  %v2355_v8 = vld [vmem:[%s4498_s1 + $0xb0] sm:$0xf] }
  0x29   :  { %454 = vmatpush.bf16.msrb.mxu0 %v2242_v25  ;;  %467 = vmatpush.bf16.msrb.mxu1 %v2246_v26 }
  0x2a   :  { %445 = vmatpush.bf16.msra.mxu3 %v2190_v0 }
  0x2d   :  { %455 = vmatpush.bf16.msrb.mxu0 %v2230_v34  ;;  %468 = vmatpush.bf16.msrb.mxu1 %v2234_v35 }
  0x2e   :  { %446 = vmatpush.bf16.msra.mxu3 %v2178_v11  ;;  %v2356_v11 = vor.u32 %v2920_v9, %v2355_v8  ;;  %v2901_v8 = vld [vmem:[%s4498_s1 + $0x20] sm:$0xf0]  ;;  %v2900_v9 = vld [vmem:[%s4498_s1 + $0x1c] sm:$0xf] }
  0x31   :  { %456 = vmatpush.bf16.msrb.mxu0 %v2218_v43  ;;  %469 = vmatpush.bf16.msrb.mxu1 %v2222_v44 }
  0x32   :  { %447 = vmatpush.bf16.msra.mxu3 %v2166_v24  ;;  %v2912_v24 = vld [vmem:[%s4498_s1 + $0x7c] sm:$0xf] }
  0x35   :  { %457 = vmatpush.bf16.msrb.mxu0 %v2206_v57  ;;  %470 = vmatpush.bf16.msrb.mxu1 %v2210_v58  ;;  %v3456_v58 = vld [vmem:[%s4501_s3] sm:$0xff]  }
  0x39   :  { %458 = vmatpush.bf16.msrb.mxu0 %v2194_v3  ;;  %471 = vmatpush.bf16.msrb.mxu1 %v2198_v7  ;;  %v2347_v3 = vld [vmem:[%s4498_s1 + $0xa8] sm:$0xf]  ;;  %v2349_v7 = vld [vmem:[%s4498_s1 + $0xb4] sm:$0xf0] }
  0x3a   :  { %v2348_v6 = vor.u32 %v2919_v4, %v2347_v3  ;;  %v2352_v10 = vor.u32 %v2918_v5, %v2349_v7  ;;  %v2275_v7 = vld [vmem:[%s4498_s1 + $0x18] sm:$0xf] }
  0x3c   :  { %695 = vmatpush.bf16.msrb.mxu2 %v2348_v6  ;;  %708 = vmatpush.bf16.msrb.mxu3 %v2352_v10  ;;  %v2277_v10 = vld [vmem:[%s4498_s1 + $0x24] sm:$0xf0] }
  0x3d   :  { %459 = vmatpush.bf16.msrb.mxu0 %v2182_v12  ;;  %472 = vmatpush.bf16.msrb.mxu1 %v2186_v17  ;;  %v2335_v12 = vld [vmem:[%s4498_s1 + $0x90] sm:$0xf]  ;;  %v2343_v17 = vld [vmem:[%s4498_s1 + $0x98] sm:$0xf] }
  0x3e   :  { %v2336_v15 = vor.u32 %v2916_v13, %v2335_v12  ;;  %v2344_v20 = vor.u32 %v2917_v18, %v2343_v17  ;;  %v2902_v13 = vld [vmem:[%s4498_s1 + $0x28] sm:$0xf0]  ;;  %v2263_v18 = vld [vmem:[%s4498_s1] sm:$0xf] }
  0x40   :  { %696 = vmatpush.bf16.msrb.mxu2 %v2336_v15  ;;  %v2276_v15 = vor.u32 %v2901_v8, %v2275_v7  ;;  %v2433_v8 = vld [vmem:[%s4498_s1 + $0x90] sm:$0xf] }
  0x41   :  { %460 = vmatpush.bf16.msrb.mxu0 %v2170_v27  ;;  %473 = vmatpush.bf16.msrb.mxu1 %v2174_v30  ;;  %v2331_v27 = vld [vmem:[%s4498_s1 + $0x80] sm:$0xf] }
  0x45   :  { %721 = vmatpush.bf16.msra.mxu0 %v2356_v11  ;;  %v2283_v11 = vld [vmem:[%s4498_s1 + $0x20] sm:$0xf] }
  0x46   :  { %v2284_v17 = vor.u32 %v2902_v13, %v2283_v11  ;;  %v2441_v13 = vld [vmem:[%s4498_s1 + $0x98] sm:$0xf] }
  0x49   :  { %722 = vmatpush.bf16.msra.mxu0 %v2344_v20  ;;  %v2897_v20 = vld [vmem:[%s4498_s1 + $0x4] sm:$0xf] }
  0xa0   :  { %v194_v50 = vpop.f32.mrf.mxu0 }
  0xa1   :  { %v224_v55 = vadd.f32 %v194_v50, %v22_v45  ;;  %v207_v56 = vpop.f32.mrf.mxu1 }
  0xa2   :  { %v244_v59 = vadd.f32 %v207_v56, %v23_v46 }
  0xa3   :  { %v2161_v60 = vmul.f32 -1.442695, %v224_v55 }
  0xa4   :  { %v2162_v63 = vmul.f32 -1.442695, %v244_v59 }
  0xa5   :  { %3043 = vpow2.f32 %v2161_v60 }
  0xa6   :  { %3045 = vpow2.f32 %v2162_v63  ;;  %v273_v63 = vunpack.c.l.bf16 %v3456_v58 }
  0xa8   :  { %v196_v16 = vpop.f32.mrf.mxu0 }
  0xa9   :  { %v209_v21 = vpop.f32.mrf.mxu1  ;;  %v2337_v16 = vld [vmem:[%s4498_s1 + $0x9c] sm:$0xf0] }
  0xaa   :  { %v220_v26 = vpop.f32.mrf.mxu2  ;;  %v2340_v19 = vor.u32 %v2915_v14, %v2337_v16  ;;  %v277_v21 = vld [vmem:[%s4500_s0 + $0x20] sm:$0xff]  ;;  %v2280_v16 = vor.u32 %v2900_v9, %v2277_v10  ;;  %v2940_v9 = vld [vmem:[%s4498_s1 + $0x98] sm:$0xf0]  ;;  %v2939_v10 = vld [vmem:[%s4498_s1 + $0x94] sm:$0xf] }
  0xab   :  { %v3044_v25 = vpop.eup %3043  ;;  %v264_v45 = vadd.f32 %v3447_v37, %v220_v26  ;;  %v2325_v26 = vld [vmem:[%s4498_s1 + $0x84] sm:$0xf0]  ;;  %v2434_v11 = vor.u32 %v2940_v9, %v2433_v8 }
  0xac   :  { %v3046_v28 = vpop.eup %3045  ;;  %v228_v29 = vadd.f32 1.0, %v3044_v25  ;;  %709 = vmatpush.bf16.msrb.mxu3 %v2340_v19  ;;  %v2324_v25 = vor.u32 %v2913_v23, %v2323_v22  ;;  %v2898_v19 = vld [vmem:[%s4498_s1 + $0x8] sm:$0xf0]  ;;  %v2265_v22 = vld [vmem:[%s4498_s1 + $0xc] sm:$0xf0] }
  0xad   :  { %v248_v31 = vadd.f32 1.0, %v3046_v28  ;;  %v2914_v28 = vld [vmem:[%s4498_s1 + $0x88] sm:$0xf0]  ;;  %v2271_v23 = vld [vmem:[%s4498_s1 + $0x8] sm:$0xf] }
  0xae   :  { %3047 = vrcp.f32 %v228_v29  ;;  %v240_v40 = vand.u32 2147483648, %v228_v29  ;;  %v238_v42 = vand.u32 2147483647, %v228_v29  ;;  %vm234_vm1 = vweird.f32 %v228_v29  ;;  %697 = vmatpush.bf16.msrb.mxu2 %v2324_v25 }
  0xaf   :  { %3049 = vrcp.f32 %v248_v31  ;;  %vm254_vm4 = vweird.f32 %v248_v31  ;;  %v260_v51 = vand.u32 2147483648, %v248_v31  ;;  %v258_v53 = vand.u32 2147483647, %v248_v31 }
  0xb0   :  { %v241_v46 = vor.u32 1.1754944e-38, %v240_v40  ;;  %vm239_vm3 = vcmp.eq.f32.partialorder %v238_v42, 8.507059e+37  ;;  %v2332_v30 = vor.u32 %v2914_v28, %v2331_v27  ;;  %v2319_v40 = vld [vmem:[%s4498_s1 + $0x68] sm:$0xf]  ;;  %v2264_v25 = vor.u32 %v2898_v19, %v2263_v18  ;;  %v2937_v18 = vld [vmem:[%s4498_s1 + $0x80] sm:$0xf0] }
  0xb1   :  { %v261_v56 = vor.u32 1.1754944e-38, %v260_v51  ;;  %vm259_vm7 = vcmp.eq.f32.partialorder %v258_v53, 8.507059e+37  ;;  %v2301_v51 = vld [vmem:[%s4498_s1 + $0x54] sm:$0xf0]  ;;  %v2908_v53 = vld [vmem:[%s4498_s1 + $0x58] sm:$0xf0]  ;;  %v2268_v27 = vor.u32 %v2897_v20, %v2265_v22 }
  0xb2   :  { %v222_v32 = vpop.f32.mrf.mxu2  ;;  %723 = vmatpush.bf16.msra.mxu0 %v2332_v30  ;;  %v2936_v19 = vld [vmem:[%s4498_s1 + $0x7c] sm:$0xf]  ;;  %v2429_v22 = vld [vmem:[%s4498_s1 + $0x80] sm:$0xf] }
  0xb4   :  { %v3048_v33 = vpop.eup %3047 }
  0xb5   :  { %v3050_v34 = vpop.eup %3049  ;;  %v230_v35 = vmul.f32 %v3048_v33, %v228_v29  ;;  %vm235_vm0 = vweird.f32 %v3048_v33  ;;  %v2328_v29 = vor.u32 %v2912_v24, %v2325_v26  ;;  %v2899_v24 = vld [vmem:[%s4498_s1 + $0x10] sm:$0xf0] }
  0xb6   :  { %v250_v36 = vmul.f32 %v3050_v34, %v248_v31  ;;  %vm236_vm2 = vmor %vm234_vm1, %vm235_vm0  ;;  %vm255_vm5 = vweird.f32 %v3050_v34  ;;  %v2272_v28 = vor.u32 %v2899_v24, %v2271_v23  ;;  %v2938_v23 = vld [vmem:[%s4498_s1 + $0x88] sm:$0xf0] }
  0xb7   :  { %v231_v38 = vsub.f32 1.0, %v230_v35  ;;  %vm256_vm6 = vmor %vm254_vm4, %vm255_vm5  ;;  %710 = vmatpush.bf16.msrb.mxu3 %v2328_v29  ;;  %v2910_v35 = vld [vmem:[%s4498_s1 + $0x68] sm:$0xf0] }
  0xb8   :  { %v251_v39 = vsub.f32 1.0, %v250_v36  ;;  %v2909_v36 = vld [vmem:[%s4498_s1 + $0x64] sm:$0xf] }
  0xb9   :  { %v232_v41 = vmul.f32 %v3048_v33, %v231_v38 }
  0xba   :  { %v252_v43 = vmul.f32 %v3050_v34, %v251_v39  ;;  %v2313_v39 = vld [vmem:[%s4498_s1 + $0x6c] sm:$0xf0] }
  0xbb   :  { %v233_v44 = vadd.f32 %v3048_v33, %v232_v41  ;;  %v2911_v41 = vld [vmem:[%s4498_s1 + $0x70] sm:$0xf0] }
  0xbc   :  { %v253_v50 = vadd.f32 %v3050_v34, %v252_v43  ;;  %v2316_v43 = vor.u32 %v2909_v36, %v2313_v39 }
  0xbd   :  { %v237_v47 = vsel %vm236_vm2, %v3048_v33, %v233_v44  ;;  %v2320_v44 = vor.u32 %v2911_v41, %v2319_v40 }
  0xbe   :  { %v242_v49 = vsel %vm239_vm3, %v241_v46, %v237_v47  ;;  %v257_v55 = vsel %vm256_vm6, %v3050_v34, %v253_v50  ;;  %v2311_v34 = vld [vmem:[%s4498_s1 + $0x60] sm:$0xf]  ;;  %711 = vmatpush.bf16.msrb.mxu3 %v2316_v43  ;;  %v2299_v46 = vld [vmem:[%s4498_s1 + $0x48] sm:$0xf]  ;;  %v2907_v47 = vld [vmem:[%s4498_s1 + $0x50] sm:$0xf0] }
  0xbf   :  { %v265_v52 = vmul.f32 %v264_v45, %v242_v49  ;;  %v262_v57 = vsel %vm259_vm7, %v261_v56, %v257_v55  ;;  %v2312_v38 = vor.u32 %v2910_v35, %v2311_v34  ;;  %v276_v45 = vld [vmem:[%s4500_s0 + $0x18] sm:$0xff]  ;;  %724 = vmatpush.bf16.msra.mxu0 %v2320_v44  ;;  %v2300_v50 = vor.u32 %v2907_v47, %v2299_v46  ;;  %v278_v47 = vld [vmem:[%s4500_s0 + $0x28] sm:$0xff] }
  0xc0   :  { %v268_v59 = vsub.f32 1.0, %v262_v57  ;;  %v270_v62 = vmul.f32 0.0, %v262_v57  ;;  %v2287_v57 = vld [vmem:[%s4498_s1 + $0x30] sm:$0xf] }
  0xc1   :  { %v266_v54 = vadd.f32 %v265_v52, %v24_v48  ;;  %698 = vmatpush.bf16.msrb.mxu2 %v2312_v38  ;;  %v2906_v48 = vld [vmem:[%s4498_s1 + $0x4c] sm:$0xf]  ;;  %v2307_v52 = vld [vmem:[%s4498_s1 + $0x50] sm:$0xf] }
  0xc2   :  { %v2304_v55 = vor.u32 %v2906_v48, %v2301_v51  ;;  %v2308_v56 = vor.u32 %v2908_v53, %v2307_v52 }
  0xc3   :  { %3051 = vtanh.f32 %v266_v54 }
  0xc4   :  { %712 = vmatpush.bf16.msrb.mxu3 %v2304_v55  ;;  %725 = vmatpush.bf16.msra.mxu0 %v2308_v56 }
  0xc5   :  { %699 = vmatpush.bf16.msrb.mxu2 %v2300_v50 }
  0xc9   :  { %v3052_v60 = vpop.eup %3051 }
  0xca   :  { %v269_v61 = vmul.f32 %v3052_v60, %v268_v59  ;;  %v2904_v59 = vld [vmem:[%s4498_s1 + $0x38] sm:$0xf0]  ;;  %v2903_v60 = vld [vmem:[%s4498_s1 + $0x34] sm:$0xf] }
  0xcc   :  { %v3459_v0 = vadd.f32 %v270_v62, %v269_v61  ;;  %v2288_v62 = vor.u32 %v2904_v59, %v2287_v57 }
  0xce   :  { %v274_v1 = vadd.f32 %v273_v63, %v3459_v0  ;;  %v279_v2 = vpack.c.bf16 %v3459_v0, %v3459_v0  ;;  %v2289_v63 = vld [vmem:[%s4498_s1 + $0x3c] sm:$0xf0]  ;;  %700 = vmatpush.bf16.msrb.mxu2 %v2288_v62 }
  0xcf   :  { %v2292_v5 = vor.u32 %v2903_v60, %v2289_v63  ;;  %v528_v60 = vunpack.c.h.bf16 %v3456_v58  ;;  %v2943_v58 = vld [vmem:[%s4498_s1 + $0xb0] sm:$0xf0] }
  0xd0   :  { %275 = vst [vmem:[%s4502_s4] sm:$0xff] %v274_v1  ;;  %448 = vmatmul.bf16.vlgmr.msra.gmra.mxu3 %v279_v2  ;;  %461 = vmatmul.bf16.vlgmr.msrb.gmra.mxu0 %v279_v2  ;;  %v2295_v1 = vld [vmem:[%s4498_s1 + $0x38] sm:$0xf] }
  0xd1   :  { %474 = vmatmul.bf16.vlgmr.msrb.gmra.mxu1 %v279_v2  ;;  %v2905_v2 = vld [vmem:[%s4498_s1 + $0x40] sm:$0xf0]  ;;  %713 = vmatpush.bf16.msrb.mxu3 %v2292_v5  ;;  %v2944_v5 = vld [vmem:[%s4498_s1 + $0xb8] sm:$0xf0] }
  0xd2   :  { %v2296_v6 = vor.u32 %v2905_v2, %v2295_v1  ;;  %701 = vmatpush.bf16.msrb.mxu2 %v2276_v15  ;;  %v2942_v1 = vld [vmem:[%s4498_s1 + $0xac] sm:$0xf] }
  0xd4   :  { %726 = vmatpush.bf16.msra.mxu0 %v2296_v6 }
  0xd5   :  { %714 = vmatpush.bf16.msrb.mxu3 %v2280_v16 }
  0xd6   :  { %702 = vmatpush.bf16.msrb.mxu2 %v2264_v25  ;;  %v2430_v25 = vor.u32 %v2938_v23, %v2429_v22 }
  0xd8   :  { %727 = vmatpush.bf16.msra.mxu0 %v2284_v17  ;;  %v2421_v17 = vld [vmem:[%s4498_s1 + $0x78] sm:$0xf] }
  0xd9   :  { %715 = vmatpush.bf16.msrb.mxu3 %v2268_v27  ;;  %v2422_v20 = vor.u32 %v2937_v18, %v2421_v17  ;;  %v2409_v27 = vld [vmem:[%s4498_s1 + $0x60] sm:$0xf]  ;;  %v2923_v17 = vld [vmem:[%s4498_s1 + $0x10] sm:$0xf0] }
  0xdc   :  { %728 = vmatpush.bf16.msra.mxu0 %v2272_v28  ;;  %v2934_v28 = vld [vmem:[%s4498_s1 + $0x68] sm:$0xf0] }
 0x14d   :  { %v462_v31 = vpop.f32.mrf.mxu0 }
 0x14e   :  { %v499_v32 = vadd.f32 %v462_v31, %v277_v21  ;;  %v3524_v33 = vpop.f32.mrf.mxu1 }
 0x14f   :  { %v519_v44 = vadd.f32 %v3447_v37, %v3524_v33 }
 0x150   :  { %v2260_v42 = vmul.f32 -1.442695, %v499_v32 }
 0x152   :  { %3053 = vpow2.f32 %v2260_v42 }
 0x153   :  { %v449_v49 = vpop.f32.mrf.mxu3 }
 0x154   :  { %v479_v54 = vadd.f32 %v449_v49, %v276_v45 }
 0x155   :  { %v464_v61 = vpop.f32.mrf.mxu0 }
 0x156   :  { %v2259_v3 = vmul.f32 -1.442695, %v479_v54  ;;  %v477_v4 = vpop.f32.mrf.mxu1 }
 0x157   :  { %v2453_v4 = vld [vmem:[%s4498_s1 + $0xb0] sm:$0xf] }
 0x158   :  { %v3054_v12 = vpop.eup %3053  ;;  %3055 = vpow2.f32 %v2259_v3  ;;  %v2447_v3 = vld [vmem:[%s4498_s1 + $0xb4] sm:$0xf0]  ;;  %v2454_v7 = vor.u32 %v2944_v5, %v2453_v4  ;;  %v2375_v4 = vld [vmem:[%s4498_s1 + $0x24] sm:$0xf0]  ;;  %v2381_v5 = vld [vmem:[%s4498_s1 + $0x20] sm:$0xf] }
 0x159   :  { %v503_v14 = vadd.f32 1.0, %v3054_v12  ;;  %v2450_v6 = vor.u32 %v2942_v1, %v2447_v3  ;;  %v2435_v12 = vld [vmem:[%s4498_s1 + $0x9c] sm:$0xf0]  ;;  %v2373_v1 = vld [vmem:[%s4498_s1 + $0x18] sm:$0xf] }
 0x15a   :  { %976 = vmatpush.bf16.msra.mxu3 %v2454_v7  ;;  %v2438_v15 = vor.u32 %v2939_v10, %v2435_v12  ;;  %v2924_v3 = vld [vmem:[%s4498_s1 + $0x1c] sm:$0xf]  ;;  %v2361_v10 = vld [vmem:[%s4498_s1] sm:$0xf]  ;;  %v2921_v12 = vld [vmem:[%s4498_s1 + $0x4] sm:$0xf] }
 0x15b   :  { %v451_v21 = vpop.f32.mrf.mxu3  ;;  %3057 = vrcp.f32 %v503_v14  ;;  %v515_v49 = vand.u32 2147483648, %v503_v14  ;;  %vm509_vm13 = vweird.f32 %v503_v14  ;;  %v513_v51 = vand.u32 2147483647, %v503_v14  ;;  %963 = vmatpush.bf16.msra.mxu2 %v2450_v6  ;;  %v2926_v6 = vld [vmem:[%s4498_s1 + $0x28] sm:$0xf0] }
 0x15c   :  { %v2423_v21 = vld [vmem:[%s4498_s1 + $0x84] sm:$0xf0]  ;;  %v2378_v8 = vor.u32 %v2924_v3, %v2375_v4  ;;  %v2382_v9 = vor.u32 %v2926_v6, %v2381_v5  ;;  %v2531_v4 = vld [vmem:[%s4498_s1 + $0x90] sm:$0xf]  ;;  %v2964_v5 = vld [vmem:[%s4498_s1 + $0x98] sm:$0xf0] }
 0x15d   :  { %v516_v54 = vor.u32 1.1754944e-38, %v515_v49  ;;  %vm514_vm15 = vcmp.eq.f32.partialorder %v513_v51, 8.507059e+37  ;;  %v2426_v24 = vor.u32 %v2936_v19, %v2423_v21  ;;  %v2963_v6 = vld [vmem:[%s4498_s1 + $0x94] sm:$0xf] }
 0x15e   :  { %v3056_v26 = vpop.eup %3055 }
 0x15f   :  { %v483_v29 = vadd.f32 1.0, %v3056_v26  ;;  %964 = vmatpush.bf16.msra.mxu2 %v2438_v15  ;;  %v2363_v15 = vld [vmem:[%s4498_s1 + $0xc] sm:$0xf0] }
 0x161   :  { %3059 = vrcp.f32 %v483_v29  ;;  %v3058_v30 = vpop.eup %3057  ;;  %v495_v38 = vand.u32 2147483648, %v483_v29  ;;  %v493_v40 = vand.u32 2147483647, %v483_v29  ;;  %vm489_vm9 = vweird.f32 %v483_v29 }
 0x162   :  { %v505_v31 = vmul.f32 %v3058_v30, %v503_v14  ;;  %vm510_vm12 = vweird.f32 %v3058_v30  ;;  %v2941_v14 = vld [vmem:[%s4498_s1 + $0xa0] sm:$0xf0] }
 0x163   :  { %v496_v43 = vor.u32 1.1754944e-38, %v495_v38  ;;  %vm494_vm11 = vcmp.eq.f32.partialorder %v493_v40, 8.507059e+37  ;;  %vm511_vm14 = vmor %vm509_vm13, %vm510_vm12  ;;  %v2442_v16 = vor.u32 %v2941_v14, %v2441_v13  ;;  %965 = vmatpush.bf16.msra.mxu2 %v2426_v24  ;;  %v531_v38 = vld [vmem:[%s4500_s0 + $0x30] sm:$0xff]  ;;  %v2397_v40 = vld [vmem:[%s4498_s1 + $0x48] sm:$0xf] }
 0x164   :  { %v506_v35 = vsub.f32 1.0, %v505_v31  ;;  %v2411_v31 = vld [vmem:[%s4498_s1 + $0x6c] sm:$0xf0] }
 0x165   :  { %977 = vmatpush.bf16.msra.mxu3 %v2442_v16  ;;  %v2369_v16 = vld [vmem:[%s4498_s1 + $0x8] sm:$0xf] }
 0x166   :  { %v507_v41 = vmul.f32 %v3058_v30, %v506_v35  ;;  %v2370_v21 = vor.u32 %v2923_v17, %v2369_v16  ;;  %v2521_v17 = vld [vmem:[%s4498_s1 + $0x84] sm:$0xf0] }
 0x167   :  { %v3060_v32 = vpop.eup %3059 }
 0x168   :  { %v485_v34 = vmul.f32 %v3060_v32, %v483_v29  ;;  %vm490_vm8 = vweird.f32 %v3060_v32  ;;  %v508_v48 = vadd.f32 %v3058_v30, %v507_v41  ;;  %v2933_v29 = vld [vmem:[%s4498_s1 + $0x64] sm:$0xf]  ;;  %v2931_v41 = vld [vmem:[%s4498_s1 + $0x50] sm:$0xf0] }
 0x169   :  { %vm491_vm10 = vmor %vm489_vm9, %vm490_vm8  ;;  %978 = vmatpush.bf16.msra.mxu3 %v2430_v25  ;;  %v2414_v35 = vor.u32 %v2933_v29, %v2411_v31 }
 0x16a   :  { %v486_v36 = vsub.f32 1.0, %v485_v34  ;;  %v512_v53 = vsel %vm511_vm14, %v3058_v30, %v508_v48  ;;  %v2410_v30 = vor.u32 %v2934_v28, %v2409_v27  ;;  %v2935_v34 = vld [vmem:[%s4498_s1 + $0x70] sm:$0xf0]  ;;  %v2932_v48 = vld [vmem:[%s4498_s1 + $0x58] sm:$0xf0] }
 0x16b   :  { %v517_v33 = vsel %vm514_vm15, %v516_v54, %v512_v53  ;;  %966 = vmatpush.bf16.msra.mxu2 %v2414_v35  ;;  %v2385_v53 = vld [vmem:[%s4498_s1 + $0x30] sm:$0xf]  ;;  %v2928_v54 = vld [vmem:[%s4498_s1 + $0x38] sm:$0xf0] }
 0x16c   :  { %v487_v39 = vmul.f32 %v3060_v32, %v486_v36  ;;  %v523_v55 = vsub.f32 1.0, %v517_v33  ;;  %v525_v59 = vmul.f32 %v517_v33, %v3459_v0  ;;  %v2445_v0 = vld [vmem:[%s4498_s1 + $0xa8] sm:$0xf]  ;;  %v2927_v33 = vld [vmem:[%s4498_s1 + $0x34] sm:$0xf] }
 0x16d   :  { %v2446_v2 = vor.u32 %v2943_v58, %v2445_v0 }
 0x16e   :  { %v488_v42 = vadd.f32 %v3060_v32, %v487_v39  ;;  %v532_v39 = vld [vmem:[%s4500_s0 + $0x38] sm:$0xff] }
 0x16f   :  { %950 = vmatpush.bf16.msra.mxu1 %v2446_v2  ;;  %v2925_v2 = vld [vmem:[%s4498_s1 + $0x20] sm:$0xf0] }
 0x170   :  { %v492_v45 = vsel %vm491_vm10, %v3060_v32, %v488_v42  ;;  %v2417_v32 = vld [vmem:[%s4498_s1 + $0x68] sm:$0xf]  ;;  %v2930_v42 = vld [vmem:[%s4498_s1 + $0x4c] sm:$0xf]  ;;  %v2374_v7 = vor.u32 %v2925_v2, %v2373_v1  ;;  %v2968_v1 = vld [vmem:[%s4498_s1 + $0xb8] sm:$0xf0] }
 0x171   :  { %v497_v46 = vsel %vm494_vm11, %v496_v43, %v492_v45  ;;  %v2418_v36 = vor.u32 %v2935_v34, %v2417_v32  ;;  %v2398_v45 = vor.u32 %v2931_v41, %v2397_v40 }
 0x172   :  { %v520_v50 = vmul.f32 %v519_v44, %v497_v46  ;;  %v2399_v46 = vld [vmem:[%s4498_s1 + $0x54] sm:$0xf0] }
 0x173   :  { %951 = vmatpush.bf16.msra.mxu1 %v2434_v11  ;;  %979 = vmatpush.bf16.msra.mxu3 %v2418_v36  ;;  %v2402_v51 = vor.u32 %v2930_v42, %v2399_v46  ;;  %v2922_v11 = vld [vmem:[%s4498_s1 + $0x8] sm:$0xf0] }
 0x174   :  { %v521_v52 = vadd.f32 %v520_v50, %v278_v47  ;;  %v2405_v47 = vld [vmem:[%s4498_s1 + $0x50] sm:$0xf]  ;;  %v2362_v18 = vor.u32 %v2922_v11, %v2361_v10  ;;  %v2965_v10 = vld [vmem:[%s4498_s1 + $0xa0] sm:$0xf0] }
 0x175   :  { %967 = vmatpush.bf16.msra.mxu2 %v2402_v51  ;;  %v3794_v51 = vld [vmem:[%s4501_s3 + $0x8] sm:$0xff]  }
 0x176   :  { %3061 = vtanh.f32 %v521_v52  ;;  %v2406_v52 = vor.u32 %v2932_v48, %v2405_v47 }
 0x177   :  { %952 = vmatpush.bf16.msra.mxu1 %v2422_v20  ;;  %v2366_v20 = vor.u32 %v2921_v12, %v2363_v15  ;;  %v2960_v15 = vld [vmem:[%s4498_s1 + $0x7c] sm:$0xf] }
 0x178   :  { %980 = vmatpush.bf16.msra.mxu3 %v2406_v52 }
 0x17b   :  { %953 = vmatpush.bf16.msra.mxu1 %v2410_v30 }
 0x17c   :  { %v3062_v56 = vpop.eup %3061 }
 0x17d   :  { %v524_v57 = vmul.f32 %v3062_v56, %v523_v55  ;;  %v2386_v55 = vor.u32 %v2928_v54, %v2385_v53  ;;  %v2387_v56 = vld [vmem:[%s4498_s1 + $0x3c] sm:$0xf0] }
 0x17e   :  { %v2390_v0 = vor.u32 %v2927_v33, %v2387_v56 }
 0x17f   :  { %v3626_v61 = vadd.f32 %v525_v59, %v524_v57  ;;  %954 = vmatpush.bf16.msra.mxu1 %v2398_v45  ;;  %v2393_v57 = vld [vmem:[%s4498_s1 + $0x38] sm:$0xf]  ;;  %v2929_v59 = vld [vmem:[%s4498_s1 + $0x40] sm:$0xf0] }
 0x180   :  { %v2394_v58 = vor.u32 %v2929_v59, %v2393_v57  ;;  %968 = vmatpush.bf16.msra.mxu2 %v2390_v0  ;;  %v2545_v0 = vld [vmem:[%s4498_s1 + $0xb4] sm:$0xf0] }
 0x181   :  { %v529_v62 = vadd.f32 %v528_v60, %v3626_v61  ;;  %v534_v63 = vpack.c.bf16 %v3626_v61, %v3626_v61 }
 0x182   :  { %981 = vmatpush.bf16.msra.mxu3 %v2394_v58  ;;  %v2551_v58 = vld [vmem:[%s4498_s1 + $0xb0] sm:$0xf] }
 0x183   :  { %530 = vst [vmem:[%s4502_s4 + $0x8] sm:$0xff] %v529_v62  ;;  %703 = vmatmul.bf16.vlgmr.msrb.gmra.mxu2 %v534_v63  ;;  %716 = vmatmul.bf16.vlgmr.msrb.gmra.mxu3 %v534_v63  ;;  %v2552_v3 = vor.u32 %v2968_v1, %v2551_v58  ;;  %v2473_v1 = vld [vmem:[%s4498_s1 + $0x24] sm:$0xf0] }
 0x184   :  { %729 = vmatmul.bf16.vlgmr.msra.gmra.mxu0 %v534_v63  ;;  %955 = vmatpush.bf16.msra.mxu1 %v2386_v55  ;;  %v783_v55 = vunpack.c.l.bf16 %v3794_v51 }
 0x185   :  { %969 = vmatpush.bf16.msra.mxu2 %v2378_v8  ;;  %v2533_v8 = vld [vmem:[%s4498_s1 + $0x9c] sm:$0xf0] }
 0x186   :  { %982 = vmatpush.bf16.msra.mxu3 %v2382_v9  ;;  %v2539_v9 = vld [vmem:[%s4498_s1 + $0x98] sm:$0xf]  ;;  %v2536_v11 = vor.u32 %v2963_v6, %v2533_v8  ;;  %v2946_v8 = vld [vmem:[%s4498_s1 + $0x8] sm:$0xf0] }
 0x187   :  { %v2540_v12 = vor.u32 %v2965_v10, %v2539_v9  ;;  %v2945_v9 = vld [vmem:[%s4498_s1 + $0x4] sm:$0xf] }
 0x188   :  { %956 = vmatpush.bf16.msra.mxu1 %v2374_v7  ;;  %v2532_v7 = vor.u32 %v2964_v5, %v2531_v4 }
 0x189   :  { %970 = vmatpush.bf16.msra.mxu2 %v2366_v20  ;;  %v2524_v20 = vor.u32 %v2960_v15, %v2521_v17 }
 0x18a   :  { %983 = vmatpush.bf16.msra.mxu3 %v2370_v21 }
 0x18c   :  { %957 = vmatpush.bf16.msra.mxu1 %v2362_v18  ;;  %v2527_v18 = vld [vmem:[%s4498_s1 + $0x80] sm:$0xf] }
 0x18d   :  { %1231 = vmatpush.bf16.msrb.mxu2 %v2552_v3  ;;  %v2950_v3 = vld [vmem:[%s4498_s1 + $0x28] sm:$0xf0] }
 0x191   :  { %1232 = vmatpush.bf16.msrb.mxu2 %v2540_v12  ;;  %v2461_v12 = vld [vmem:[%s4498_s1 + $0xc] sm:$0xf0] }
 0x201   :  { %v3688_v26 = vpop.f32.mrf.mxu0 }
 0x202   :  { %v774_v40 = vadd.f32 %v3447_v37, %v3688_v26 }
 0x206   :  { %v704_v43 = vpop.f32.mrf.mxu2  ;;  %v717_v44 = vpop.f32.mrf.mxu3 }
 0x207   :  { %v734_v49 = vadd.f32 %v704_v43, %v531_v38  ;;  %v754_v50 = vadd.f32 %v717_v44, %v532_v39  ;;  %v533_v44 = vld [vmem:[%s4500_s0 + $0x40] sm:$0xff] }
 0x209   :  { %v2357_v60 = vmul.f32 -1.442695, %v734_v49  ;;  %v2358_v62 = vmul.f32 -1.442695, %v754_v50  ;;  %v732_v63 = vpop.f32.mrf.mxu0 }
 0x20b   :  { %3063 = vpow2.f32 %v2357_v60  ;;  %v2967_v60 = vld [vmem:[%s4498_s1 + $0xb0] sm:$0xf0] }
 0x20c   :  { %3065 = vpow2.f32 %v2358_v62  ;;  %v2966_v62 = vld [vmem:[%s4498_s1 + $0xac] sm:$0xf] }
 0x20d   :  { %v2548_v2 = vor.u32 %v2966_v62, %v2545_v0  ;;  %v2949_v62 = vld [vmem:[%s4498_s1 + $0x20] sm:$0xf0] }
 0x20e   :  { %v706_v13 = vpop.f32.mrf.mxu2  ;;  %v719_v14 = vpop.f32.mrf.mxu3 }
 0x20f   :  { %1218 = vmatpush.bf16.msrb.mxu1 %v2548_v2  ;;  %v2519_v13 = vld [vmem:[%s4498_s1 + $0x78] sm:$0xf]  ;;  %v2961_v14 = vld [vmem:[%s4498_s1 + $0x80] sm:$0xf0]  ;;  %v2479_v2 = vld [vmem:[%s4498_s1 + $0x20] sm:$0xf] }
 0x210   :  { %v2520_v16 = vor.u32 %v2961_v14, %v2519_v13  ;;  %v2480_v6 = vor.u32 %v2950_v3, %v2479_v2  ;;  %v2467_v13 = vld [vmem:[%s4498_s1 + $0x8] sm:$0xf]  ;;  %v2947_v14 = vld [vmem:[%s4498_s1 + $0x10] sm:$0xf0]  ;;  %v2631_v3 = vld [vmem:[%s4498_s1 + $0x9c] sm:$0xf0] }
 0x211   :  { %v3064_v19 = vpop.eup %3063  ;;  %v2468_v17 = vor.u32 %v2947_v14, %v2467_v13  ;;  %v2625_v13 = vld [vmem:[%s4498_s1 + $0x80] sm:$0xf]  ;;  %v2986_v14 = vld [vmem:[%s4498_s1 + $0x88] sm:$0xf0] }
 0x212   :  { %v3066_v22 = vpop.eup %3065  ;;  %v738_v23 = vadd.f32 1.0, %v3064_v19  ;;  %v2962_v19 = vld [vmem:[%s4498_s1 + $0x88] sm:$0xf0] }
 0x213   :  { %v758_v24 = vadd.f32 1.0, %v3066_v22  ;;  %1219 = vmatpush.bf16.msrb.mxu1 %v2536_v11  ;;  %v2528_v21 = vor.u32 %v2962_v19, %v2527_v18  ;;  %v2507_v22 = vld [vmem:[%s4498_s1 + $0x60] sm:$0xf] }
 0x214   :  { %3067 = vrcp.f32 %v738_v23  ;;  %v750_v31 = vand.u32 2147483648, %v738_v23  ;;  %v748_v35 = vand.u32 2147483647, %v738_v23  ;;  %vm744_vm1 = vweird.f32 %v738_v23 }
 0x215   :  { %3069 = vrcp.f32 %v758_v24  ;;  %v770_v46 = vand.u32 2147483648, %v758_v24  ;;  %vm764_vm5 = vweird.f32 %v758_v24  ;;  %v768_v47 = vand.u32 2147483647, %v758_v24  ;;  %1233 = vmatpush.bf16.msrb.mxu2 %v2528_v21 }
 0x216   :  { %v751_v39 = vor.u32 1.1754944e-38, %v750_v31  ;;  %vm749_vm3 = vcmp.eq.f32.partialorder %v748_v35, 8.507059e+37  ;;  %v2955_v35 = vld [vmem:[%s4498_s1 + $0x50] sm:$0xf0] }
 0x217   :  { %v771_v50 = vor.u32 1.1754944e-38, %v770_v46  ;;  %vm769_vm7 = vcmp.eq.f32.partialorder %v768_v47, 8.507059e+37  ;;  %1220 = vmatpush.bf16.msrb.mxu1 %v2524_v20  ;;  %v787_v46 = vld [vmem:[%s4500_s0 + $0x50] sm:$0xff] }
 0x21a   :  { %v3068_v25 = vpop.eup %3067 }
 0x21b   :  { %v3070_v27 = vpop.eup %3069  ;;  %v740_v28 = vmul.f32 %v3068_v25, %v738_v23  ;;  %vm745_vm0 = vweird.f32 %v3068_v25  ;;  %v2958_v23 = vld [vmem:[%s4498_s1 + $0x68] sm:$0xf0] }
 0x21c   :  { %v760_v29 = vmul.f32 %v3070_v27, %v758_v24  ;;  %vm746_vm2 = vmor %vm744_vm1, %vm745_vm0  ;;  %vm765_vm4 = vweird.f32 %v3070_v27  ;;  %v2957_v24 = vld [vmem:[%s4498_s1 + $0x64] sm:$0xf] }
 0x21d   :  { %v741_v30 = vsub.f32 1.0, %v740_v28  ;;  %vm766_vm6 = vmor %vm764_vm5, %vm765_vm4  ;;  %v2515_v28 = vld [vmem:[%s4498_s1 + $0x68] sm:$0xf] }
 0x21e   :  { %v761_v32 = vsub.f32 1.0, %v760_v29  ;;  %v2959_v29 = vld [vmem:[%s4498_s1 + $0x70] sm:$0xf0] }
 0x21f   :  { %v742_v34 = vmul.f32 %v3068_v25, %v741_v30  ;;  %v2516_v31 = vor.u32 %v2959_v29, %v2515_v28 }
 0x220   :  { %v762_v36 = vmul.f32 %v3070_v27, %v761_v32  ;;  %v786_v32 = vld [vmem:[%s4500_s0 + $0x48] sm:$0xff] }
 0x221   :  { %v743_v38 = vadd.f32 %v3068_v25, %v742_v34  ;;  %1234 = vmatpush.bf16.msrb.mxu2 %v2516_v31  ;;  %v2495_v34 = vld [vmem:[%s4498_s1 + $0x48] sm:$0xf] }
 0x222   :  { %v763_v43 = vadd.f32 %v3070_v27, %v762_v36  ;;  %v2954_v36 = vld [vmem:[%s4498_s1 + $0x4c] sm:$0xf] }
 0x223   :  { %v747_v41 = vsel %vm746_vm2, %v3068_v25, %v743_v38  ;;  %v2508_v25 = vor.u32 %v2958_v23, %v2507_v22 }
 0x224   :  { %v752_v42 = vsel %vm749_vm3, %v751_v39, %v747_v41  ;;  %v767_v49 = vsel %vm766_vm6, %v3070_v27, %v763_v43  ;;  %v2509_v27 = vld [vmem:[%s4498_s1 + $0x6c] sm:$0xf0]  ;;  %v2496_v39 = vor.u32 %v2955_v35, %v2495_v34 }
 0x225   :  { %v775_v45 = vmul.f32 %v774_v40, %v752_v42  ;;  %v772_v26 = vsel %vm769_vm7, %v771_v50, %v767_v49  ;;  %v2512_v30 = vor.u32 %v2957_v24, %v2509_v27  ;;  %v2497_v40 = vld [vmem:[%s4498_s1 + $0x54] sm:$0xf0]  ;;  %v2503_v41 = vld [vmem:[%s4498_s1 + $0x50] sm:$0xf]  ;;  %v2956_v42 = vld [vmem:[%s4498_s1 + $0x58] sm:$0xf0] }
 0x226   :  { %v778_v52 = vsub.f32 1.0, %v772_v26  ;;  %v780_v33 = vmul.f32 %v772_v26, %v3626_v61  ;;  %v2543_v61 = vld [vmem:[%s4498_s1 + $0xa8] sm:$0xf]  ;;  %v2952_v49 = vld [vmem:[%s4498_s1 + $0x38] sm:$0xf0] }
 0x227   :  { %v776_v48 = vadd.f32 %v775_v45, %v533_v44  ;;  %v2544_v63 = vor.u32 %v2967_v60, %v2543_v61  ;;  %1221 = vmatpush.bf16.msrb.mxu1 %v2512_v30  ;;  %v2500_v44 = vor.u32 %v2954_v36, %v2497_v40  ;;  %v2504_v45 = vor.u32 %v2956_v42, %v2503_v41  ;;  %v2951_v26 = vld [vmem:[%s4498_s1 + $0x34] sm:$0xf]  ;;  %v2471_v60 = vld [vmem:[%s4498_s1 + $0x18] sm:$0xf] }
 0x228   :  { %v2472_v58 = vor.u32 %v2949_v62, %v2471_v60  ;;  %v2992_v60 = vld [vmem:[%s4498_s1 + $0xb8] sm:$0xf0] }
 0x229   :  { %3071 = vtanh.f32 %v776_v48  ;;  %1205 = vmatpush.bf16.msrb.mxu0 %v2544_v63  ;;  %1235 = vmatpush.bf16.msrb.mxu2 %v2504_v45  ;;  %v2483_v48 = vld [vmem:[%s4498_s1 + $0x30] sm:$0xf]  ;;  %v2948_v63 = vld [vmem:[%s4498_s1 + $0x1c] sm:$0xf] }
 0x22a   :  { %v2484_v50 = vor.u32 %v2952_v49, %v2483_v48  ;;  %v2476_v5 = vor.u32 %v2948_v63, %v2473_v1  ;;  %v2987_v1 = vld [vmem:[%s4498_s1 + $0x94] sm:$0xf] }
 0x22b   :  { %1222 = vmatpush.bf16.msrb.mxu1 %v2500_v44 }
 0x22d   :  { %1206 = vmatpush.bf16.msrb.mxu0 %v2532_v7  ;;  %v2459_v7 = vld [vmem:[%s4498_s1] sm:$0xf] }
 0x22e   :  { %v2460_v11 = vor.u32 %v2946_v8, %v2459_v7  ;;  %v2617_v8 = vld [vmem:[%s4498_s1 + $0x78] sm:$0xf] }
 0x22f   :  { %v3072_v53 = vpop.eup %3071 }
 0x230   :  { %v779_v54 = vmul.f32 %v3072_v53, %v778_v52  ;;  %v2485_v52 = vld [vmem:[%s4498_s1 + $0x3c] sm:$0xf0]  ;;  %v2491_v53 = vld [vmem:[%s4498_s1 + $0x38] sm:$0xf] }
 0x231   :  { %1207 = vmatpush.bf16.msrb.mxu0 %v2520_v16  ;;  %v2464_v16 = vor.u32 %v2945_v9, %v2461_v12  ;;  %v2985_v9 = vld [vmem:[%s4498_s1 + $0x80] sm:$0xf0]  ;;  %v2619_v12 = vld [vmem:[%s4498_s1 + $0x84] sm:$0xf0] }
 0x232   :  { %v3798_v56 = vadd.f32 %v780_v33, %v779_v54  ;;  %v2488_v54 = vor.u32 %v2951_v26, %v2485_v52  ;;  %v2953_v33 = vld [vmem:[%s4498_s1 + $0x40] sm:$0xf0]  ;;  %v1038_v52 = vunpack.c.h.bf16 %v3794_v51  ;;  %v2991_v51 = vld [vmem:[%s4498_s1 + $0xb0] sm:$0xf0] }
 0x234   :  { %v784_v57 = vadd.f32 %v783_v55, %v3798_v56  ;;  %v789_v59 = vpack.c.bf16 %v3798_v56, %v3798_v56  ;;  %1223 = vmatpush.bf16.msrb.mxu1 %v2488_v54 }
 0x235   :  { %1208 = vmatpush.bf16.msrb.mxu0 %v2508_v25 }
 0x236   :  { %785 = vst [vmem:[%s4502_s4 + $0x10] sm:$0xff] %v784_v57  ;;  %958 = vmatmul.bf16.vlgmr.msra.gmra.mxu1 %v789_v59  ;;  %971 = vmatmul.bf16.vlgmr.msra.gmra.mxu2 %v789_v59  ;;  %v2492_v57 = vor.u32 %v2953_v33, %v2491_v53 }
 0x237   :  { %984 = vmatmul.bf16.vlgmr.msra.gmra.mxu3 %v789_v59 }
 0x238   :  { %1236 = vmatpush.bf16.msrb.mxu2 %v2492_v57  ;;  %1224 = vmatpush.bf16.msrb.mxu1 %v2476_v5  ;;  %v2989_v5 = vld [vmem:[%s4498_s1 + $0xa0] sm:$0xf0] }
 0x239   :  { %1209 = vmatpush.bf16.msrb.mxu0 %v2496_v39 }
 0x23c   :  { %1237 = vmatpush.bf16.msrb.mxu2 %v2480_v6  ;;  %1225 = vmatpush.bf16.msrb.mxu1 %v2464_v16  ;;  %v2634_v6 = vor.u32 %v2987_v1, %v2631_v3  ;;  %v2626_v16 = vor.u32 %v2986_v14, %v2625_v13  ;;  %v2557_v1 = vld [vmem:[%s4498_s1] sm:$0xf]  ;;  %v2969_v3 = vld [vmem:[%s4498_s1 + $0x4] sm:$0xf] }
 0x23d   :  { %1210 = vmatpush.bf16.msrb.mxu0 %v2484_v50 }
 0x240   :  { %1238 = vmatpush.bf16.msrb.mxu2 %v2468_v17  ;;  %v2605_v17 = vld [vmem:[%s4498_s1 + $0x60] sm:$0xf] }
 0x241   :  { %1211 = vmatpush.bf16.msrb.mxu0 %v2472_v58  ;;  %v2988_v58 = vld [vmem:[%s4498_s1 + $0x98] sm:$0xf0] }
 0x245   :  { %1212 = vmatpush.bf16.msrb.mxu0 %v2460_v11  ;;  %v2618_v11 = vor.u32 %v2985_v9, %v2617_v8  ;;  %v2971_v8 = vld [vmem:[%s4498_s1 + $0x10] sm:$0xf0] }
 0x2b3   :  { %v959_v38 = vpop.f32.mrf.mxu1 }
 0x2b4   :  { %v989_v43 = vadd.f32 %v959_v38, %v786_v32  ;;  %v788_v38 = vld [vmem:[%s4500_s0 + $0x58] sm:$0xff] }
 0x2b6   :  { %v2455_v47 = vmul.f32 -1.442695, %v989_v43 }
 0x2b8   :  { %3073 = vpow2.f32 %v2455_v47 }
 0x2b9   :  { %v972_v55 = vpop.f32.mrf.mxu2 }
 0x2ba   :  { %v1009_v59 = vadd.f32 %v972_v55, %v787_v46  ;;  %v985_v61 = vpop.f32.mrf.mxu3  ;;  %v2990_v55 = vld [vmem:[%s4498_s1 + $0xac] sm:$0xf] }
 0x2bb   :  { %v961_v0 = vpop.f32.mrf.mxu1  ;;  %v1029_v36 = vadd.f32 %v3447_v37, %v985_v61  ;;  %v2649_v61 = vld [vmem:[%s4498_s1 + $0xb0] sm:$0xf] }
 0x2bc   :  { %v2456_v4 = vmul.f32 -1.442695, %v1009_v59  ;;  %v2643_v59 = vld [vmem:[%s4498_s1 + $0xb4] sm:$0xf0]  ;;  %v2650_v63 = vor.u32 %v2992_v60, %v2649_v61  ;;  %v2629_v0 = vld [vmem:[%s4498_s1 + $0x90] sm:$0xf] }
 0x2bd   :  { %v2646_v62 = vor.u32 %v2990_v55, %v2643_v59  ;;  %v2630_v2 = vor.u32 %v2988_v58, %v2629_v0  ;;  %v2972_v55 = vld [vmem:[%s4498_s1 + $0x1c] sm:$0xf]  ;;  %v2571_v60 = vld [vmem:[%s4498_s1 + $0x24] sm:$0xf0] }
 0x2be   :  { %v3074_v10 = vpop.eup %3073  ;;  %3075 = vpow2.f32 %v2456_v4  ;;  %1486 = vmatpush.bf16.msra.mxu1 %v2650_v63  ;;  %v2637_v4 = vld [vmem:[%s4498_s1 + $0x98] sm:$0xf]  ;;  %v2974_v63 = vld [vmem:[%s4498_s1 + $0x28] sm:$0xf0]  ;;  %v2574_v0 = vor.u32 %v2972_v55, %v2571_v60  ;;  %v3011_v60 = vld [vmem:[%s4498_s1 + $0x94] sm:$0xf] }
 0x2bf   :  { %v993_v15 = vadd.f32 1.0, %v3074_v10  ;;  %1473 = vmatpush.bf16.msra.mxu0 %v2646_v62  ;;  %v2638_v7 = vor.u32 %v2989_v5, %v2637_v4  ;;  %v2984_v10 = vld [vmem:[%s4498_s1 + $0x7c] sm:$0xf]  ;;  %v2577_v62 = vld [vmem:[%s4498_s1 + $0x20] sm:$0xf] }
 0x2c0   :  { %v2578_v58 = vor.u32 %v2974_v63, %v2577_v62  ;;  %v2729_v63 = vld [vmem:[%s4498_s1 + $0x9c] sm:$0xf0] }
 0x2c1   :  { %3077 = vrcp.f32 %v993_v15  ;;  %v974_v18 = vpop.f32.mrf.mxu2  ;;  %v1005_v25 = vand.u32 2147483648, %v993_v15  ;;  %v1003_v28 = vand.u32 2147483647, %v993_v15  ;;  %vm999_vm9 = vweird.f32 %v993_v15 }
 0x2c2   :  { %v987_v19 = vpop.f32.mrf.mxu3  ;;  %1487 = vmatpush.bf16.msra.mxu1 %v2638_v7  ;;  %v2982_v18 = vld [vmem:[%s4498_s1 + $0x68] sm:$0xf0]  ;;  %v2565_v7 = vld [vmem:[%s4498_s1 + $0x8] sm:$0xf] }
 0x2c3   :  { %v1006_v32 = vor.u32 1.1754944e-38, %v1005_v25  ;;  %vm1004_vm11 = vcmp.eq.f32.partialorder %v1003_v28, 8.507059e+37  ;;  %1474 = vmatpush.bf16.msra.mxu0 %v2634_v6  ;;  %v2981_v19 = vld [vmem:[%s4498_s1 + $0x64] sm:$0xf]  ;;  %v2559_v6 = vld [vmem:[%s4498_s1 + $0xc] sm:$0xf0] }
 0x2c4   :  { %v3076_v20 = vpop.eup %3075  ;;  %v1041_v25 = vld [vmem:[%s4500_s0 + $0x60] sm:$0xff] }
 0x2c5   :  { %v1013_v21 = vadd.f32 1.0, %v3076_v20  ;;  %v2606_v20 = vor.u32 %v2982_v18, %v2605_v17 }
 0x2c6   :  { %1488 = vmatpush.bf16.msra.mxu1 %v2626_v16 }
 0x2c7   :  { %v3078_v22 = vpop.eup %3077  ;;  %3079 = vrcp.f32 %v1013_v21  ;;  %v1025_v41 = vand.u32 2147483648, %v1013_v21  ;;  %v1023_v43 = vand.u32 2147483647, %v1013_v21  ;;  %vm1019_vm13 = vweird.f32 %v1013_v21 }
 0x2c8   :  { %v995_v23 = vmul.f32 %v3078_v22, %v993_v15  ;;  %vm1000_vm8 = vweird.f32 %v3078_v22  ;;  %v2622_v15 = vor.u32 %v2984_v10, %v2619_v12  ;;  %v2566_v12 = vor.u32 %v2971_v8, %v2565_v7  ;;  %v2717_v8 = vld [vmem:[%s4498_s1 + $0x84] sm:$0xf0] }
 0x2c9   :  { %vm1001_vm10 = vmor %vm999_vm9, %vm1000_vm8  ;;  %v1026_v46 = vor.u32 1.1754944e-38, %v1025_v41  ;;  %vm1024_vm15 = vcmp.eq.f32.partialorder %v1023_v43, 8.507059e+37 }
 0x2ca   :  { %v996_v24 = vsub.f32 1.0, %v995_v23  ;;  %1475 = vmatpush.bf16.msra.mxu0 %v2622_v15 }
 0x2cc   :  { %v997_v27 = vmul.f32 %v3078_v22, %v996_v24  ;;  %v2983_v24 = vld [vmem:[%s4498_s1 + $0x70] sm:$0xf0] }
 0x2cd   :  { %v3080_v29 = vpop.eup %3079 }
 0x2ce   :  { %v1015_v30 = vmul.f32 %v3080_v29, %v1013_v21  ;;  %v998_v31 = vadd.f32 %v3078_v22, %v997_v27  ;;  %vm1020_vm12 = vweird.f32 %v3080_v29  ;;  %v2607_v21 = vld [vmem:[%s4498_s1 + $0x6c] sm:$0xf0]  ;;  %v1042_v27 = vld [vmem:[%s4500_s0 + $0x68] sm:$0xff] }
 0x2cf   :  { %vm1021_vm14 = vmor %vm1019_vm13, %vm1020_vm12  ;;  %v2610_v23 = vor.u32 %v2981_v19, %v2607_v21 }
 0x2d0   :  { %v1016_v34 = vsub.f32 1.0, %v1015_v30  ;;  %v1002_v35 = vsel %vm1001_vm10, %v3078_v22, %v998_v31  ;;  %v2613_v22 = vld [vmem:[%s4498_s1 + $0x68] sm:$0xf]  ;;  %v2979_v30 = vld [vmem:[%s4498_s1 + $0x50] sm:$0xf0] }
 0x2d1   :  { %v1007_v39 = vsel %vm1004_vm11, %v1006_v32, %v1002_v35  ;;  %v2614_v28 = vor.u32 %v2983_v24, %v2613_v22  ;;  %1476 = vmatpush.bf16.msra.mxu0 %v2610_v23  ;;  %v2978_v31 = vld [vmem:[%s4498_s1 + $0x4c] sm:$0xf] }
 0x2d2   :  { %v1017_v40 = vmul.f32 %v3080_v29, %v1016_v34  ;;  %v1030_v42 = vmul.f32 %v1029_v36, %v1007_v39  ;;  %v2595_v36 = vld [vmem:[%s4498_s1 + $0x54] sm:$0xf0]  ;;  %v2980_v39 = vld [vmem:[%s4498_s1 + $0x58] sm:$0xf0] }
 0x2d3   :  { %1489 = vmatpush.bf16.msra.mxu1 %v2614_v28 }
 0x2d4   :  { %v1018_v44 = vadd.f32 %v3080_v29, %v1017_v40  ;;  %v1031_v45 = vadd.f32 %v1030_v42, %v788_v38  ;;  %v2601_v38 = vld [vmem:[%s4498_s1 + $0x50] sm:$0xf]  ;;  %v2598_v42 = vor.u32 %v2978_v31, %v2595_v36 }
 0x2d5   :  { %v2602_v43 = vor.u32 %v2980_v39, %v2601_v38 }
 0x2d6   :  { %v1022_v47 = vsel %vm1021_vm14, %v3080_v29, %v1018_v44  ;;  %3081 = vtanh.f32 %v1031_v45  ;;  %v2593_v29 = vld [vmem:[%s4498_s1 + $0x48] sm:$0xf]  ;;  %1477 = vmatpush.bf16.msra.mxu0 %v2598_v42 }
 0x2d7   :  { %v1027_v48 = vsel %vm1024_vm15, %v1026_v46, %v1022_v47  ;;  %v2594_v35 = vor.u32 %v2979_v30, %v2593_v29  ;;  %v2581_v46 = vld [vmem:[%s4498_s1 + $0x30] sm:$0xf]  ;;  %1490 = vmatpush.bf16.msra.mxu1 %v2602_v43  ;;  %v2976_v47 = vld [vmem:[%s4498_s1 + $0x38] sm:$0xf0]  ;;  %v4123_v29 = vld [vmem:[%s4499_s2] ss:$0 sm:$0xff] }
 0x2d8   :  { %v1033_v37 = vsub.f32 1.0, %v1027_v48  ;;  %v1035_v26 = vmul.f32 %v1027_v48, %v3798_v56  ;;  %v2641_v56 = vld [vmem:[%s4498_s1 + $0xa8] sm:$0xf]  ;;  %v2975_v48 = vld [vmem:[%s4498_s1 + $0x34] sm:$0xf] }
 0x2d9   :  { %v2642_v57 = vor.u32 %v2991_v51, %v2641_v56  ;;  %v2569_v56 = vld [vmem:[%s4498_s1 + $0x18] sm:$0xf]  ;;  %v2973_v51 = vld [vmem:[%s4498_s1 + $0x20] sm:$0xf0]  ;;  %v4132_v43 = vld [vmem:[%s4501_s3 + $0x10] sm:$0xff]  }
 0x2da   :  { %v2570_v61 = vor.u32 %v2973_v51, %v2569_v56  ;;  %v2747_v56 = vld [vmem:[%s4498_s1 + $0xb0] sm:$0xf]  ;;  %v3016_v51 = vld [vmem:[%s4498_s1 + $0xb8] sm:$0xf0] }
 0x2db   :  { %1460 = vmatpush.bf16.msrb.mxu3 %v2642_v57 }
 0x2dc   :  { %v3082_v49 = vpop.eup %3081 }
 0x2dd   :  { %v1034_v50 = vmul.f32 %v3082_v49, %v1033_v37  ;;  %v2583_v37 = vld [vmem:[%s4498_s1 + $0x3c] sm:$0xf0]  ;;  %v2582_v49 = vor.u32 %v2976_v47, %v2581_v46 }
 0x2df   :  { %v3962_v53 = vadd.f32 %v1035_v26, %v1034_v50  ;;  %1461 = vmatpush.bf16.msrb.mxu3 %v2630_v2  ;;  %v2586_v50 = vor.u32 %v2975_v48, %v2583_v37  ;;  %v2589_v26 = vld [vmem:[%s4498_s1 + $0x38] sm:$0xf]  ;;  %v2970_v2 = vld [vmem:[%s4498_s1 + $0x8] sm:$0xf0]  ;;  %v1293_v48 = vunpack.c.l.bf16 %v4132_v43 }
 0x2e0   :  { %v2558_v5 = vor.u32 %v2970_v2, %v2557_v1  ;;  %v2732_v1 = vor.u32 %v3011_v60, %v2729_v63 }
 0x2e1   :  { %v1039_v54 = vadd.f32 %v1038_v52, %v3962_v53  ;;  %v1044_v33 = vpack.c.bf16 %v3962_v53, %v3962_v53  ;;  %v2977_v52 = vld [vmem:[%s4498_s1 + $0x40] sm:$0xf0]  ;;  %1478 = vmatpush.bf16.msra.mxu0 %v2586_v50 }
 0x2e3   :  { %1040 = vst [vmem:[%s4502_s4 + $0x18] sm:$0xff] %v1039_v54  ;;  %1213 = vmatmul.bf16.vlgmr.msrb.gmra.mxu0 %v1044_v33  ;;  %1226 = vmatmul.bf16.vlgmr.msrb.gmra.mxu1 %v1044_v33  ;;  %v2590_v54 = vor.u32 %v2977_v52, %v2589_v26  ;;  %v3015_v26 = vld [vmem:[%s4498_s1 + $0xb0] sm:$0xf0]  ;;  %v3014_v52 = vld [vmem:[%s4498_s1 + $0xac] sm:$0xf] }
 0x2e4   :  { %1239 = vmatmul.bf16.vlgmr.msrb.gmra.mxu2 %v1044_v33  ;;  %1462 = vmatpush.bf16.msrb.mxu3 %v2618_v11  ;;  %v2562_v11 = vor.u32 %v2969_v3, %v2559_v6  ;;  %v1297_v3 = vld [vmem:[%s4500_s0 + $0x80] sm:$0xff]  ;;  %v3008_v6 = vld [vmem:[%s4498_s1 + $0x7c] sm:$0xf] }
 0x2e5   :  { %1491 = vmatpush.bf16.msra.mxu1 %v2590_v54  ;;  %1479 = vmatpush.bf16.msra.mxu0 %v2574_v0  ;;  %v2735_v0 = vld [vmem:[%s4498_s1 + $0x98] sm:$0xf] }
 0x2e8   :  { %1463 = vmatpush.bf16.msrb.mxu3 %v2606_v20 }
 0x2e9   :  { %1492 = vmatpush.bf16.msra.mxu1 %v2578_v58  ;;  %1480 = vmatpush.bf16.msra.mxu0 %v2562_v11  ;;  %v3013_v58 = vld [vmem:[%s4498_s1 + $0xa0] sm:$0xf0]  ;;  %v2720_v11 = vor.u32 %v3008_v6, %v2717_v8  ;;  %v2995_v6 = vld [vmem:[%s4498_s1 + $0x10] sm:$0xf0] }
 0x2ea   :  { %v2736_v2 = vor.u32 %v3013_v58, %v2735_v0  ;;  %v2655_v58 = vld [vmem:[%s4498_s1] sm:$0xf] }
 0x2ec   :  { %1464 = vmatpush.bf16.msrb.mxu3 %v2594_v35 }
 0x2ed   :  { %1493 = vmatpush.bf16.msra.mxu1 %v2566_v12 }
 0x2f0   :  { %1465 = vmatpush.bf16.msrb.mxu3 %v2582_v49 }
 0x2f4   :  { %1466 = vmatpush.bf16.msrb.mxu3 %v2570_v61  ;;  %v3012_v61 = vld [vmem:[%s4498_s1 + $0x98] sm:$0xf0] }
 0x2f8   :  { %1467 = vmatpush.bf16.msrb.mxu3 %v2558_v5  ;;  %v3009_v5 = vld [vmem:[%s4498_s1 + $0x80] sm:$0xf0] }
 0x360   :  { %v1214_v32 = vpop.f32.mrf.mxu0  ;;  %v1227_v34 = vpop.f32.mrf.mxu1 }
 0x361   :  { %v1244_v40 = vadd.f32 %v1214_v32, %v1041_v25  ;;  %v1264_v41 = vadd.f32 %v1227_v34, %v1042_v27  ;;  %v1043_v32 = vld [vmem:[%s4500_s0 + $0x70] sm:$0xff] }
 0x363   :  { %v2553_v44 = vmul.f32 -1.442695, %v1244_v40  ;;  %v2554_v45 = vmul.f32 -1.442695, %v1264_v41 }
 0x365   :  { %3083 = vpow2.f32 %v2553_v44 }
 0x366   :  { %3085 = vpow2.f32 %v2554_v45 }
 0x367   :  { %v1240_v33 = vpop.f32.mrf.mxu2 }
 0x368   :  { %v1216_v57 = vpop.f32.mrf.mxu0  ;;  %v1229_v59 = vpop.f32.mrf.mxu1  ;;  %v1284_v30 = vadd.f32 %v4123_v29, %v1240_v33  ;;  %v2741_v33 = vld [vmem:[%s4498_s1 + $0xb4] sm:$0xf0] }
 0x369   :  { %v2744_v55 = vor.u32 %v3014_v52, %v2741_v33  ;;  %v2748_v57 = vor.u32 %v3016_v51, %v2747_v56  ;;  %v2727_v59 = vld [vmem:[%s4498_s1 + $0x90] sm:$0xf]  ;;  %v2667_v33 = vld [vmem:[%s4498_s1 + $0x18] sm:$0xf]  ;;  %v2997_v56 = vld [vmem:[%s4498_s1 + $0x20] sm:$0xf0] }
 0x36a   :  { %v2728_v62 = vor.u32 %v3012_v61, %v2727_v59  ;;  %v2996_v51 = vld [vmem:[%s4498_s1 + $0x1c] sm:$0xf]  ;;  %v2998_v61 = vld [vmem:[%s4498_s1 + $0x28] sm:$0xf0] }
 0x36b   :  { %v3084_v4 = vpop.eup %3083  ;;  %1728 = vmatpush.bf16.msra.mxu3 %v2744_v55  ;;  %1741 = vmatpush.bf16.msrb.mxu0 %v2748_v57  ;;  %v2669_v55 = vld [vmem:[%s4498_s1 + $0x24] sm:$0xf0]  ;;  %v2675_v57 = vld [vmem:[%s4498_s1 + $0x20] sm:$0xf] }
 0x36c   :  { %v3086_v9 = vpop.eup %3085  ;;  %v1248_v10 = vadd.f32 1.0, %v3084_v4  ;;  %v2715_v4 = vld [vmem:[%s4498_s1 + $0x78] sm:$0xf]  ;;  %v2672_v63 = vor.u32 %v2996_v51, %v2669_v55  ;;  %v2676_v0 = vor.u32 %v2998_v61, %v2675_v57  ;;  %v3036_v51 = vld [vmem:[%s4498_s1 + $0x98] sm:$0xf0] }
 0x36d   :  { %v1268_v13 = vadd.f32 1.0, %v3086_v9  ;;  %v2716_v7 = vor.u32 %v3009_v5, %v2715_v4  ;;  %v2723_v9 = vld [vmem:[%s4498_s1 + $0x80] sm:$0xf]  ;;  %v2657_v4 = vld [vmem:[%s4498_s1 + $0xc] sm:$0xf0] }
 0x36e   :  { %3087 = vrcp.f32 %v1248_v10  ;;  %v1260_v21 = vand.u32 2147483648, %v1248_v10  ;;  %v1258_v23 = vand.u32 2147483647, %v1248_v10  ;;  %vm1254_vm1 = vweird.f32 %v1248_v10  ;;  %v2663_v5 = vld [vmem:[%s4498_s1 + $0x8] sm:$0xf] }
 0x36f   :  { %3089 = vrcp.f32 %v1268_v13  ;;  %v1242_v14 = vpop.f32.mrf.mxu2  ;;  %v1280_v35 = vand.u32 2147483648, %v1268_v13  ;;  %vm1274_vm5 = vweird.f32 %v1268_v13  ;;  %v1278_v38 = vand.u32 2147483647, %v1268_v13  ;;  %1729 = vmatpush.bf16.msra.mxu3 %v2732_v1  ;;  %1742 = vmatpush.bf16.msrb.mxu0 %v2736_v2  ;;  %v2994_v1 = vld [vmem:[%s4498_s1 + $0x8] sm:$0xf0] }
 0x370   :  { %v1261_v27 = vor.u32 1.1754944e-38, %v1260_v21  ;;  %vm1259_vm3 = vcmp.eq.f32.partialorder %v1258_v23, 8.507059e+37  ;;  %v2711_v21 = vld [vmem:[%s4498_s1 + $0x68] sm:$0xf]  ;;  %v2993_v2 = vld [vmem:[%s4498_s1 + $0x4] sm:$0xf] }
 0x371   :  { %v1281_v41 = vor.u32 1.1754944e-38, %v1280_v35  ;;  %vm1279_vm7 = vcmp.eq.f32.partialorder %v1278_v38, 8.507059e+37  ;;  %v2693_v35 = vld [vmem:[%s4498_s1 + $0x54] sm:$0xf0]  ;;  %v3004_v38 = vld [vmem:[%s4498_s1 + $0x58] sm:$0xf0] }
 0x372   :  { %v3035_v55 = vld [vmem:[%s4498_s1 + $0x94] sm:$0xf]  ;;  %v2833_v61 = vld [vmem:[%s4498_s1 + $0x98] sm:$0xf] }
 0x373   :  { %1730 = vmatpush.bf16.msra.mxu3 %v2720_v11 }
 0x374   :  { %v3088_v15 = vpop.eup %3087 }
 0x375   :  { %v3090_v16 = vpop.eup %3089  ;;  %v1250_v17 = vmul.f32 %v3088_v15, %v1248_v10  ;;  %vm1255_vm0 = vweird.f32 %v3088_v15  ;;  %v3010_v10 = vld [vmem:[%s4498_s1 + $0x88] sm:$0xf0] }
 0x376   :  { %v1270_v18 = vmul.f32 %v3090_v16, %v1268_v13  ;;  %vm1256_vm2 = vmor %vm1254_vm1, %vm1255_vm0  ;;  %vm1275_vm4 = vweird.f32 %v3090_v16  ;;  %v2724_v12 = vor.u32 %v3010_v10, %v2723_v9  ;;  %v2660_v9 = vor.u32 %v2993_v2, %v2657_v4  ;;  %v2821_v4 = vld [vmem:[%s4498_s1 + $0x80] sm:$0xf] }
 0x377   :  { %v1251_v19 = vsub.f32 1.0, %v1250_v17  ;;  %vm1276_vm6 = vmor %vm1274_vm5, %vm1275_vm4  ;;  %v3006_v17 = vld [vmem:[%s4498_s1 + $0x68] sm:$0xf0]  ;;  %v2664_v10 = vor.u32 %v2995_v6, %v2663_v5 }
 0x378   :  { %v1271_v20 = vsub.f32 1.0, %v1270_v18  ;;  %1743 = vmatpush.bf16.msrb.mxu0 %v2724_v12  ;;  %v3005_v18 = vld [vmem:[%s4498_s1 + $0x64] sm:$0xf]  ;;  %v3034_v5 = vld [vmem:[%s4498_s1 + $0x88] sm:$0xf0] }
 0x379   :  { %v1252_v22 = vmul.f32 %v3088_v15, %v1251_v19 }
 0x37a   :  { %v1272_v24 = vmul.f32 %v3090_v16, %v1271_v20  ;;  %v2705_v20 = vld [vmem:[%s4498_s1 + $0x6c] sm:$0xf0] }
 0x37b   :  { %v1253_v25 = vadd.f32 %v3088_v15, %v1252_v22  ;;  %v3007_v22 = vld [vmem:[%s4498_s1 + $0x70] sm:$0xf0] }
 0x37c   :  { %v1273_v31 = vadd.f32 %v3090_v16, %v1272_v24  ;;  %v2708_v24 = vor.u32 %v3005_v18, %v2705_v20 }
 0x37d   :  { %v1257_v28 = vsel %vm1256_vm2, %v3088_v15, %v1253_v25  ;;  %v2712_v25 = vor.u32 %v3007_v22, %v2711_v21 }
 0x37e   :  { %v1262_v34 = vsel %vm1259_vm3, %v1261_v27, %v1257_v28  ;;  %v1277_v40 = vsel %vm1276_vm6, %v3090_v16, %v1273_v31  ;;  %v2703_v16 = vld [vmem:[%s4498_s1 + $0x60] sm:$0xf]  ;;  %v1296_v27 = vld [vmem:[%s4500_s0 + $0x78] sm:$0xff]  ;;  %1731 = vmatpush.bf16.msra.mxu3 %v2708_v24  ;;  %v2691_v28 = vld [vmem:[%s4498_s1 + $0x48] sm:$0xf] }
 0x37f   :  { %v1285_v36 = vmul.f32 %v1284_v30, %v1262_v34  ;;  %v1282_v42 = vsel %vm1279_vm7, %v1281_v41, %v1277_v40  ;;  %v2704_v19 = vor.u32 %v3006_v17, %v2703_v16  ;;  %1744 = vmatpush.bf16.msrb.mxu0 %v2712_v25  ;;  %v3003_v30 = vld [vmem:[%s4498_s1 + $0x50] sm:$0xf0]  ;;  %v3002_v31 = vld [vmem:[%s4498_s1 + $0x4c] sm:$0xf] }
 0x380   :  { %v1288_v44 = vsub.f32 1.0, %v1282_v42  ;;  %v1290_v47 = vmul.f32 %v1282_v42, %v3962_v53  ;;  %v2739_v53 = vld [vmem:[%s4498_s1 + $0xa8] sm:$0xf]  ;;  %v2692_v34 = vor.u32 %v3003_v30, %v2691_v28  ;;  %v2696_v40 = vor.u32 %v3002_v31, %v2693_v35  ;;  %v2679_v42 = vld [vmem:[%s4498_s1 + $0x30] sm:$0xf] }
 0x381   :  { %v1286_v39 = vadd.f32 %v1285_v36, %v1043_v32  ;;  %v2740_v54 = vor.u32 %v3015_v26, %v2739_v53  ;;  %v2699_v36 = vld [vmem:[%s4498_s1 + $0x50] sm:$0xf]  ;;  %v1298_v31 = vld [vmem:[%s4500_s0 + $0x88] sm:$0xff] }
 0x382   :  { %v2700_v41 = vor.u32 %v3004_v38, %v2699_v36  ;;  %1732 = vmatpush.bf16.msra.mxu3 %v2696_v40 }
 0x383   :  { %3091 = vtanh.f32 %v1286_v39  ;;  %1715 = vmatpush.bf16.msra.mxu2 %v2740_v54 }
 0x384   :  { %1745 = vmatpush.bf16.msrb.mxu0 %v2700_v41 }
 0x387   :  { %1716 = vmatpush.bf16.msra.mxu2 %v2728_v62  ;;  %v2668_v62 = vor.u32 %v2997_v56, %v2667_v33  ;;  %v2825_v56 = vld [vmem:[%s4498_s1 + $0x90] sm:$0xf] }
 0x388   :  { %v2826_v57 = vor.u32 %v3036_v51, %v2825_v56 }
 0x389   :  { %v3092_v45 = vpop.eup %3091 }
 0x38a   :  { %v1289_v46 = vmul.f32 %v3092_v45, %v1288_v44  ;;  %v3000_v44 = vld [vmem:[%s4498_s1 + $0x38] sm:$0xf0]  ;;  %v2999_v45 = vld [vmem:[%s4498_s1 + $0x34] sm:$0xf] }
 0x38b   :  { %1717 = vmatpush.bf16.msra.mxu2 %v2716_v7  ;;  %v2656_v7 = vor.u32 %v2994_v1, %v2655_v58  ;;  %v3033_v58 = vld [vmem:[%s4498_s1 + $0x80] sm:$0xf0]  ;;  %v3032_v1 = vld [vmem:[%s4498_s1 + $0x7c] sm:$0xf] }
 0x38c   :  { %v4136_v37 = vadd.f32 %v1290_v47, %v1289_v46  ;;  %v2680_v47 = vor.u32 %v3000_v44, %v2679_v42 }
 0x38e   :  { %v1294_v49 = vadd.f32 %v1293_v48, %v4136_v37  ;;  %v1299_v50 = vpack.c.bf16 %v4136_v37, %v4136_v37  ;;  %v2681_v48 = vld [vmem:[%s4498_s1 + $0x3c] sm:$0xf0] }
 0x38f   :  { %1718 = vmatpush.bf16.msra.mxu2 %v2704_v19  ;;  %v2684_v52 = vor.u32 %v2999_v45, %v2681_v48  ;;  %v1548_v45 = vunpack.c.h.bf16 %v4132_v43  ;;  %v3039_v43 = vld [vmem:[%s4498_s1 + $0xb0] sm:$0xf0] }
 0x390   :  { %1295 = vst [vmem:[%s4502_s4 + $0x20] sm:$0xff] %v1294_v49  ;;  %1468 = vmatmul.bf16.vlgmr.msrb.gmra.mxu3 %v1299_v50  ;;  %1481 = vmatmul.bf16.vlgmr.msra.gmra.mxu0 %v1299_v50  ;;  %v2687_v49 = vld [vmem:[%s4498_s1 + $0x38] sm:$0xf] }
 0x391   :  { %1494 = vmatmul.bf16.vlgmr.msra.gmra.mxu1 %v1299_v50  ;;  %v3001_v50 = vld [vmem:[%s4498_s1 + $0x40] sm:$0xf0]  ;;  %1733 = vmatpush.bf16.msra.mxu3 %v2684_v52  ;;  %v3040_v52 = vld [vmem:[%s4498_s1 + $0xb8] sm:$0xf0] }
 0x392   :  { %v2688_v54 = vor.u32 %v3001_v50, %v2687_v49  ;;  %v3038_v49 = vld [vmem:[%s4498_s1 + $0xac] sm:$0xf] }
 0x393   :  { %1719 = vmatpush.bf16.msra.mxu2 %v2692_v34 }
 0x394   :  { %1746 = vmatpush.bf16.msrb.mxu0 %v2688_v54 }
 0x395   :  { %1734 = vmatpush.bf16.msra.mxu3 %v2672_v63 }
 0x397   :  { %1720 = vmatpush.bf16.msra.mxu2 %v2680_v47 }
 0x398   :  { %1747 = vmatpush.bf16.msrb.mxu0 %v2676_v0  ;;  %v2813_v0 = vld [vmem:[%s4498_s1 + $0x78] sm:$0xf] }
 0x399   :  { %1735 = vmatpush.bf16.msra.mxu3 %v2660_v9  ;;  %v2814_v2 = vor.u32 %v3033_v58, %v2813_v0  ;;  %v2801_v9 = vld [vmem:[%s4498_s1 + $0x60] sm:$0xf]  ;;  %v3019_v0 = vld [vmem:[%s4498_s1 + $0x10] sm:$0xf0] }
 0x39b   :  { %1721 = vmatpush.bf16.msra.mxu2 %v2668_v62 }
 0x39c   :  { %1748 = vmatpush.bf16.msrb.mxu0 %v2664_v10  ;;  %v3030_v10 = vld [vmem:[%s4498_s1 + $0x68] sm:$0xf0] }
 0x39f   :  { %1722 = vmatpush.bf16.msra.mxu2 %v2656_v7  ;;  %v2822_v7 = vor.u32 %v3034_v5, %v2821_v4 }
 0x40d   :  { %v1482_v13 = vpop.f32.mrf.mxu0 }
 0x40e   :  { %v1519_v14 = vadd.f32 %v1482_v13, %v1297_v3  ;;  %v4201_v15 = vpop.f32.mrf.mxu1 }
 0x40f   :  { %v1539_v25 = vadd.f32 %v4123_v29, %v4201_v15 }
 0x410   :  { %v2652_v23 = vmul.f32 -1.442695, %v1519_v14 }
 0x412   :  { %3093 = vpow2.f32 %v2652_v23 }
 0x413   :  { %v1469_v32 = vpop.f32.mrf.mxu3 }
 0x414   :  { %v1499_v39 = vadd.f32 %v1469_v32, %v1296_v27 }
 0x415   :  { %v1484_v46 = vpop.f32.mrf.mxu0 }
 0x416   :  { %v2651_v53 = vmul.f32 -1.442695, %v1499_v39  ;;  %v1497_v26 = vpop.f32.mrf.mxu1 }
 0x417   :  { %v2845_v26 = vld [vmem:[%s4498_s1 + $0xb0] sm:$0xf] }
 0x418   :  { %v3094_v59 = vpop.eup %3093  ;;  %3095 = vpow2.f32 %v2651_v53  ;;  %v2839_v53 = vld [vmem:[%s4498_s1 + $0xb4] sm:$0xf0]  ;;  %v2846_v33 = vor.u32 %v3040_v52, %v2845_v26  ;;  %v2767_v26 = vld [vmem:[%s4498_s1 + $0x24] sm:$0xf0]  ;;  %v2773_v52 = vld [vmem:[%s4498_s1 + $0x20] sm:$0xf] }
 0x419   :  { %v1523_v60 = vadd.f32 1.0, %v3094_v59  ;;  %v2842_v54 = vor.u32 %v3038_v49, %v2839_v53  ;;  %v2827_v59 = vld [vmem:[%s4498_s1 + $0x9c] sm:$0xf0]  ;;  %v2765_v49 = vld [vmem:[%s4498_s1 + $0x18] sm:$0xf] }
 0x41a   :  { %1996 = vmatpush.bf16.msrb.mxu3 %v2846_v33  ;;  %v2830_v62 = vor.u32 %v3035_v55, %v2827_v59  ;;  %v3020_v53 = vld [vmem:[%s4498_s1 + $0x1c] sm:$0xf]  ;;  %v2753_v55 = vld [vmem:[%s4498_s1] sm:$0xf]  ;;  %v3017_v59 = vld [vmem:[%s4498_s1 + $0x4] sm:$0xf] }
 0x41b   :  { %v1471_v3 = vpop.f32.mrf.mxu3  ;;  %3097 = vrcp.f32 %v1523_v60  ;;  %v1535_v32 = vand.u32 2147483648, %v1523_v60  ;;  %vm1529_vm13 = vweird.f32 %v1523_v60  ;;  %v1533_v35 = vand.u32 2147483647, %v1523_v60  ;;  %1983 = vmatpush.bf16.msrb.mxu2 %v2842_v54  ;;  %v3022_v54 = vld [vmem:[%s4498_s1 + $0x28] sm:$0xf0] }
 0x41c   :  { %v2815_v3 = vld [vmem:[%s4498_s1 + $0x84] sm:$0xf0]  ;;  %v2770_v56 = vor.u32 %v3020_v53, %v2767_v26  ;;  %v2774_v51 = vor.u32 %v3022_v54, %v2773_v52 }
 0x41d   :  { %v1536_v39 = vor.u32 1.1754944e-38, %v1535_v32  ;;  %vm1534_vm15 = vcmp.eq.f32.partialorder %v1533_v35, 8.507059e+37  ;;  %v2818_v6 = vor.u32 %v3032_v1, %v2815_v3 }
 0x41e   :  { %v3096_v8 = vpop.eup %3095 }
 0x41f   :  { %v1503_v11 = vadd.f32 1.0, %v3096_v8  ;;  %1984 = vmatpush.bf16.msrb.mxu2 %v2830_v62  ;;  %v2755_v62 = vld [vmem:[%s4498_s1 + $0xc] sm:$0xf0] }
 0x421   :  { %3099 = vrcp.f32 %v1503_v11  ;;  %v3098_v12 = vpop.eup %3097  ;;  %v1515_v19 = vand.u32 2147483648, %v1503_v11  ;;  %v1513_v21 = vand.u32 2147483647, %v1503_v11  ;;  %vm1509_vm9 = vweird.f32 %v1503_v11 }
 0x422   :  { %v1525_v13 = vmul.f32 %v3098_v12, %v1523_v60  ;;  %vm1530_vm12 = vweird.f32 %v3098_v12  ;;  %v3037_v60 = vld [vmem:[%s4498_s1 + $0xa0] sm:$0xf0] }
 0x423   :  { %v1516_v24 = vor.u32 1.1754944e-38, %v1515_v19  ;;  %vm1514_vm11 = vcmp.eq.f32.partialorder %v1513_v21, 8.507059e+37  ;;  %vm1531_vm14 = vmor %vm1529_vm13, %vm1530_vm12  ;;  %v2834_v63 = vor.u32 %v3037_v60, %v2833_v61  ;;  %1985 = vmatpush.bf16.msrb.mxu2 %v2818_v6  ;;  %v1551_v19 = vld [vmem:[%s4500_s0 + $0x90] sm:$0xff]  ;;  %v2789_v21 = vld [vmem:[%s4498_s1 + $0x48] sm:$0xf] }
 0x424   :  { %v1526_v17 = vsub.f32 1.0, %v1525_v13  ;;  %v2803_v13 = vld [vmem:[%s4498_s1 + $0x6c] sm:$0xf0] }
 0x425   :  { %1997 = vmatpush.bf16.msrb.mxu3 %v2834_v63  ;;  %v2761_v63 = vld [vmem:[%s4498_s1 + $0x8] sm:$0xf] }
 0x426   :  { %v1527_v22 = vmul.f32 %v3098_v12, %v1526_v17  ;;  %v2762_v3 = vor.u32 %v3019_v0, %v2761_v63 }
 0x427   :  { %v3100_v14 = vpop.eup %3099 }
 0x428   :  { %v1505_v16 = vmul.f32 %v3100_v14, %v1503_v11  ;;  %vm1510_vm8 = vweird.f32 %v3100_v14  ;;  %v1528_v28 = vadd.f32 %v3098_v12, %v1527_v22  ;;  %v3029_v11 = vld [vmem:[%s4498_s1 + $0x64] sm:$0xf]  ;;  %v3027_v22 = vld [vmem:[%s4498_s1 + $0x50] sm:$0xf0] }
 0x429   :  { %vm1511_vm10 = vmor %vm1509_vm9, %vm1510_vm8  ;;  %1998 = vmatpush.bf16.msrb.mxu3 %v2822_v7  ;;  %v2806_v17 = vor.u32 %v3029_v11, %v2803_v13 }
 0x42a   :  { %v1506_v18 = vsub.f32 1.0, %v1505_v16  ;;  %v1532_v38 = vsel %vm1531_vm14, %v3098_v12, %v1528_v28  ;;  %v2802_v12 = vor.u32 %v3030_v10, %v2801_v9  ;;  %v3031_v16 = vld [vmem:[%s4498_s1 + $0x70] sm:$0xf0]  ;;  %v2791_v28 = vld [vmem:[%s4498_s1 + $0x54] sm:$0xf0] }
 0x42b   :  { %v1537_v15 = vsel %vm1534_vm15, %v1536_v39, %v1532_v38  ;;  %1986 = vmatpush.bf16.msrb.mxu2 %v2806_v17  ;;  %v2777_v38 = vld [vmem:[%s4498_s1 + $0x30] sm:$0xf]  ;;  %v3024_v39 = vld [vmem:[%s4498_s1 + $0x38] sm:$0xf0] }
 0x42c   :  { %v1507_v20 = vmul.f32 %v3100_v14, %v1506_v18  ;;  %v1543_v40 = vsub.f32 1.0, %v1537_v15  ;;  %v1545_v44 = vmul.f32 %v1537_v15, %v4136_v37  ;;  %v2837_v37 = vld [vmem:[%s4498_s1 + $0xa8] sm:$0xf]  ;;  %v3023_v15 = vld [vmem:[%s4498_s1 + $0x34] sm:$0xf] }
 0x42d   :  { %v2838_v50 = vor.u32 %v3039_v43, %v2837_v37 }
 0x42e   :  { %v1508_v23 = vadd.f32 %v3100_v14, %v1507_v20  ;;  %v1552_v20 = vld [vmem:[%s4500_s0 + $0x98] sm:$0xff] }
 0x42f   :  { %1970 = vmatpush.bf16.msrb.mxu1 %v2838_v50  ;;  %v3021_v50 = vld [vmem:[%s4498_s1 + $0x20] sm:$0xf0] }
 0x430   :  { %v1512_v27 = vsel %vm1511_vm10, %v3100_v14, %v1508_v23  ;;  %v2809_v14 = vld [vmem:[%s4498_s1 + $0x68] sm:$0xf]  ;;  %v3026_v23 = vld [vmem:[%s4498_s1 + $0x4c] sm:$0xf]  ;;  %v2766_v33 = vor.u32 %v3021_v50, %v2765_v49 }
 0x431   :  { %v1517_v30 = vsel %vm1514_vm11, %v1516_v24, %v1512_v27  ;;  %v2810_v18 = vor.u32 %v3031_v16, %v2809_v14  ;;  %v2790_v27 = vor.u32 %v3027_v22, %v2789_v21  ;;  %v2794_v35 = vor.u32 %v3026_v23, %v2791_v28 }
 0x432   :  { %v1540_v34 = vmul.f32 %v1539_v25, %v1517_v30  ;;  %v2797_v30 = vld [vmem:[%s4498_s1 + $0x50] sm:$0xf] }
 0x433   :  { %1971 = vmatpush.bf16.msrb.mxu1 %v2826_v57  ;;  %1999 = vmatpush.bf16.msrb.mxu3 %v2810_v18  ;;  %v3018_v57 = vld [vmem:[%s4498_s1 + $0x8] sm:$0xf0] }
 0x434   :  { %v1541_v36 = vadd.f32 %v1540_v34, %v1298_v31  ;;  %v3028_v31 = vld [vmem:[%s4498_s1 + $0x58] sm:$0xf0]  ;;  %1987 = vmatpush.bf16.msrb.mxu2 %v2794_v35  ;;  %v2754_v58 = vor.u32 %v3018_v57, %v2753_v55 }
 0x435   :  { %v4471_v35 = vld [vmem:[%s4501_s3 + $0x18] sm:$0xff]  }
 0x436   :  { %3101 = vtanh.f32 %v1541_v36  ;;  %v2798_v36 = vor.u32 %v3028_v31, %v2797_v30 }
 0x437   :  { %1972 = vmatpush.bf16.msrb.mxu1 %v2814_v2  ;;  %v2758_v2 = vor.u32 %v3017_v59, %v2755_v62 }
 0x438   :  { %2000 = vmatpush.bf16.msrb.mxu3 %v2798_v36 }
 0x43b   :  { %1973 = vmatpush.bf16.msrb.mxu1 %v2802_v12 }
 0x43c   :  { %v3102_v41 = vpop.eup %3101 }
 0x43d   :  { %v1544_v42 = vmul.f32 %v3102_v41, %v1543_v40  ;;  %v2778_v40 = vor.u32 %v3024_v39, %v2777_v38  ;;  %v2779_v41 = vld [vmem:[%s4498_s1 + $0x3c] sm:$0xf0] }
 0x43e   :  { %v2782_v37 = vor.u32 %v3023_v15, %v2779_v41 }
 0x43f   :  { %v4303_v46 = vadd.f32 %v1545_v44, %v1544_v42  ;;  %1974 = vmatpush.bf16.msrb.mxu1 %v2790_v27  ;;  %v2785_v42 = vld [vmem:[%s4498_s1 + $0x38] sm:$0xf]  ;;  %v3025_v44 = vld [vmem:[%s4498_s1 + $0x40] sm:$0xf0] }
 0x440   :  { %v2786_v43 = vor.u32 %v3025_v44, %v2785_v42  ;;  %1988 = vmatpush.bf16.msrb.mxu2 %v2782_v37  ;;  %v1807_v37 = vld [vmem:[%s4500_s0 + $0xb0] sm:$0xff] }
 0x441   :  { %v1549_v47 = vadd.f32 %v1548_v45, %v4303_v46  ;;  %v1554_v48 = vpack.c.bf16 %v4303_v46, %v4303_v46 }
 0x442   :  { %2001 = vmatpush.bf16.msrb.mxu3 %v2786_v43 }
 0x443   :  { %1550 = vst [vmem:[%s4502_s4 + $0x28] sm:$0xff] %v1549_v47  ;;  %1723 = vmatmul.bf16.vlgmr.msra.gmra.mxu2 %v1554_v48  ;;  %1736 = vmatmul.bf16.vlgmr.msra.gmra.mxu3 %v1554_v48 }
 0x444   :  { %1749 = vmatmul.bf16.vlgmr.msrb.gmra.mxu0 %v1554_v48  ;;  %1975 = vmatpush.bf16.msrb.mxu1 %v2778_v40  ;;  %v1803_v40 = vunpack.c.l.bf16 %v4471_v35 }
 0x445   :  { %1989 = vmatpush.bf16.msrb.mxu2 %v2770_v56 }
 0x446   :  { %2002 = vmatpush.bf16.msrb.mxu3 %v2774_v51 }
 0x448   :  { %1976 = vmatpush.bf16.msrb.mxu1 %v2766_v33 }
 0x449   :  { %1990 = vmatpush.bf16.msrb.mxu2 %v2758_v2 }
 0x44a   :  { %2003 = vmatpush.bf16.msrb.mxu3 %v2762_v3 }
 0x44c   :  { %1977 = vmatpush.bf16.msrb.mxu1 %v2754_v58 }
 0x4c1   :  { %v4365_v8 = vpop.f32.mrf.mxu0 }
 0x4c2   :  { %v1794_v21 = vadd.f32 %v4123_v29, %v4365_v8 }
 0x4c6   :  { %v1724_v24 = vpop.f32.mrf.mxu2  ;;  %v1737_v25 = vpop.f32.mrf.mxu3 }
 0x4c7   :  { %v1754_v32 = vadd.f32 %v1724_v24, %v1551_v19  ;;  %v1774_v34 = vadd.f32 %v1737_v25, %v1552_v20  ;;  %v1553_v25 = vld [vmem:[%s4500_s0 + $0xa0] sm:$0xff] }
 0x4c9   :  { %v2749_v45 = vmul.f32 -1.442695, %v1754_v32  ;;  %v2750_v47 = vmul.f32 -1.442695, %v1774_v34  ;;  %v1752_v48 = vpop.f32.mrf.mxu0 }
 0x4cb   :  { %3103 = vpow2.f32 %v2749_v45 }
 0x4cc   :  { %3105 = vpow2.f32 %v2750_v47 }
 0x4ce   :  { %v1726_v61 = vpop.f32.mrf.mxu2  ;;  %v1739_v60 = vpop.f32.mrf.mxu3 }
 0x4d1   :  { %v3104_v1 = vpop.eup %3103 }
 0x4d2   :  { %v3106_v4 = vpop.eup %3105  ;;  %v1758_v5 = vadd.f32 1.0, %v3104_v1 }
 0x4d3   :  { %v1778_v6 = vadd.f32 1.0, %v3106_v4 }
 0x4d4   :  { %3107 = vrcp.f32 %v1758_v5  ;;  %v1770_v13 = vand.u32 2147483648, %v1758_v5  ;;  %v1768_v17 = vand.u32 2147483647, %v1758_v5  ;;  %vm1764_vm1 = vweird.f32 %v1758_v5 }
 0x4d5   :  { %3109 = vrcp.f32 %v1778_v6  ;;  %v1790_v28 = vand.u32 2147483648, %v1778_v6  ;;  %vm1784_vm5 = vweird.f32 %v1778_v6  ;;  %v1788_v30 = vand.u32 2147483647, %v1778_v6 }
 0x4d6   :  { %v1771_v20 = vor.u32 1.1754944e-38, %v1770_v13  ;;  %vm1769_vm3 = vcmp.eq.f32.partialorder %v1768_v17, 8.507059e+37 }
 0x4d7   :  { %v1791_v34 = vor.u32 1.1754944e-38, %v1790_v28  ;;  %vm1789_vm7 = vcmp.eq.f32.partialorder %v1788_v30, 8.507059e+37 }
 0x4da   :  { %v3108_v7 = vpop.eup %3107 }
 0x4db   :  { %v3110_v9 = vpop.eup %3109  ;;  %v1760_v10 = vmul.f32 %v3108_v7, %v1758_v5  ;;  %vm1765_vm0 = vweird.f32 %v3108_v7 }
 0x4dc   :  { %v1780_v11 = vmul.f32 %v3110_v9, %v1778_v6  ;;  %vm1766_vm2 = vmor %vm1764_vm1, %vm1765_vm0  ;;  %vm1785_vm4 = vweird.f32 %v3110_v9  ;;  %v1808_v6 = vld [vmem:[%s4500_s0 + $0xb8] sm:$0xff] }
 0x4dd   :  { %v1761_v12 = vsub.f32 1.0, %v1760_v10  ;;  %vm1786_vm6 = vmor %vm1784_vm5, %vm1785_vm4 }
 0x4de   :  { %v1781_v14 = vsub.f32 1.0, %v1780_v11 }
 0x4df   :  { %v1762_v16 = vmul.f32 %v3108_v7, %v1761_v12 }
 0x4e0   :  { %v1782_v18 = vmul.f32 %v3110_v9, %v1781_v14 }
 0x4e1   :  { %v1763_v19 = vadd.f32 %v3108_v7, %v1762_v16 }
 0x4e2   :  { %v1783_v24 = vadd.f32 %v3110_v9, %v1782_v18 }
 0x4e3   :  { %v1767_v22 = vsel %vm1766_vm2, %v3108_v7, %v1763_v19 }
 0x4e4   :  { %v1772_v23 = vsel %vm1769_vm3, %v1771_v20, %v1767_v22  ;;  %v1787_v32 = vsel %vm1786_vm6, %v3110_v9, %v1783_v24  ;;  %v2058_v22 = vunpack.c.h.bf16 %v4471_v35 }
 0x4e5   :  { %v1795_v27 = vmul.f32 %v1794_v21, %v1772_v23  ;;  %v1792_v8 = vsel %vm1789_vm7, %v1791_v34, %v1787_v32 }
 0x4e6   :  { %v1798_v36 = vsub.f32 1.0, %v1792_v8  ;;  %v1800_v15 = vmul.f32 %v1792_v8, %v4303_v46  ;;  %v1806_v46 = vld [vmem:[%s4500_s0 + $0xa8] sm:$0xff] }
 0x4e7   :  { %v1796_v31 = vadd.f32 %v1795_v27, %v1553_v25 }
 0x4e9   :  { %3111 = vtanh.f32 %v1796_v31 }
 0x4ef   :  { %v3112_v38 = vpop.eup %3111 }
 0x4f0   :  { %v1799_v39 = vmul.f32 %v3112_v38, %v1798_v36 }
 0x4f2   :  { %v4475_v41 = vadd.f32 %v1800_v15, %v1799_v39 }
 0x4f4   :  { %v1804_v42 = vadd.f32 %v1803_v40, %v4475_v41  ;;  %v1809_v44 = vpack.c.bf16 %v4475_v41, %v4475_v41 }
 0x4f6   :  { %1805 = vst [vmem:[%s4502_s4 + $0x30] sm:$0xff] %v1804_v42  ;;  %1978 = vmatmul.bf16.vlgmr.msrb.gmra.mxu1 %v1809_v44  ;;  %1991 = vmatmul.bf16.vlgmr.msrb.gmra.mxu2 %v1809_v44 }
 0x4f7   :  { %2004 = vmatmul.bf16.vlgmr.msrb.gmra.mxu3 %v1809_v44 }
 0x573   :  { %v1979_v45 = vpop.f32.mrf.mxu1 }
 0x574   :  { %v2009_v47 = vadd.f32 %v1979_v45, %v1806_v46 }
 0x576   :  { %v2847_v48 = vmul.f32 -1.442695, %v2009_v47 }
 0x578   :  { %3113 = vpow2.f32 %v2847_v48 }
 0x579   :  { %v1992_v43 = vpop.f32.mrf.mxu2 }
 0x57a   :  { %v2029_v49 = vadd.f32 %v1992_v43, %v1807_v37  ;;  %v2005_v50 = vpop.f32.mrf.mxu3 }
 0x57b   :  { %v1981_v53 = vpop.f32.mrf.mxu1  ;;  %v2049_v5 = vadd.f32 %v4123_v29, %v2005_v50 }
 0x57c   :  { %v2848_v26 = vmul.f32 -1.442695, %v2029_v49 }
 0x57e   :  { %v3114_v52 = vpop.eup %3113  ;;  %3115 = vpow2.f32 %v2848_v26 }
 0x57f   :  { %v2013_v54 = vadd.f32 1.0, %v3114_v52 }
 0x581   :  { %3117 = vrcp.f32 %v2013_v54  ;;  %v1994_v33 = vpop.f32.mrf.mxu2  ;;  %v2025_v60 = vand.u32 2147483648, %v2013_v54  ;;  %v2023_v63 = vand.u32 2147483647, %v2013_v54  ;;  %vm2019_vm9 = vweird.f32 %v2013_v54 }
 0x582   :  { %v2007_v56 = vpop.f32.mrf.mxu3 }
 0x583   :  { %v2026_v2 = vor.u32 1.1754944e-38, %v2025_v60  ;;  %vm2024_vm11 = vcmp.eq.f32.partialorder %v2023_v63, 8.507059e+37 }
 0x584   :  { %v3116_v51 = vpop.eup %3115 }
 0x585   :  { %v2033_v55 = vadd.f32 1.0, %v3116_v51 }
 0x587   :  { %v3118_v57 = vpop.eup %3117  ;;  %3119 = vrcp.f32 %v2033_v55  ;;  %v2045_v10 = vand.u32 2147483648, %v2033_v55  ;;  %v2043_v12 = vand.u32 2147483647, %v2033_v55  ;;  %vm2039_vm13 = vweird.f32 %v2033_v55 }
 0x588   :  { %v2015_v59 = vmul.f32 %v3118_v57, %v2013_v54  ;;  %vm2020_vm8 = vweird.f32 %v3118_v57 }
 0x589   :  { %vm2021_vm10 = vmor %vm2019_vm9, %vm2020_vm8  ;;  %v2046_v16 = vor.u32 1.1754944e-38, %v2045_v10  ;;  %vm2044_vm15 = vcmp.eq.f32.partialorder %v2043_v12, 8.507059e+37 }
 0x58a   :  { %v2016_v61 = vsub.f32 1.0, %v2015_v59 }
 0x58c   :  { %v2017_v62 = vmul.f32 %v3118_v57, %v2016_v61 }
 0x58d   :  { %v3120_v0 = vpop.eup %3119 }
 0x58e   :  { %v2035_v58 = vmul.f32 %v3120_v0, %v2033_v55  ;;  %v2018_v1 = vadd.f32 %v3118_v57, %v2017_v62  ;;  %vm2040_vm12 = vweird.f32 %v3120_v0 }
 0x58f   :  { %vm2041_vm14 = vmor %vm2039_vm13, %vm2040_vm12 }
 0x590   :  { %v2036_v3 = vsub.f32 1.0, %v2035_v58  ;;  %v2022_v4 = vsel %vm2021_vm10, %v3118_v57, %v2018_v1 }
 0x591   :  { %v2027_v7 = vsel %vm2024_vm11, %v2026_v2, %v2022_v4 }
 0x592   :  { %v2037_v9 = vmul.f32 %v3120_v0, %v2036_v3  ;;  %v2050_v11 = vmul.f32 %v2049_v5, %v2027_v7 }
 0x594   :  { %v2038_v13 = vadd.f32 %v3120_v0, %v2037_v9  ;;  %v2051_v14 = vadd.f32 %v2050_v11, %v1808_v6 }
 0x596   :  { %v2042_v17 = vsel %vm2041_vm14, %v3120_v0, %v2038_v13  ;;  %3121 = vtanh.f32 %v2051_v14 }
 0x597   :  { %v2047_v18 = vsel %vm2044_vm15, %v2046_v16, %v2042_v17 }
 0x598   :  { %v2053_v29 = vsub.f32 1.0, %v2047_v18  ;;  %v2055_v21 = vmul.f32 %v2047_v18, %v4475_v41 }
 0x59c   :  { %v3122_v19 = vpop.eup %3121 }
 0x59d   :  { %v2054_v20 = vmul.f32 %v3122_v19, %v2053_v29 }
 0x59f   :  { %v2056_v23 = vadd.f32 %v2055_v21, %v2054_v20 }
 0x5a1   :  { %v2059_v24 = vadd.f32 %v2058_v22, %v2056_v23 }
 0x5a3   :  { %2060 = vst [vmem:[%s4502_s4 + $0x38] sm:$0xff] %v2059_v24 }

</bundles_post_ra>
